<compile_context>
chip_gen: v5e
topology: v5e:2x2
jax: 0.10.0
libtpu: 0.0.40
codegen_flags: <defaults>
</compile_context>

<pallas_src>
import functools

import jax
import jax.numpy as jnp
from jax.experimental import pallas as pl
from jax.experimental.pallas import tpu as pltpu

# ------------------------- small config (tiny, patch4) ----------------------
IMG = 16
PATCH = 4
IN_CH = 3
EMBED = 32
DEPTH = 2
HEADS = 4
DEC_EMBED = 16
DEC_DEPTH = 1
DEC_HEADS = 4
MLP_RATIO = 4
L = (IMG // PATCH) ** 2            # 16 patches
PATCH_DIM = PATCH * PATCH * IN_CH  # 48
EPS = 1e-6
MASK_RATIO = 0.75
EMA_DECAY = 0.999

EMA_TILE_ROWS = 64                 # (64, 128) EMA tiles: sublane/lane dense

_ARB = pltpu.CompilerParams(dimension_semantics=("arbitrary",))
_PAR = pltpu.CompilerParams(dimension_semantics=("parallel",))


def _rep_spec(a):
    """Full-array block replicated across a rank-1 grid."""
    nd = a.ndim
    shape = a.shape
    return pl.BlockSpec(shape, lambda i: (0,) * nd)


# --------------------------- fused transformer block ------------------------
def _block_kernel(*refs, heads, with_final_ln):
    if with_final_ln:
        (x_ref, ln1g, ln1b, qkvw, qkvb, projw, projb,
         ln2g, ln2b, fc1w, fc1b, fc2w, fc2b, ng, nb, o_ref) = refs
    else:
        (x_ref, ln1g, ln1b, qkvw, qkvb, projw, projb,
         ln2g, ln2b, fc1w, fc1b, fc2w, fc2b, o_ref) = refs
        ng = nb = None

    def ln(v, g_ref, b_ref):
        mu = jnp.mean(v, axis=-1, keepdims=True)
        var = jnp.mean((v - mu) ** 2, axis=-1, keepdims=True)
        return (v - mu) * jax.lax.rsqrt(var + EPS) * g_ref[...] + b_ref[...]

    x = x_ref[0].astype(jnp.float32)            # (S, D) -- resident in VMEM
    S, D = x.shape
    dh = D // heads
    scale = 1.0 / (dh ** 0.5)

    # ---- attention: LN1 -> QKV -> per-head softmax attention -> proj -------
    h = ln(x, ln1g, ln1b)
    qkv = jnp.dot(h, qkvw[...], preferred_element_type=jnp.float32) + qkvb[...]
    pw = projw[...]                             # (D, D)

    acc = jnp.zeros((S, D), jnp.float32)
    for hd in range(heads):                     # static loop; lane slices per head
        q = qkv[:, hd * dh:(hd + 1) * dh]
        k = qkv[:, D + hd * dh: D + (hd + 1) * dh]
        v = qkv[:, 2 * D + hd * dh: 2 * D + (hd + 1) * dh]
        s = jax.lax.dot_general(q, k, (((1,), (1,)), ((), ())),
                                preferred_element_type=jnp.float32) * scale
        s = s - jnp.max(s, axis=-1, keepdims=True)
        p = jnp.exp(s)
        p = p * pl.reciprocal(jnp.sum(p, axis=-1, keepdims=True), approx=True)
        o = jnp.dot(p, v, preferred_element_type=jnp.float32)      # (S, dh)
        # concat-by-heads followed by proj == sum_h o_h @ proj_w[rows_h, :]
        acc = acc + jnp.dot(o, pw[hd * dh:(hd + 1) * dh, :],
                            preferred_element_type=jnp.float32)
    x = x + acc + projb[...]

    # ---- MLP: LN2 -> fc1 -> GELU -> fc2 -> residual -------------------------
    h2 = ln(x, ln2g, ln2b)
    m = jnp.dot(h2, fc1w[...], preferred_element_type=jnp.float32) + fc1b[...]
    # TODO(synk): torch nn.GELU default is exact erf; tanh approximation used here.
    m = jax.nn.gelu(m, approximate=True)
    m = jnp.dot(m, fc2w[...], preferred_element_type=jnp.float32) + fc2b[...]
    x = x + m

    if with_final_ln:
        x = ln(x, ng, nb)

    o_ref[0] = x.astype(o_ref.dtype)


def fused_block_pallas(x, bp, heads, final_norm=None):
    """One pallas_call per transformer block; grid over batch (parallel)."""
    B, S, D = x.shape
    with_final_ln = final_norm is not None

    def vec(v):
        return v.reshape(1, -1)

    args = [x,
            vec(bp['ln1_g']), vec(bp['ln1_b']),
            bp['qkv_w'], vec(bp['qkv_b']),
            bp['proj_w'], vec(bp['proj_b']),
            vec(bp['ln2_g']), vec(bp['ln2_b']),
            bp['fc1_w'], vec(bp['fc1_b']),
            bp['fc2_w'], vec(bp['fc2_b'])]
    if with_final_ln:
        args += [vec(final_norm[0]), vec(final_norm[1])]

    in_specs = ([pl.BlockSpec((1, S, D), lambda b: (b, 0, 0))]
                + [_rep_spec(a) for a in args[1:]])

    return pl.pallas_call(
        functools.partial(_block_kernel, heads=heads,
                          with_final_ln=with_final_ln),
        out_shape=jax.ShapeDtypeStruct((B, S, D), jnp.float32),
        grid=(B,),
        in_specs=in_specs,
        out_specs=pl.BlockSpec((1, S, D), lambda b: (b, 0, 0)),
        compiler_params=_PAR,
    )(*args)


# ------------------- patch embedding + positional embedding -----------------
def _embed_kernel(p_ref, w_ref, b_ref, pos_ref, o_ref):
    y = jnp.dot(p_ref[0], w_ref[...], preferred_element_type=jnp.float32)
    o_ref[0] = (y + b_ref[...] + pos_ref[0]).astype(o_ref.dtype)


def patch_embed_pallas(patches, w, b, pos):
    N, Lp, Pd = patches.shape
    D = w.shape[1]
    return pl.pallas_call(
        _embed_kernel,
        out_shape=jax.ShapeDtypeStruct((N, Lp, D), jnp.float32),
        grid=(N,),
        in_specs=[pl.BlockSpec((1, Lp, Pd), lambda n: (n, 0, 0)),
                  pl.BlockSpec((Pd, D), lambda n: (0, 0)),
                  pl.BlockSpec((1, D), lambda n: (0, 0)),
                  pl.BlockSpec((1, Lp, D), lambda n: (0, 0, 0))],
        out_specs=pl.BlockSpec((1, Lp, D), lambda n: (n, 0, 0)),
        compiler_params=_PAR,
    )(patches, w, b.reshape(1, D), pos)


# ----------------------------- generic small linear -------------------------
def _linear_kernel(x_ref, w_ref, b_ref, o_ref):
    o_ref[...] = (jnp.dot(x_ref[...], w_ref[...],
                          preferred_element_type=jnp.float32)
                  + b_ref[...]).astype(o_ref.dtype)


def linear_pallas(x, w, b):
    M, K = x.shape
    N = w.shape[1]
    return pl.pallas_call(
        _linear_kernel,
        out_shape=jax.ShapeDtypeStruct((M, N), jnp.float32),
        grid=(1,),
        in_specs=[pl.BlockSpec((M, K), lambda i: (0, 0)),
                  pl.BlockSpec((K, N), lambda i: (0, 0)),
                  pl.BlockSpec((1, N), lambda i: (0, 0))],
        out_specs=pl.BlockSpec((M, N), lambda i: (0, 0)),
        compiler_params=_ARB,
    )(x, w, b.reshape(1, N))


# ------------- decoder head: LN -> prediction -> masked MSE loss ------------
def _dec_head_kernel(x_ref, g_ref, b_ref, w_ref, pb_ref, tgt_ref, m_ref,
                     pred_ref, loss_ref):
    B = x_ref.shape[0]
    w = w_ref[...]
    g = g_ref[...]
    bb = b_ref[...]
    pb = pb_ref[...]
    num = jnp.zeros((1, 1), jnp.float32)
    den = jnp.zeros((1, 1), jnp.float32)
    for bi in range(B):                          # static batch loop, 2D math only
        xb = x_ref[bi].astype(jnp.float32)       # (L, Dd)
        mu = jnp.mean(xb, axis=-1, keepdims=True)
        var = jnp.mean((xb - mu) ** 2, axis=-1, keepdims=True)
        yb = (xb - mu) * jax.lax.rsqrt(var + EPS) * g + bb
        pr = jnp.dot(yb, w, preferred_element_type=jnp.float32) + pb
        pred_ref[bi] = pr.astype(pred_ref.dtype)
        diff = pr - tgt_ref[bi]
        per_patch = jnp.mean(diff * diff, axis=-1, keepdims=True)   # (L, 1)
        mb = m_ref[bi]                                              # (L, 1)
        num = num + jnp.sum(per_patch * mb, axis=(0, 1), keepdims=True)
        den = den + jnp.sum(mb, axis=(0, 1), keepdims=True)
    loss_ref[...] = num / den


def decoder_head_loss_pallas(x, g, b, w, pb, target, mask):
    B, Lp, Dd = x.shape
    Pd = w.shape[1]
    args = (x, g.reshape(1, Dd), b.reshape(1, Dd), w, pb.reshape(1, Pd),
            target, mask.reshape(B, Lp, 1))
    pred, loss = pl.pallas_call(
        _dec_head_kernel,
        out_shape=(jax.ShapeDtypeStruct((B, Lp, Pd), jnp.float32),
                   jax.ShapeDtypeStruct((1, 1), jnp.float32)),
        grid=(1,),
        in_specs=[_rep_spec(a) for a in args],
        out_specs=(pl.BlockSpec((B, Lp, Pd), lambda i: (0, 0, 0)),
                   pl.BlockSpec((1, 1), lambda i: (0, 0))),
        compiler_params=_ARB,
    )(*args)
    return pred, loss[0, 0]


# ----------------------------- EMA parameter update -------------------------
def flatten_params(params):
    """Flatten a pytree into a lane/sublane-dense (rows, 128) f32 buffer."""
    leaves = jax.tree_util.tree_leaves(params)
    flat = jnp.concatenate([jnp.ravel(l).astype(jnp.float32) for l in leaves])
    pad = (-flat.shape[0]) % (EMA_TILE_ROWS * 128)
    flat = jnp.pad(flat, (0, pad))
    return flat.reshape(-1, 128)


def unflatten_params(flat2d, template):
    """Recover a structured pytree from the flat EMA buffer (not on hot path)."""
    leaves, treedef = jax.tree_util.tree_flatten(template)
    flat = flat2d.reshape(-1)
    out, off = [], 0
    for leaf in leaves:
        out.append(flat[off:off + leaf.size].reshape(leaf.shape).astype(leaf.dtype))
        off += leaf.size
    return jax.tree_util.tree_unflatten(treedef, out)


def _ema_kernel(t_ref, s_ref, o_ref, *, decay):
    o_ref[...] = decay * t_ref[...] + (1.0 - decay) * s_ref[...]


def ema_update_pallas(target_flat, student_flat, decay):
    R = target_flat.shape[0]
    return pl.pallas_call(
        functools.partial(_ema_kernel, decay=decay),
        out_shape=jax.ShapeDtypeStruct((R, 128), jnp.float32),
        grid=(R // EMA_TILE_ROWS,),
        in_specs=[pl.BlockSpec((EMA_TILE_ROWS, 128), lambda i: (i, 0)),
                  pl.BlockSpec((EMA_TILE_ROWS, 128), lambda i: (i, 0))],
        out_specs=pl.BlockSpec((EMA_TILE_ROWS, 128), lambda i: (i, 0)),
        input_output_aliases={0: 0},             # update target buffer in place
        compiler_params=_PAR,
    )(target_flat, student_flat)


# ------------------------------- parameters ---------------------------------
def init_mae_params(key):
    state = {'key': key}

    def nxt():
        state['key'], sub = jax.random.split(state['key'])
        return sub

    def nrm(shape, scale=0.02):
        return (scale * jax.random.normal(nxt(), shape)).astype(jnp.float32)

    def zeros(shape):
        return jnp.zeros(shape, jnp.float32)

    def ones(shape):
        return jnp.ones(shape, jnp.float32)

    def block_params(dim, mlp_ratio):
        hd = dim * mlp_ratio
        return {
            'ln1_g': ones((dim,)), 'ln1_b': zeros((dim,)),
            'qkv_w': nrm((dim, 3 * dim)), 'qkv_b': zeros((3 * dim,)),
            'proj_w': nrm((dim, dim)), 'proj_b': zeros((dim,)),
            'ln2_g': ones((dim,)), 'ln2_b': zeros((dim,)),
            'fc1_w': nrm((dim, hd)), 'fc1_b': zeros((hd,)),
            'fc2_w': nrm((hd, dim)), 'fc2_b': zeros((dim,)),
        }

    params = {
        'patch_w': nrm((PATCH_DIM, EMBED)),     # conv weight pre-transposed
        'patch_b': zeros((EMBED,)),
        'cls_token': nrm((1, 1, EMBED)),
        'pos_embed': nrm((1, L + 1, EMBED)),    # deterministic random (sin-cos in MAE)
        'blocks': [block_params(EMBED, MLP_RATIO) for _ in range(DEPTH)],
        'norm_g': ones((EMBED,)), 'norm_b': zeros((EMBED,)),
        'dec_embed_w': nrm((EMBED, DEC_EMBED)), 'dec_embed_b': zeros((DEC_EMBED,)),
        'mask_token': nrm((1, 1, DEC_EMBED)),
        'dec_pos_embed': nrm((1, L + 1, DEC_EMBED)),
        'dec_blocks': [block_params(DEC_EMBED, MLP_RATIO) for _ in range(DEC_DEPTH)],
        'dec_norm_g': ones((DEC_EMBED,)), 'dec_norm_b': zeros((DEC_EMBED,)),
        'dec_pred_w': nrm((DEC_EMBED, PATCH_DIM)), 'dec_pred_b': zeros((PATCH_DIM,)),
    }
    return params


# ------------------------------- model glue ---------------------------------
def patchify(imgs):
    N, C, H, W = imgs.shape
    p = PATCH
    h, w = H // p, W // p
    x = imgs.reshape(N, C, h, p, w, p)
    x = jnp.einsum('nchpwq->nhwpqc', x)
    return x.reshape(N, h * w, p * p * C)


def random_masking(x, mask_ratio, key):
    N, Lp, D = x.shape
    len_keep = int(Lp * (1 - mask_ratio))
    noise = jax.random.uniform(key, (N, Lp))
    ids_shuffle = jnp.argsort(noise, axis=1)
    ids_restore = jnp.argsort(ids_shuffle, axis=1)
    ids_keep = ids_shuffle[:, :len_keep]
    x_masked = jnp.take_along_axis(x, ids_keep[:, :, None], axis=1)
    mask = jnp.ones((N, Lp), jnp.float32)
    mask = mask.at[:, :len_keep].set(0.0)
    mask = jnp.take_along_axis(mask, ids_restore, axis=1)
    return x_masked, mask, ids_restore


def forward_encoder(imgs, params, mask_ratio, key):
    N = imgs.shape[0]
    patches = patchify(imgs)                                     # (N, L, p*p*C)
    # fused: patch-embed matmul + bias + positional embedding add
    x = patch_embed_pallas(patches, params['patch_w'], params['patch_b'],
                           params['pos_embed'][:, 1:, :])
    x, mask, ids_restore = random_masking(x, mask_ratio, key)
    cls = params['cls_token'] + params['pos_embed'][:, :1, :]
    cls = jnp.broadcast_to(cls, (N, 1, EMBED))
    x = jnp.concatenate([cls, x], axis=1)
    nblk = len(params['blocks'])
    for i, bp in enumerate(params['blocks']):
        # final encoder LayerNorm fused into the last block
        fn = (params['norm_g'], params['norm_b']) if i == nblk - 1 else None
        x = fused_block_pallas(x, bp, HEADS, final_norm=fn)
    return x, mask, ids_restore, patches


def forward_decoder_and_loss(latent, params, ids_restore, target, mask):
    N, S, D = latent.shape
    x = linear_pallas(latent.reshape(N * S, D),
                      params['dec_embed_w'],
                      params['dec_embed_b']).reshape(N, S, DEC_EMBED)
    n_mask = L + 1 - S
    mask_tokens = jnp.broadcast_to(params['mask_token'], (N, n_mask, DEC_EMBED))
    x_ = jnp.concatenate([x[:, 1:, :], mask_tokens], axis=1)     # (N, L, Ddec)
    x_ = jnp.take_along_axis(x_, ids_restore[:, :, None], axis=1)
    x = jnp.concatenate([x[:, :1, :], x_], axis=1)
    x = x + params['dec_pos_embed']
    for bp in params['dec_blocks']:
        x = fused_block_pallas(x, bp, DEC_HEADS)
    x_tokens = x[:, 1:, :]                                       # drop cls (glue)
    # fused: decoder LayerNorm + prediction head + masked-MSE loss
    pred, loss = decoder_head_loss_pallas(
        x_tokens, params['dec_norm_g'], params['dec_norm_b'],
        params['dec_pred_w'], params['dec_pred_b'], target, mask)
    return pred, loss


def ema_mae_forward(imgs, student_params, target_flat, key,
                    mask_ratio=MASK_RATIO, ema_decay=EMA_DECAY):
    latent, mask, ids_restore, patches = forward_encoder(
        imgs, student_params, mask_ratio, key)
    pred, loss = forward_decoder_and_loss(
        latent, student_params, ids_restore, patches, mask)
    # PyTorch mutates target_model in place; here the target lives as a
    # persistent flat (rows, 128) buffer that the EMA kernel updates in place
    # (input_output_aliases) -- no per-step pytree split.
    # TODO(synk): in a real trainer the student params would also be kept
    # pre-flattened so the per-step concat below disappears entirely.
    new_target_flat = ema_update_pallas(
        target_flat, flatten_params(student_params), ema_decay)
    return (loss, pred, mask), new_target_flat


# ----------------------------------- main ------------------------------------
if __name__ == "__main__":
    key = jax.random.PRNGKey(0)
    k_param, k_img, k_mask = jax.random.split(key, 3)

    student_params = init_mae_params(k_param)
    # target_model.load_state_dict(student_model.state_dict()):
    # target parameters are held as one flat lane-dense buffer.
    target_flat = flatten_params(student_params)

    imgs = jax.random.normal(k_img, (2, IN_CH, IMG, IMG), jnp.float32)

    step = jax.jit(ema_mae_forward)
    (loss, pred, mask), new_target_flat = step(
        imgs, student_params, target_flat, k_mask)
    jax.block_until_ready((loss, pred, mask, new_target_flat))

    assert pred.shape == (2, L, PATCH_DIM)
    assert mask.shape == (2, L)
    assert loss.shape == ()
    assert new_target_flat.shape == target_flat.shape
    print("KERNEL_OK")
</pallas_src>

<mosaic_0001>
module attributes {stable_mosaic.version = 11 : i64} {
  func.func @_embed_kernel(%arg0: i32, %arg1: memref<1x16x48xf32, #tpu.memory_space<vmem>>, %arg2: memref<48x32xf32, #tpu.memory_space<vmem>>, %arg3: memref<1x32xf32, #tpu.memory_space<vmem>>, %arg4: memref<1x16x32xf32, #tpu.memory_space<vmem>>, %arg5: memref<1x16x32xf32, #tpu.memory_space<vmem>>) attributes {dimension_semantics = [#tpu.dimension_semantics<parallel>], iteration_bounds = array<i64: 2>, scalar_prefetch = 0 : i64, scratch_operands = 0 : i64, tpu.core_type = #tpu.core_type<tc>, window_params = [{transform_indices = @transform_0, window_bounds = array<i64: 1, 16, 48>}, {pipeline_mode = #tpu.pipeline_mode<synchronous>, transform_indices = @transform_1, window_bounds = array<i64: 48, 32>}, {pipeline_mode = #tpu.pipeline_mode<synchronous>, transform_indices = @transform_2, window_bounds = array<i64: 1, 32>}, {pipeline_mode = #tpu.pipeline_mode<synchronous>, transform_indices = @transform_3, window_bounds = array<i64: 1, 16, 32>}, {transform_indices = @transform_4, window_bounds = array<i64: 1, 16, 32>}]} {
    %c0 = arith.constant 0 : index
    %c0_0 = arith.constant 0 : index
    %c0_1 = arith.constant 0 : index
    %0 = vector.load %arg1[%c0, %c0_0, %c0_1] : memref<1x16x48xf32, #tpu.memory_space<vmem>>, vector<1x16x48xf32>
    %1 = vector.shape_cast %0 : vector<1x16x48xf32> to vector<16x48xf32>
    %c0_2 = arith.constant 0 : index
    %c0_3 = arith.constant 0 : index
    %2 = vector.load %arg2[%c0_2, %c0_3] : memref<48x32xf32, #tpu.memory_space<vmem>>, vector<48x32xf32>
    %cst = arith.constant dense<0.000000e+00> : vector<16x32xf32>
    %3 = tpu.matmul %1, %2, %cst {dimension_numbers = #tpu.dot_dimension_numbers<[1], [0], [0], [1], [0, 0, 1, 1], [], []>} : vector<16x48xf32>, vector<48x32xf32>, vector<16x32xf32> -> vector<16x32xf32>
    %c0_4 = arith.constant 0 : index
    %c0_5 = arith.constant 0 : index
    %4 = vector.load %arg3[%c0_4, %c0_5] : memref<1x32xf32, #tpu.memory_space<vmem>>, vector<1x32xf32>
    %5 = vector.broadcast %4 : vector<1x32xf32> to vector<16x32xf32>
    %6 = arith.addf %3, %5 : vector<16x32xf32>
    %c0_6 = arith.constant 0 : index
    %c0_7 = arith.constant 0 : index
    %c0_8 = arith.constant 0 : index
    %7 = vector.load %arg4[%c0_6, %c0_7, %c0_8] : memref<1x16x32xf32, #tpu.memory_space<vmem>>, vector<1x16x32xf32>
    %8 = vector.shape_cast %7 : vector<1x16x32xf32> to vector<16x32xf32>
    %9 = arith.addf %6, %8 : vector<16x32xf32>
    %c0_9 = arith.constant 0 : index
    %c0_10 = arith.constant 0 : index
    %c0_11 = arith.constant 0 : index
    %10 = vector.load %arg5[%c0_9, %c0_10, %c0_11] : memref<1x16x32xf32, #tpu.memory_space<vmem>>, vector<1x16x32xf32>
    %11 = vector.shape_cast %10 : vector<1x16x32xf32> to vector<16x32xf32>
    %12 = vector.shape_cast %9 : vector<16x32xf32> to vector<1x16x32xf32>
    tpu.vector_store %arg5[%c0_9, %c0_10, %c0_11], %12 {strides = array<i32>} : memref<1x16x32xf32, #tpu.memory_space<vmem>>, vector<1x16x32xf32>,
    return
  }
  func.func @transform_0(%arg0: i32) -> (i32, i32, i32) {
    %c0_i32 = arith.constant 0 : i32
    %c0_i32_0 = arith.constant 0 : i32
    %c0_i32_1 = arith.constant 0 : i32
    return %arg0, %c0_i32, %c0_i32_0 : i32, i32, i32
  }
  func.func @transform_1(%arg0: i32) -> (i32, i32) {
    %c0_i32 = arith.constant 0 : i32
    %c0_i32_0 = arith.constant 0 : i32
    %c0_i32_1 = arith.constant 0 : i32
    return %c0_i32, %c0_i32_0 : i32, i32
  }
  func.func @transform_2(%arg0: i32) -> (i32, i32) {
    %c0_i32 = arith.constant 0 : i32
    %c0_i32_0 = arith.constant 0 : i32
    %c0_i32_1 = arith.constant 0 : i32
    return %c0_i32, %c0_i32_0 : i32, i32
  }
  func.func @transform_3(%arg0: i32) -> (i32, i32, i32) {
    %c0_i32 = arith.constant 0 : i32
    %c0_i32_0 = arith.constant 0 : i32
    %c0_i32_1 = arith.constant 0 : i32
    %c0_i32_2 = arith.constant 0 : i32
    return %c0_i32, %c0_i32_0, %c0_i32_1 : i32, i32, i32
  }
  func.func @transform_4(%arg0: i32) -> (i32, i32, i32) {
    %c0_i32 = arith.constant 0 : i32
    %c0_i32_0 = arith.constant 0 : i32
    %c0_i32_1 = arith.constant 0 : i32
    return %arg0, %c0_i32, %c0_i32_0 : i32, i32, i32
  }
}

module attributes {stable_mosaic.version = 11 : i64} {
  func.func @_block_kernel(%arg0: i32, %arg1: memref<1x5x32xf32, #tpu.memory_space<vmem>>, %arg2: memref<1x32xf32, #tpu.memory_space<vmem>>, %arg3: memref<1x32xf32, #tpu.memory_space<vmem>>, %arg4: memref<32x96xf32, #tpu.memory_space<vmem>>, %arg5: memref<1x96xf32, #tpu.memory_space<vmem>>, %arg6: memref<32x32xf32, #tpu.memory_space<vmem>>, %arg7: memref<1x32xf32, #tpu.memory_space<vmem>>, %arg8: memref<1x32xf32, #tpu.memory_space<vmem>>, %arg9: memref<1x32xf32, #tpu.memory_space<vmem>>, %arg10: memref<32x128xf32, #tpu.memory_space<vmem>>, %arg11: memref<1x128xf32, #tpu.memory_space<vmem>>, %arg12: memref<128x32xf32, #tpu.memory_space<vmem>>, %arg13: memref<1x32xf32, #tpu.memory_space<vmem>>, %arg14: memref<1x5x32xf32, #tpu.memory_space<vmem>>) attributes {dimension_semantics = [#tpu.dimension_semantics<parallel>], iteration_bounds = array<i64: 2>, scalar_prefetch = 0 : i64, scratch_operands = 0 : i64, tpu.core_type = #tpu.core_type<tc>, window_params = [{transform_indices = @transform_0, window_bounds = array<i64: 1, 5, 32>}, {pipeline_mode = #tpu.pipeline_mode<synchronous>, transform_indices = @transform_1, window_bounds = array<i64: 1, 32>}, {pipeline_mode = #tpu.pipeline_mode<synchronous>, transform_indices = @transform_2, window_bounds = array<i64: 1, 32>}, {pipeline_mode = #tpu.pipeline_mode<synchronous>, transform_indices = @transform_3, window_bounds = array<i64: 32, 96>}, {pipeline_mode = #tpu.pipeline_mode<synchronous>, transform_indices = @transform_4, window_bounds = array<i64: 1, 96>}, {pipeline_mode = #tpu.pipeline_mode<synchronous>, transform_indices = @transform_5, window_bounds = array<i64: 32, 32>}, {pipeline_mode = #tpu.pipeline_mode<synchronous>, transform_indices = @transform_6, window_bounds = array<i64: 1, 32>}, {pipeline_mode = #tpu.pipeline_mode<synchronous>, transform_indices = @transform_7, window_bounds = array<i64: 1, 32>}, {pipeline_mode = #tpu.pipeline_mode<synchronous>, transform_indices = @transform_8, window_bounds = array<i64: 1, 32>}, {pipeline_mode = #tpu.pipeline_mode<synchronous>, transform_indices = @transform_9, window_bounds = array<i64: 32, 128>}, {pipeline_mode = #tpu.pipeline_mode<synchronous>, transform_indices = @transform_10, window_bounds = array<i64: 1, 128>}, {pipeline_mode = #tpu.pipeline_mode<synchronous>, transform_indices = @transform_11, window_bounds = array<i64: 128, 32>}, {pipeline_mode = #tpu.pipeline_mode<synchronous>, transform_indices = @transform_12, window_bounds = array<i64: 1, 32>}, {transform_indices = @transform_13, window_bounds = array<i64: 1, 5, 32>}]} {
    %c0 = arith.constant 0 : index
    %c0_0 = arith.constant 0 : index
    %c0_1 = arith.constant 0 : index
    %0 = vector.load %arg1[%c0, %c0_0, %c0_1] : memref<1x5x32xf32, #tpu.memory_space<vmem>>, vector<1x5x32xf32>
    %1 = vector.shape_cast %0 : vector<1x5x32xf32> to vector<5x32xf32>
    %cst = arith.constant dense<0.000000e+00> : vector<5xf32>
    %2 = vector.multi_reduction <add>, %1, %cst [1] : vector<5x32xf32> to vector<5xf32>
    %3 = vector.shape_cast %2 : vector<5xf32> to vector<5x1xf32>
    %cst_2 = arith.constant 3.200000e+01 : f32
    %4 = vector.broadcast %cst_2 : f32 to vector<5x1xf32>
    %5 = arith.divf %3, %4 : vector<5x1xf32>
    %6 = vector.broadcast %5 : vector<5x1xf32> to vector<5x32xf32>
    %7 = arith.subf %1, %6 : vector<5x32xf32>
    %8 = arith.mulf %7, %7 : vector<5x32xf32>
    %cst_3 = arith.constant dense<0.000000e+00> : vector<5xf32>
    %9 = vector.multi_reduction <add>, %8, %cst_3 [1] : vector<5x32xf32> to vector<5xf32>
    %10 = vector.shape_cast %9 : vector<5xf32> to vector<5x1xf32>
    %cst_4 = arith.constant 3.200000e+01 : f32
    %11 = vector.broadcast %cst_4 : f32 to vector<5x1xf32>
    %12 = arith.divf %10, %11 : vector<5x1xf32>
    %13 = vector.broadcast %5 : vector<5x1xf32> to vector<5x32xf32>
    %14 = arith.subf %1, %13 : vector<5x32xf32>
    %cst_5 = arith.constant 9.99999997E-7 : f32
    %15 = vector.broadcast %cst_5 : f32 to vector<5x1xf32>
    %16 = arith.addf %12, %15 : vector<5x1xf32>
    %17 = math.rsqrt %16 : vector<5x1xf32>
    %18 = vector.broadcast %17 : vector<5x1xf32> to vector<5x32xf32>
    %19 = arith.mulf %14, %18 : vector<5x32xf32>
    %c0_6 = arith.constant 0 : index
    %c0_7 = arith.constant 0 : index
    %20 = vector.load %arg2[%c0_6, %c0_7] : memref<1x32xf32, #tpu.memory_space<vmem>>, vector<1x32xf32>
    %21 = vector.broadcast %20 : vector<1x32xf32> to vector<5x32xf32>
    %22 = arith.mulf %19, %21 : vector<5x32xf32>
    %c0_8 = arith.constant 0 : index
    %c0_9 = arith.constant 0 : index
    %23 = vector.load %arg3[%c0_8, %c0_9] : memref<1x32xf32, #tpu.memory_space<vmem>>, vector<1x32xf32>
    %24 = vector.broadcast %23 : vector<1x32xf32> to vector<5x32xf32>
    %25 = arith.addf %22, %24 : vector<5x32xf32>
    %c0_10 = arith.constant 0 : index
    %c0_11 = arith.constant 0 : index
    %26 = vector.load %arg4[%c0_10, %c0_11] : memref<32x96xf32, #tpu.memory_space<vmem>>, vector<32x96xf32>
    %cst_12 = arith.constant dense<0.000000e+00> : vector<5x96xf32>
    %27 = tpu.matmul %25, %26, %cst_12 {dimension_numbers = #tpu.dot_dimension_numbers<[1], [0], [0], [1], [0, 0, 1, 1], [], []>} : vector<5x32xf32>, vector<32x96xf32>, vector<5x96xf32> -> vector<5x96xf32>
    %c0_13 = arith.constant 0 : index
    %c0_14 = arith.constant 0 : index
    %28 = vector.load %arg5[%c0_13, %c0_14] : memref<1x96xf32, #tpu.memory_space<vmem>>, vector<1x96xf32>
    %29 = vector.broadcast %28 : vector<1x96xf32> to vector<5x96xf32>
    %30 = arith.addf %27, %29 : vector<5x96xf32>
    %c0_15 = arith.constant 0 : index
    %c0_16 = arith.constant 0 : index
    %31 = vector.load %arg6[%c0_15, %c0_16] : memref<32x32xf32, #tpu.memory_space<vmem>>, vector<32x32xf32>
    %cst_17 = arith.constant 0.000000e+00 : f32
    %32 = vector.broadcast %cst_17 : f32 to vector<5x32xf32>
    %33 = vector.extract_strided_slice %30 {offsets = [0, 0], sizes = [5, 8], strides = [1, 1]} : vector<5x96xf32> to vector<5x8xf32>
    %34 = vector.extract_strided_slice %30 {offsets = [0, 32], sizes = [5, 8], strides = [1, 1]} : vector<5x96xf32> to vector<5x8xf32>
    %35 = vector.extract_strided_slice %30 {offsets = [0, 64], sizes = [5, 8], strides = [1, 1]} : vector<5x96xf32> to vector<5x8xf32>
    %cst_18 = arith.constant dense<0.000000e+00> : vector<5x5xf32>
    %36 = tpu.matmul %33, %34, %cst_18 {dimension_numbers = #tpu.dot_dimension_numbers<[1], [1], [0], [0], [0, 0, 1, 0], [], []>} : vector<5x8xf32>, vector<5x8xf32>, vector<5x5xf32> -> vector<5x5xf32>
    %cst_19 = arith.constant 0.353553385 : f32
    %37 = vector.broadcast %cst_19 : f32 to vector<5x5xf32>
    %38 = arith.mulf %36, %37 : vector<5x5xf32>
    %cst_20 = arith.constant dense<0xFF800000> : vector<5xf32>
    %39 = vector.multi_reduction <maximumf>, %38, %cst_20 [1] : vector<5x5xf32> to vector<5xf32>
    %40 = vector.shape_cast %39 : vector<5xf32> to vector<5x1xf32>
    %41 = vector.broadcast %40 : vector<5x1xf32> to vector<5x5xf32>
    %42 = arith.subf %38, %41 : vector<5x5xf32>
    %43 = math.exp %42 : vector<5x5xf32>
    %cst_21 = arith.constant dense<0.000000e+00> : vector<5xf32>
    %44 = vector.multi_reduction <add>, %43, %cst_21 [1] : vector<5x5xf32> to vector<5xf32>
    %45 = vector.shape_cast %44 : vector<5xf32> to vector<5x1xf32>
    %46 = tpu.reciprocal %45 {approx = true} : vector<5x1xf32> -> vector<5x1xf32>
    %47 = vector.broadcast %46 : vector<5x1xf32> to vector<5x5xf32>
    %48 = arith.mulf %43, %47 : vector<5x5xf32>
    %cst_22 = arith.constant dense<0.000000e+00> : vector<5x8xf32>
    %49 = tpu.matmul %48, %35, %cst_22 {dimension_numbers = #tpu.dot_dimension_numbers<[1], [0], [0], [1], [0, 0, 1, 1], [], []>} : vector<5x5xf32>, vector<5x8xf32>, vector<5x8xf32> -> vector<5x8xf32>
    %50 = vector.extract_strided_slice %31 {offsets = [0, 0], sizes = [8, 32], strides = [1, 1]} : vector<32x32xf32> to vector<8x32xf32>
    %cst_23 = arith.constant dense<0.000000e+00> : vector<5x32xf32>
    %51 = tpu.matmul %49, %50, %cst_23 {dimension_numbers = #tpu.dot_dimension_numbers<[1], [0], [0], [1], [0, 0, 1, 1], [], []>} : vector<5x8xf32>, vector<8x32xf32>, vector<5x32xf32> -> vector<5x32xf32>
    %52 = arith.addf %32, %51 : vector<5x32xf32>
    %53 = vector.extract_strided_slice %30 {offsets = [0, 8], sizes = [5, 8], strides = [1, 1]} : vector<5x96xf32> to vector<5x8xf32>
    %54 = vector.extract_strided_slice %30 {offsets = [0, 40], sizes = [5, 8], strides = [1, 1]} : vector<5x96xf32> to vector<5x8xf32>
    %55 = vector.extract_strided_slice %30 {offsets = [0, 72], sizes = [5, 8], strides = [1, 1]} : vector<5x96xf32> to vector<5x8xf32>
    %cst_24 = arith.constant dense<0.000000e+00> : vector<5x5xf32>
    %56 = tpu.matmul %53, %54, %cst_24 {dimension_numbers = #tpu.dot_dimension_numbers<[1], [1], [0], [0], [0, 0, 1, 0], [], []>} : vector<5x8xf32>, vector<5x8xf32>, vector<5x5xf32> -> vector<5x5xf32>
    %cst_25 = arith.constant 0.353553385 : f32
    %57 = vector.broadcast %cst_25 : f32 to vector<5x5xf32>
    %58 = arith.mulf %56, %57 : vector<5x5xf32>
    %cst_26 = arith.constant dense<0xFF800000> : vector<5xf32>
    %59 = vector.multi_reduction <maximumf>, %58, %cst_26 [1] : vector<5x5xf32> to vector<5xf32>
    %60 = vector.shape_cast %59 : vector<5xf32> to vector<5x1xf32>
    %61 = vector.broadcast %60 : vector<5x1xf32> to vector<5x5xf32>
    %62 = arith.subf %58, %61 : vector<5x5xf32>
    %63 = math.exp %62 : vector<5x5xf32>
    %cst_27 = arith.constant dense<0.000000e+00> : vector<5xf32>
    %64 = vector.multi_reduction <add>, %63, %cst_27 [1] : vector<5x5xf32> to vector<5xf32>
    %65 = vector.shape_cast %64 : vector<5xf32> to vector<5x1xf32>
    %66 = tpu.reciprocal %65 {approx = true} : vector<5x1xf32> -> vector<5x1xf32>
    %67 = vector.broadcast %66 : vector<5x1xf32> to vector<5x5xf32>
    %68 = arith.mulf %63, %67 : vector<5x5xf32>
    %cst_28 = arith.constant dense<0.000000e+00> : vector<5x8xf32>
    %69 = tpu.matmul %68, %55, %cst_28 {dimension_numbers = #tpu.dot_dimension_numbers<[1], [0], [0], [1], [0, 0, 1, 1], [], []>} : vector<5x5xf32>, vector<5x8xf32>, vector<5x8xf32> -> vector<5x8xf32>
    %70 = vector.extract_strided_slice %31 {offsets = [8, 0], sizes = [8, 32], strides = [1, 1]} : vector<32x32xf32> to vector<8x32xf32>
    %cst_29 = arith.constant dense<0.000000e+00> : vector<5x32xf32>
    %71 = tpu.matmul %69, %70, %cst_29 {dimension_numbers = #tpu.dot_dimension_numbers<[1], [0], [0], [1], [0, 0, 1, 1], [], []>} : vector<5x8xf32>, vector<8x32xf32>, vector<5x32xf32> -> vector<5x32xf32>
    %72 = arith.addf %52, %71 : vector<5x32xf32>
    %73 = vector.extract_strided_slice %30 {offsets = [0, 16], sizes = [5, 8], strides = [1, 1]} : vector<5x96xf32> to vector<5x8xf32>
    %74 = vector.extract_strided_slice %30 {offsets = [0, 48], sizes = [5, 8], strides = [1, 1]} : vector<5x96xf32> to vector<5x8xf32>
    %75 = vector.extract_strided_slice %30 {offsets = [0, 80], sizes = [5, 8], strides = [1, 1]} : vector<5x96xf32> to vector<5x8xf32>
    %cst_30 = arith.constant dense<0.000000e+00> : vector<5x5xf32>
    %76 = tpu.matmul %73, %74, %cst_30 {dimension_numbers = #tpu.dot_dimension_numbers<[1], [1], [0], [0], [0, 0, 1, 0], [], []>} : vector<5x8xf32>, vector<5x8xf32>, vector<5x5xf32> -> vector<5x5xf32>
    %cst_31 = arith.constant 0.353553385 : f32
    %77 = vector.broadcast %cst_31 : f32 to vector<5x5xf32>
    %78 = arith.mulf %76, %77 : vector<5x5xf32>
    %cst_32 = arith.constant dense<0xFF800000> : vector<5xf32>
    %79 = vector.multi_reduction <maximumf>, %78, %cst_32 [1] : vector<5x5xf32> to vector<5xf32>
    %80 = vector.shape_cast %79 : vector<5xf32> to vector<5x1xf32>
    %81 = vector.broadcast %80 : vector<5x1xf32> to vector<5x5xf32>
    %82 = arith.subf %78, %81 : vector<5x5xf32>
    %83 = math.exp %82 : vector<5x5xf32>
    %cst_33 = arith.constant dense<0.000000e+00> : vector<5xf32>
    %84 = vector.multi_reduction <add>, %83, %cst_33 [1] : vector<5x5xf32> to vector<5xf32>
    %85 = vector.shape_cast %84 : vector<5xf32> to vector<5x1xf32>
    %86 = tpu.reciprocal %85 {approx = true} : vector<5x1xf32> -> vector<5x1xf32>
    %87 = vector.broadcast %86 : vector<5x1xf32> to vector<5x5xf32>
    %88 = arith.mulf %83, %87 : vector<5x5xf32>
    %cst_34 = arith.constant dense<0.000000e+00> : vector<5x8xf32>
    %89 = tpu.matmul %88, %75, %cst_34 {dimension_numbers = #tpu.dot_dimension_numbers<[1], [0], [0], [1], [0, 0, 1, 1], [], []>} : vector<5x5xf32>, vector<5x8xf32>, vector<5x8xf32> -> vector<5x8xf32>
    %90 = vector.extract_strided_slice %31 {offsets = [16, 0], sizes = [8, 32], strides = [1, 1]} : vector<32x32xf32> to vector<8x32xf32>
    %cst_35 = arith.constant dense<0.000000e+00> : vector<5x32xf32>
    %91 = tpu.matmul %89, %90, %cst_35 {dimension_numbers = #tpu.dot_dimension_numbers<[1], [0], [0], [1], [0, 0, 1, 1], [], []>} : vector<5x8xf32>, vector<8x32xf32>, vector<5x32xf32> -> vector<5x32xf32>
    %92 = arith.addf %72, %91 : vector<5x32xf32>
    %93 = vector.extract_strided_slice %30 {offsets = [0, 24], sizes = [5, 8], strides = [1, 1]} : vector<5x96xf32> to vector<5x8xf32>
    %94 = vector.extract_strided_slice %30 {offsets = [0, 56], sizes = [5, 8], strides = [1, 1]} : vector<5x96xf32> to vector<5x8xf32>
    %95 = vector.extract_strided_slice %30 {offsets = [0, 88], sizes = [5, 8], strides = [1, 1]} : vector<5x96xf32> to vector<5x8xf32>
    %cst_36 = arith.constant dense<0.000000e+00> : vector<5x5xf32>
    %96 = tpu.matmul %93, %94, %cst_36 {dimension_numbers = #tpu.dot_dimension_numbers<[1], [1], [0], [0], [0, 0, 1, 0], [], []>} : vector<5x8xf32>, vector<5x8xf32>, vector<5x5xf32> -> vector<5x5xf32>
    %cst_37 = arith.constant 0.353553385 : f32
    %97 = vector.broadcast %cst_37 : f32 to vector<5x5xf32>
    %98 = arith.mulf %96, %97 : vector<5x5xf32>
    %cst_38 = arith.constant dense<0xFF800000> : vector<5xf32>
    %99 = vector.multi_reduction <maximumf>, %98, %cst_38 [1] : vector<5x5xf32> to vector<5xf32>
    %100 = vector.shape_cast %99 : vector<5xf32> to vector<5x1xf32>
    %101 = vector.broadcast %100 : vector<5x1xf32> to vector<5x5xf32>
    %102 = arith.subf %98, %101 : vector<5x5xf32>
    %103 = math.exp %102 : vector<5x5xf32>
    %cst_39 = arith.constant dense<0.000000e+00> : vector<5xf32>
    %104 = vector.multi_reduction <add>, %103, %cst_39 [1] : vector<5x5xf32> to vector<5xf32>
    %105 = vector.shape_cast %104 : vector<5xf32> to vector<5x1xf32>
    %106 = tpu.reciprocal %105 {approx = true} : vector<5x1xf32> -> vector<5x1xf32>
    %107 = vector.broadcast %106 : vector<5x1xf32> to vector<5x5xf32>
    %108 = arith.mulf %103, %107 : vector<5x5xf32>
    %cst_40 = arith.constant dense<0.000000e+00> : vector<5x8xf32>
    %109 = tpu.matmul %108, %95, %cst_40 {dimension_numbers = #tpu.dot_dimension_numbers<[1], [0], [0], [1], [0, 0, 1, 1], [], []>} : vector<5x5xf32>, vector<5x8xf32>, vector<5x8xf32> -> vector<5x8xf32>
    %110 = vector.extract_strided_slice %31 {offsets = [24, 0], sizes = [8, 32], strides = [1, 1]} : vector<32x32xf32> to vector<8x32xf32>
    %cst_41 = arith.constant dense<0.000000e+00> : vector<5x32xf32>
    %111 = tpu.matmul %109, %110, %cst_41 {dimension_numbers = #tpu.dot_dimension_numbers<[1], [0], [0], [1], [0, 0, 1, 1], [], []>} : vector<5x8xf32>, vector<8x32xf32>, vector<5x32xf32> -> vector<5x32xf32>
    %112 = arith.addf %92, %111 : vector<5x32xf32>
    %113 = arith.addf %1, %112 : vector<5x32xf32>
    %c0_42 = arith.constant 0 : index
    %c0_43 = arith.constant 0 : index
    %114 = vector.load %arg7[%c0_42, %c0_43] : memref<1x32xf32, #tpu.memory_space<vmem>>, vector<1x32xf32>
    %115 = vector.broadcast %114 : vector<1x32xf32> to vector<5x32xf32>
    %116 = arith.addf %113, %115 : vector<5x32xf32>
    %cst_44 = arith.constant dense<0.000000e+00> : vector<5xf32>
    %117 = vector.multi_reduction <add>, %116, %cst_44 [1] : vector<5x32xf32> to vector<5xf32>
    %118 = vector.shape_cast %117 : vector<5xf32> to vector<5x1xf32>
    %cst_45 = arith.constant 3.200000e+01 : f32
    %119 = vector.broadcast %cst_45 : f32 to vector<5x1xf32>
    %120 = arith.divf %118, %119 : vector<5x1xf32>
    %121 = vector.broadcast %120 : vector<5x1xf32> to vector<5x32xf32>
    %122 = arith.subf %116, %121 : vector<5x32xf32>
    %123 = arith.mulf %122, %122 : vector<5x32xf32>
    %cst_46 = arith.constant dense<0.000000e+00> : vector<5xf32>
    %124 = vector.multi_reduction <add>, %123, %cst_46 [1] : vector<5x32xf32> to vector<5xf32>
    %125 = vector.shape_cast %124 : vector<5xf32> to vector<5x1xf32>
    %cst_47 = arith.constant 3.200000e+01 : f32
    %126 = vector.broadcast %cst_47 : f32 to vector<5x1xf32>
    %127 = arith.divf %125, %126 : vector<5x1xf32>
    %128 = vector.broadcast %120 : vector<5x1xf32> to vector<5x32xf32>
    %129 = arith.subf %116, %128 : vector<5x32xf32>
    %cst_48 = arith.constant 9.99999997E-7 : f32
    %130 = vector.broadcast %cst_48 : f32 to vector<5x1xf32>
    %131 = arith.addf %127, %130 : vector<5x1xf32>
    %132 = math.rsqrt %131 : vector<5x1xf32>
    %133 = vector.broadcast %132 : vector<5x1xf32> to vector<5x32xf32>
    %134 = arith.mulf %129, %133 : vector<5x32xf32>
    %c0_49 = arith.constant 0 : index
    %c0_50 = arith.constant 0 : index
    %135 = vector.load %arg8[%c0_49, %c0_50] : memref<1x32xf32, #tpu.memory_space<vmem>>, vector<1x32xf32>
    %136 = vector.broadcast %135 : vector<1x32xf32> to vector<5x32xf32>
    %137 = arith.mulf %134, %136 : vector<5x32xf32>
    %c0_51 = arith.constant 0 : index
    %c0_52 = arith.constant 0 : index
    %138 = vector.load %arg9[%c0_51, %c0_52] : memref<1x32xf32, #tpu.memory_space<vmem>>, vector<1x32xf32>
    %139 = vector.broadcast %138 : vector<1x32xf32> to vector<5x32xf32>
    %140 = arith.addf %137, %139 : vector<5x32xf32>
    %c0_53 = arith.constant 0 : index
    %c0_54 = arith.constant 0 : index
    %141 = vector.load %arg10[%c0_53, %c0_54] : memref<32x128xf32, #tpu.memory_space<vmem>>, vector<32x128xf32>
    %cst_55 = arith.constant dense<0.000000e+00> : vector<5x128xf32>
    %142 = tpu.matmul %140, %141, %cst_55 {dimension_numbers = #tpu.dot_dimension_numbers<[1], [0], [0], [1], [0, 0, 1, 1], [], []>} : vector<5x32xf32>, vector<32x128xf32>, vector<5x128xf32> -> vector<5x128xf32>
    %c0_56 = arith.constant 0 : index
    %c0_57 = arith.constant 0 : index
    %143 = vector.load %arg11[%c0_56, %c0_57] : memref<1x128xf32, #tpu.memory_space<vmem>>, vector<1x128xf32>
    %144 = vector.broadcast %143 : vector<1x128xf32> to vector<5x128xf32>
    %145 = arith.addf %142, %144 : vector<5x128xf32>
    %146 = arith.mulf %145, %145 : vector<5x128xf32>
    %147 = arith.mulf %145, %146 : vector<5x128xf32>
    %cst_58 = arith.constant 4.471500e-02 : f32
    %148 = vector.broadcast %cst_58 : f32 to vector<5x128xf32>
    %149 = arith.mulf %148, %147 : vector<5x128xf32>
    %150 = arith.addf %145, %149 : vector<5x128xf32>
    %cst_59 = arith.constant 0.797884583 : f32
    %151 = vector.broadcast %cst_59 : f32 to vector<5x128xf32>
    %152 = arith.mulf %151, %150 : vector<5x128xf32>
    %153 = math.tanh %152 : vector<5x128xf32>
    %cst_60 = arith.constant 1.000000e+00 : f32
    %154 = vector.broadcast %cst_60 : f32 to vector<5x128xf32>
    %155 = arith.addf %154, %153 : vector<5x128xf32>
    %cst_61 = arith.constant 5.000000e-01 : f32
    %156 = vector.broadcast %cst_61 : f32 to vector<5x128xf32>
    %157 = arith.mulf %156, %155 : vector<5x128xf32>
    %158 = arith.mulf %145, %157 : vector<5x128xf32>
    %c0_62 = arith.constant 0 : index
    %c0_63 = arith.constant 0 : index
    %159 = vector.load %arg12[%c0_62, %c0_63] : memref<128x32xf32, #tpu.memory_space<vmem>>, vector<128x32xf32>
    %cst_64 = arith.constant dense<0.000000e+00> : vector<5x32xf32>
    %160 = tpu.matmul %158, %159, %cst_64 {dimension_numbers = #tpu.dot_dimension_numbers<[1], [0], [0], [1], [0, 0, 1, 1], [], []>} : vector<5x128xf32>, vector<128x32xf32>, vector<5x32xf32> -> vector<5x32xf32>
    %c0_65 = arith.constant 0 : index
    %c0_66 = arith.constant 0 : index
    %161 = vector.load %arg13[%c0_65, %c0_66] : memref<1x32xf32, #tpu.memory_space<vmem>>, vector<1x32xf32>
    %162 = vector.broadcast %161 : vector<1x32xf32> to vector<5x32xf32>
    %163 = arith.addf %160, %162 : vector<5x32xf32>
    %164 = arith.addf %116, %163 : vector<5x32xf32>
    %c0_67 = arith.constant 0 : index
    %c0_68 = arith.constant 0 : index
    %c0_69 = arith.constant 0 : index
    %165 = vector.load %arg14[%c0_67, %c0_68, %c0_69] : memref<1x5x32xf32, #tpu.memory_space<vmem>>, vector<1x5x32xf32>
    %166 = vector.shape_cast %165 : vector<1x5x32xf32> to vector<5x32xf32>
    %167 = vector.shape_cast %164 : vector<5x32xf32> to vector<1x5x32xf32>
    tpu.vector_store %arg14[%c0_67, %c0_68, %c0_69], %167 {strides = array<i32>} : memref<1x5x32xf32, #tpu.memory_space<vmem>>, vector<1x5x32xf32>,
    return
  }
  func.func @transform_0(%arg0: i32) -> (i32, i32, i32) {
    %c0_i32 = arith.constant 0 : i32
    %c0_i32_0 = arith.constant 0 : i32
    %c0_i32_1 = arith.constant 0 : i32
    return %arg0, %c0_i32, %c0_i32_0 : i32, i32, i32
  }
  func.func @transform_1(%arg0: i32) -> (i32, i32) {
    %c0_i32 = arith.constant 0 : i32
    %c0_i32_0 = arith.constant 0 : i32
    %c0_i32_1 = arith.constant 0 : i32
    return %c0_i32, %c0_i32_0 : i32, i32
  }
  func.func @transform_2(%arg0: i32) -> (i32, i32) {
    %c0_i32 = arith.constant 0 : i32
    %c0_i32_0 = arith.constant 0 : i32
    %c0_i32_1 = arith.constant 0 : i32
    return %c0_i32, %c0_i32_0 : i32, i32
  }
  func.func @transform_3(%arg0: i32) -> (i32, i32) {
    %c0_i32 = arith.constant 0 : i32
    %c0_i32_0 = arith.constant 0 : i32
    %c0_i32_1 = arith.constant 0 : i32
    return %c0_i32, %c0_i32_0 : i32, i32
  }
  func.func @transform_4(%arg0: i32) -> (i32, i32) {
    %c0_i32 = arith.constant 0 : i32
    %c0_i32_0 = arith.constant 0 : i32
    %c0_i32_1 = arith.constant 0 : i32
    return %c0_i32, %c0_i32_0 : i32, i32
  }
  func.func @transform_5(%arg0: i32) -> (i32, i32) {
    %c0_i32 = arith.constant 0 : i32
    %c0_i32_0 = arith.constant 0 : i32
    %c0_i32_1 = arith.constant 0 : i32
    return %c0_i32, %c0_i32_0 : i32, i32
  }
  func.func @transform_6(%arg0: i32) -> (i32, i32) {
    %c0_i32 = arith.constant 0 : i32
    %c0_i32_0 = arith.constant 0 : i32
    %c0_i32_1 = arith.constant 0 : i32
    return %c0_i32, %c0_i32_0 : i32, i32
  }
  func.func @transform_7(%arg0: i32) -> (i32, i32) {
    %c0_i32 = arith.constant 0 : i32
    %c0_i32_0 = arith.constant 0 : i32
    %c0_i32_1 = arith.constant 0 : i32
    return %c0_i32, %c0_i32_0 : i32, i32
  }
  func.func @transform_8(%arg0: i32) -> (i32, i32) {
    %c0_i32 = arith.constant 0 : i32
    %c0_i32_0 = arith.constant 0 : i32
    %c0_i32_1 = arith.constant 0 : i32
    return %c0_i32, %c0_i32_0 : i32, i32
  }
  func.func @transform_9(%arg0: i32) -> (i32, i32) {
    %c0_i32 = arith.constant 0 : i32
    %c0_i32_0 = arith.constant 0 : i32
    %c0_i32_1 = arith.constant 0 : i32
    return %c0_i32, %c0_i32_0 : i32, i32
  }
  func.func @transform_10(%arg0: i32) -> (i32, i32) {
    %c0_i32 = arith.constant 0 : i32
    %c0_i32_0 = arith.constant 0 : i32
    %c0_i32_1 = arith.constant 0 : i32
    return %c0_i32, %c0_i32_0 : i32, i32
  }
  func.func @transform_11(%arg0: i32) -> (i32, i32) {
    %c0_i32 = arith.constant 0 : i32
    %c0_i32_0 = arith.constant 0 : i32
    %c0_i32_1 = arith.constant 0 : i32
    return %c0_i32, %c0_i32_0 : i32, i32
  }
  func.func @transform_12(%arg0: i32) -> (i32, i32) {
    %c0_i32 = arith.constant 0 : i32
    %c0_i32_0 = arith.constant 0 : i32
    %c0_i32_1 = arith.constant 0 : i32
    return %c0_i32, %c0_i32_0 : i32, i32
  }
  func.func @transform_13(%arg0: i32) -> (i32, i32, i32) {
    %c0_i32 = arith.constant 0 : i32
    %c0_i32_0 = arith.constant 0 : i32
    %c0_i32_1 = arith.constant 0 : i32
    return %arg0, %c0_i32, %c0_i32_0 : i32, i32, i32
  }
}

module attributes {stable_mosaic.version = 11 : i64} {
  func.func @_block_kernel(%arg0: i32, %arg1: memref<1x5x32xf32, #tpu.memory_space<vmem>>, %arg2: memref<1x32xf32, #tpu.memory_space<vmem>>, %arg3: memref<1x32xf32, #tpu.memory_space<vmem>>, %arg4: memref<32x96xf32, #tpu.memory_space<vmem>>, %arg5: memref<1x96xf32, #tpu.memory_space<vmem>>, %arg6: memref<32x32xf32, #tpu.memory_space<vmem>>, %arg7: memref<1x32xf32, #tpu.memory_space<vmem>>, %arg8: memref<1x32xf32, #tpu.memory_space<vmem>>, %arg9: memref<1x32xf32, #tpu.memory_space<vmem>>, %arg10: memref<32x128xf32, #tpu.memory_space<vmem>>, %arg11: memref<1x128xf32, #tpu.memory_space<vmem>>, %arg12: memref<128x32xf32, #tpu.memory_space<vmem>>, %arg13: memref<1x32xf32, #tpu.memory_space<vmem>>, %arg14: memref<1x32xf32, #tpu.memory_space<vmem>>, %arg15: memref<1x32xf32, #tpu.memory_space<vmem>>, %arg16: memref<1x5x32xf32, #tpu.memory_space<vmem>>) attributes {dimension_semantics = [#tpu.dimension_semantics<parallel>], iteration_bounds = array<i64: 2>, scalar_prefetch = 0 : i64, scratch_operands = 0 : i64, tpu.core_type = #tpu.core_type<tc>, window_params = [{transform_indices = @transform_0, window_bounds = array<i64: 1, 5, 32>}, {pipeline_mode = #tpu.pipeline_mode<synchronous>, transform_indices = @transform_1, window_bounds = array<i64: 1, 32>}, {pipeline_mode = #tpu.pipeline_mode<synchronous>, transform_indices = @transform_2, window_bounds = array<i64: 1, 32>}, {pipeline_mode = #tpu.pipeline_mode<synchronous>, transform_indices = @transform_3, window_bounds = array<i64: 32, 96>}, {pipeline_mode = #tpu.pipeline_mode<synchronous>, transform_indices = @transform_4, window_bounds = array<i64: 1, 96>}, {pipeline_mode = #tpu.pipeline_mode<synchronous>, transform_indices = @transform_5, window_bounds = array<i64: 32, 32>}, {pipeline_mode = #tpu.pipeline_mode<synchronous>, transform_indices = @transform_6, window_bounds = array<i64: 1, 32>}, {pipeline_mode = #tpu.pipeline_mode<synchronous>, transform_indices = @transform_7, window_bounds = array<i64: 1, 32>}, {pipeline_mode = #tpu.pipeline_mode<synchronous>, transform_indices = @transform_8, window_bounds = array<i64: 1, 32>}, {pipeline_mode = #tpu.pipeline_mode<synchronous>, transform_indices = @transform_9, window_bounds = array<i64: 32, 128>}, {pipeline_mode = #tpu.pipeline_mode<synchronous>, transform_indices = @transform_10, window_bounds = array<i64: 1, 128>}, {pipeline_mode = #tpu.pipeline_mode<synchronous>, transform_indices = @transform_11, window_bounds = array<i64: 128, 32>}, {pipeline_mode = #tpu.pipeline_mode<synchronous>, transform_indices = @transform_12, window_bounds = array<i64: 1, 32>}, {pipeline_mode = #tpu.pipeline_mode<synchronous>, transform_indices = @transform_13, window_bounds = array<i64: 1, 32>}, {pipeline_mode = #tpu.pipeline_mode<synchronous>, transform_indices = @transform_14, window_bounds = array<i64: 1, 32>}, {transform_indices = @transform_15, window_bounds = array<i64: 1, 5, 32>}]} {
    %c0 = arith.constant 0 : index
    %c0_0 = arith.constant 0 : index
    %c0_1 = arith.constant 0 : index
    %0 = vector.load %arg1[%c0, %c0_0, %c0_1] : memref<1x5x32xf32, #tpu.memory_space<vmem>>, vector<1x5x32xf32>
    %1 = vector.shape_cast %0 : vector<1x5x32xf32> to vector<5x32xf32>
    %cst = arith.constant dense<0.000000e+00> : vector<5xf32>
    %2 = vector.multi_reduction <add>, %1, %cst [1] : vector<5x32xf32> to vector<5xf32>
    %3 = vector.shape_cast %2 : vector<5xf32> to vector<5x1xf32>
    %cst_2 = arith.constant 3.200000e+01 : f32
    %4 = vector.broadcast %cst_2 : f32 to vector<5x1xf32>
    %5 = arith.divf %3, %4 : vector<5x1xf32>
    %6 = vector.broadcast %5 : vector<5x1xf32> to vector<5x32xf32>
    %7 = arith.subf %1, %6 : vector<5x32xf32>
    %8 = arith.mulf %7, %7 : vector<5x32xf32>
    %cst_3 = arith.constant dense<0.000000e+00> : vector<5xf32>
    %9 = vector.multi_reduction <add>, %8, %cst_3 [1] : vector<5x32xf32> to vector<5xf32>
    %10 = vector.shape_cast %9 : vector<5xf32> to vector<5x1xf32>
    %cst_4 = arith.constant 3.200000e+01 : f32
    %11 = vector.broadcast %cst_4 : f32 to vector<5x1xf32>
    %12 = arith.divf %10, %11 : vector<5x1xf32>
    %13 = vector.broadcast %5 : vector<5x1xf32> to vector<5x32xf32>
    %14 = arith.subf %1, %13 : vector<5x32xf32>
    %cst_5 = arith.constant 9.99999997E-7 : f32
    %15 = vector.broadcast %cst_5 : f32 to vector<5x1xf32>
    %16 = arith.addf %12, %15 : vector<5x1xf32>
    %17 = math.rsqrt %16 : vector<5x1xf32>
    %18 = vector.broadcast %17 : vector<5x1xf32> to vector<5x32xf32>
    %19 = arith.mulf %14, %18 : vector<5x32xf32>
    %c0_6 = arith.constant 0 : index
    %c0_7 = arith.constant 0 : index
    %20 = vector.load %arg2[%c0_6, %c0_7] : memref<1x32xf32, #tpu.memory_space<vmem>>, vector<1x32xf32>
    %21 = vector.broadcast %20 : vector<1x32xf32> to vector<5x32xf32>
    %22 = arith.mulf %19, %21 : vector<5x32xf32>
    %c0_8 = arith.constant 0 : index
    %c0_9 = arith.constant 0 : index
    %23 = vector.load %arg3[%c0_8, %c0_9] : memref<1x32xf32, #tpu.memory_space<vmem>>, vector<1x32xf32>
    %24 = vector.broadcast %23 : vector<1x32xf32> to vector<5x32xf32>
    %25 = arith.addf %22, %24 : vector<5x32xf32>
    %c0_10 = arith.constant 0 : index
    %c0_11 = arith.constant 0 : index
    %26 = vector.load %arg4[%c0_10, %c0_11] : memref<32x96xf32, #tpu.memory_space<vmem>>, vector<32x96xf32>
    %cst_12 = arith.constant dense<0.000000e+00> : vector<5x96xf32>
    %27 = tpu.matmul %25, %26, %cst_12 {dimension_numbers = #tpu.dot_dimension_numbers<[1], [0], [0], [1], [0, 0, 1, 1], [], []>} : vector<5x32xf32>, vector<32x96xf32>, vector<5x96xf32> -> vector<5x96xf32>
    %c0_13 = arith.constant 0 : index
    %c0_14 = arith.constant 0 : index
    %28 = vector.load %arg5[%c0_13, %c0_14] : memref<1x96xf32, #tpu.memory_space<vmem>>, vector<1x96xf32>
    %29 = vector.broadcast %28 : vector<1x96xf32> to vector<5x96xf32>
    %30 = arith.addf %27, %29 : vector<5x96xf32>
    %c0_15 = arith.constant 0 : index
    %c0_16 = arith.constant 0 : index
    %31 = vector.load %arg6[%c0_15, %c0_16] : memref<32x32xf32, #tpu.memory_space<vmem>>, vector<32x32xf32>
    %cst_17 = arith.constant 0.000000e+00 : f32
    %32 = vector.broadcast %cst_17 : f32 to vector<5x32xf32>
    %33 = vector.extract_strided_slice %30 {offsets = [0, 0], sizes = [5, 8], strides = [1, 1]} : vector<5x96xf32> to vector<5x8xf32>
    %34 = vector.extract_strided_slice %30 {offsets = [0, 32], sizes = [5, 8], strides = [1, 1]} : vector<5x96xf32> to vector<5x8xf32>
    %35 = vector.extract_strided_slice %30 {offsets = [0, 64], sizes = [5, 8], strides = [1, 1]} : vector<5x96xf32> to vector<5x8xf32>
    %cst_18 = arith.constant dense<0.000000e+00> : vector<5x5xf32>
    %36 = tpu.matmul %33, %34, %cst_18 {dimension_numbers = #tpu.dot_dimension_numbers<[1], [1], [0], [0], [0, 0, 1, 0], [], []>} : vector<5x8xf32>, vector<5x8xf32>, vector<5x5xf32> -> vector<5x5xf32>
    %cst_19 = arith.constant 0.353553385 : f32
    %37 = vector.broadcast %cst_19 : f32 to vector<5x5xf32>
    %38 = arith.mulf %36, %37 : vector<5x5xf32>
    %cst_20 = arith.constant dense<0xFF800000> : vector<5xf32>
    %39 = vector.multi_reduction <maximumf>, %38, %cst_20 [1] : vector<5x5xf32> to vector<5xf32>
    %40 = vector.shape_cast %39 : vector<5xf32> to vector<5x1xf32>
    %41 = vector.broadcast %40 : vector<5x1xf32> to vector<5x5xf32>
    %42 = arith.subf %38, %41 : vector<5x5xf32>
    %43 = math.exp %42 : vector<5x5xf32>
    %cst_21 = arith.constant dense<0.000000e+00> : vector<5xf32>
    %44 = vector.multi_reduction <add>, %43, %cst_21 [1] : vector<5x5xf32> to vector<5xf32>
    %45 = vector.shape_cast %44 : vector<5xf32> to vector<5x1xf32>
    %46 = tpu.reciprocal %45 {approx = true} : vector<5x1xf32> -> vector<5x1xf32>
    %47 = vector.broadcast %46 : vector<5x1xf32> to vector<5x5xf32>
    %48 = arith.mulf %43, %47 : vector<5x5xf32>
    %cst_22 = arith.constant dense<0.000000e+00> : vector<5x8xf32>
    %49 = tpu.matmul %48, %35, %cst_22 {dimension_numbers = #tpu.dot_dimension_numbers<[1], [0], [0], [1], [0, 0, 1, 1], [], []>} : vector<5x5xf32>, vector<5x8xf32>, vector<5x8xf32> -> vector<5x8xf32>
    %50 = vector.extract_strided_slice %31 {offsets = [0, 0], sizes = [8, 32], strides = [1, 1]} : vector<32x32xf32> to vector<8x32xf32>
    %cst_23 = arith.constant dense<0.000000e+00> : vector<5x32xf32>
    %51 = tpu.matmul %49, %50, %cst_23 {dimension_numbers = #tpu.dot_dimension_numbers<[1], [0], [0], [1], [0, 0, 1, 1], [], []>} : vector<5x8xf32>, vector<8x32xf32>, vector<5x32xf32> -> vector<5x32xf32>
    %52 = arith.addf %32, %51 : vector<5x32xf32>
    %53 = vector.extract_strided_slice %30 {offsets = [0, 8], sizes = [5, 8], strides = [1, 1]} : vector<5x96xf32> to vector<5x8xf32>
    %54 = vector.extract_strided_slice %30 {offsets = [0, 40], sizes = [5, 8], strides = [1, 1]} : vector<5x96xf32> to vector<5x8xf32>
    %55 = vector.extract_strided_slice %30 {offsets = [0, 72], sizes = [5, 8], strides = [1, 1]} : vector<5x96xf32> to vector<5x8xf32>
    %cst_24 = arith.constant dense<0.000000e+00> : vector<5x5xf32>
    %56 = tpu.matmul %53, %54, %cst_24 {dimension_numbers = #tpu.dot_dimension_numbers<[1], [1], [0], [0], [0, 0, 1, 0], [], []>} : vector<5x8xf32>, vector<5x8xf32>, vector<5x5xf32> -> vector<5x5xf32>
    %cst_25 = arith.constant 0.353553385 : f32
    %57 = vector.broadcast %cst_25 : f32 to vector<5x5xf32>
    %58 = arith.mulf %56, %57 : vector<5x5xf32>
    %cst_26 = arith.constant dense<0xFF800000> : vector<5xf32>
    %59 = vector.multi_reduction <maximumf>, %58, %cst_26 [1] : vector<5x5xf32> to vector<5xf32>
    %60 = vector.shape_cast %59 : vector<5xf32> to vector<5x1xf32>
    %61 = vector.broadcast %60 : vector<5x1xf32> to vector<5x5xf32>
    %62 = arith.subf %58, %61 : vector<5x5xf32>
    %63 = math.exp %62 : vector<5x5xf32>
    %cst_27 = arith.constant dense<0.000000e+00> : vector<5xf32>
    %64 = vector.multi_reduction <add>, %63, %cst_27 [1] : vector<5x5xf32> to vector<5xf32>
    %65 = vector.shape_cast %64 : vector<5xf32> to vector<5x1xf32>
    %66 = tpu.reciprocal %65 {approx = true} : vector<5x1xf32> -> vector<5x1xf32>
    %67 = vector.broadcast %66 : vector<5x1xf32> to vector<5x5xf32>
    %68 = arith.mulf %63, %67 : vector<5x5xf32>
    %cst_28 = arith.constant dense<0.000000e+00> : vector<5x8xf32>
    %69 = tpu.matmul %68, %55, %cst_28 {dimension_numbers = #tpu.dot_dimension_numbers<[1], [0], [0], [1], [0, 0, 1, 1], [], []>} : vector<5x5xf32>, vector<5x8xf32>, vector<5x8xf32> -> vector<5x8xf32>
    %70 = vector.extract_strided_slice %31 {offsets = [8, 0], sizes = [8, 32], strides = [1, 1]} : vector<32x32xf32> to vector<8x32xf32>
    %cst_29 = arith.constant dense<0.000000e+00> : vector<5x32xf32>
    %71 = tpu.matmul %69, %70, %cst_29 {dimension_numbers = #tpu.dot_dimension_numbers<[1], [0], [0], [1], [0, 0, 1, 1], [], []>} : vector<5x8xf32>, vector<8x32xf32>, vector<5x32xf32> -> vector<5x32xf32>
    %72 = arith.addf %52, %71 : vector<5x32xf32>
    %73 = vector.extract_strided_slice %30 {offsets = [0, 16], sizes = [5, 8], strides = [1, 1]} : vector<5x96xf32> to vector<5x8xf32>
    %74 = vector.extract_strided_slice %30 {offsets = [0, 48], sizes = [5, 8], strides = [1, 1]} : vector<5x96xf32> to vector<5x8xf32>
    %75 = vector.extract_strided_slice %30 {offsets = [0, 80], sizes = [5, 8], strides = [1, 1]} : vector<5x96xf32> to vector<5x8xf32>
    %cst_30 = arith.constant dense<0.000000e+00> : vector<5x5xf32>
    %76 = tpu.matmul %73, %74, %cst_30 {dimension_numbers = #tpu.dot_dimension_numbers<[1], [1], [0], [0], [0, 0, 1, 0], [], []>} : vector<5x8xf32>, vector<5x8xf32>, vector<5x5xf32> -> vector<5x5xf32>
    %cst_31 = arith.constant 0.353553385 : f32
    %77 = vector.broadcast %cst_31 : f32 to vector<5x5xf32>
    %78 = arith.mulf %76, %77 : vector<5x5xf32>
    %cst_32 = arith.constant dense<0xFF800000> : vector<5xf32>
    %79 = vector.multi_reduction <maximumf>, %78, %cst_32 [1] : vector<5x5xf32> to vector<5xf32>
    %80 = vector.shape_cast %79 : vector<5xf32> to vector<5x1xf32>
    %81 = vector.broadcast %80 : vector<5x1xf32> to vector<5x5xf32>
    %82 = arith.subf %78, %81 : vector<5x5xf32>
    %83 = math.exp %82 : vector<5x5xf32>
    %cst_33 = arith.constant dense<0.000000e+00> : vector<5xf32>
    %84 = vector.multi_reduction <add>, %83, %cst_33 [1] : vector<5x5xf32> to vector<5xf32>
    %85 = vector.shape_cast %84 : vector<5xf32> to vector<5x1xf32>
    %86 = tpu.reciprocal %85 {approx = true} : vector<5x1xf32> -> vector<5x1xf32>
    %87 = vector.broadcast %86 : vector<5x1xf32> to vector<5x5xf32>
    %88 = arith.mulf %83, %87 : vector<5x5xf32>
    %cst_34 = arith.constant dense<0.000000e+00> : vector<5x8xf32>
    %89 = tpu.matmul %88, %75, %cst_34 {dimension_numbers = #tpu.dot_dimension_numbers<[1], [0], [0], [1], [0, 0, 1, 1], [], []>} : vector<5x5xf32>, vector<5x8xf32>, vector<5x8xf32> -> vector<5x8xf32>
    %90 = vector.extract_strided_slice %31 {offsets = [16, 0], sizes = [8, 32], strides = [1, 1]} : vector<32x32xf32> to vector<8x32xf32>
    %cst_35 = arith.constant dense<0.000000e+00> : vector<5x32xf32>
    %91 = tpu.matmul %89, %90, %cst_35 {dimension_numbers = #tpu.dot_dimension_numbers<[1], [0], [0], [1], [0, 0, 1, 1], [], []>} : vector<5x8xf32>, vector<8x32xf32>, vector<5x32xf32> -> vector<5x32xf32>
    %92 = arith.addf %72, %91 : vector<5x32xf32>
    %93 = vector.extract_strided_slice %30 {offsets = [0, 24], sizes = [5, 8], strides = [1, 1]} : vector<5x96xf32> to vector<5x8xf32>
    %94 = vector.extract_strided_slice %30 {offsets = [0, 56], sizes = [5, 8], strides = [1, 1]} : vector<5x96xf32> to vector<5x8xf32>
    %95 = vector.extract_strided_slice %30 {offsets = [0, 88], sizes = [5, 8], strides = [1, 1]} : vector<5x96xf32> to vector<5x8xf32>
    %cst_36 = arith.constant dense<0.000000e+00> : vector<5x5xf32>
    %96 = tpu.matmul %93, %94, %cst_36 {dimension_numbers = #tpu.dot_dimension_numbers<[1], [1], [0], [0], [0, 0, 1, 0], [], []>} : vector<5x8xf32>, vector<5x8xf32>, vector<5x5xf32> -> vector<5x5xf32>
    %cst_37 = arith.constant 0.353553385 : f32
    %97 = vector.broadcast %cst_37 : f32 to vector<5x5xf32>
    %98 = arith.mulf %96, %97 : vector<5x5xf32>
    %cst_38 = arith.constant dense<0xFF800000> : vector<5xf32>
    %99 = vector.multi_reduction <maximumf>, %98, %cst_38 [1] : vector<5x5xf32> to vector<5xf32>
    %100 = vector.shape_cast %99 : vector<5xf32> to vector<5x1xf32>
    %101 = vector.broadcast %100 : vector<5x1xf32> to vector<5x5xf32>
    %102 = arith.subf %98, %101 : vector<5x5xf32>
    %103 = math.exp %102 : vector<5x5xf32>
    %cst_39 = arith.constant dense<0.000000e+00> : vector<5xf32>
    %104 = vector.multi_reduction <add>, %103, %cst_39 [1] : vector<5x5xf32> to vector<5xf32>
    %105 = vector.shape_cast %104 : vector<5xf32> to vector<5x1xf32>
    %106 = tpu.reciprocal %105 {approx = true} : vector<5x1xf32> -> vector<5x1xf32>
    %107 = vector.broadcast %106 : vector<5x1xf32> to vector<5x5xf32>
    %108 = arith.mulf %103, %107 : vector<5x5xf32>
    %cst_40 = arith.constant dense<0.000000e+00> : vector<5x8xf32>
    %109 = tpu.matmul %108, %95, %cst_40 {dimension_numbers = #tpu.dot_dimension_numbers<[1], [0], [0], [1], [0, 0, 1, 1], [], []>} : vector<5x5xf32>, vector<5x8xf32>, vector<5x8xf32> -> vector<5x8xf32>
    %110 = vector.extract_strided_slice %31 {offsets = [24, 0], sizes = [8, 32], strides = [1, 1]} : vector<32x32xf32> to vector<8x32xf32>
    %cst_41 = arith.constant dense<0.000000e+00> : vector<5x32xf32>
    %111 = tpu.matmul %109, %110, %cst_41 {dimension_numbers = #tpu.dot_dimension_numbers<[1], [0], [0], [1], [0, 0, 1, 1], [], []>} : vector<5x8xf32>, vector<8x32xf32>, vector<5x32xf32> -> vector<5x32xf32>
    %112 = arith.addf %92, %111 : vector<5x32xf32>
    %113 = arith.addf %1, %112 : vector<5x32xf32>
    %c0_42 = arith.constant 0 : index
    %c0_43 = arith.constant 0 : index
    %114 = vector.load %arg7[%c0_42, %c0_43] : memref<1x32xf32, #tpu.memory_space<vmem>>, vector<1x32xf32>
    %115 = vector.broadcast %114 : vector<1x32xf32> to vector<5x32xf32>
    %116 = arith.addf %113, %115 : vector<5x32xf32>
    %cst_44 = arith.constant dense<0.000000e+00> : vector<5xf32>
    %117 = vector.multi_reduction <add>, %116, %cst_44 [1] : vector<5x32xf32> to vector<5xf32>
    %118 = vector.shape_cast %117 : vector<5xf32> to vector<5x1xf32>
    %cst_45 = arith.constant 3.200000e+01 : f32
    %119 = vector.broadcast %cst_45 : f32 to vector<5x1xf32>
    %120 = arith.divf %118, %119 : vector<5x1xf32>
    %121 = vector.broadcast %120 : vector<5x1xf32> to vector<5x32xf32>
    %122 = arith.subf %116, %121 : vector<5x32xf32>
    %123 = arith.mulf %122, %122 : vector<5x32xf32>
    %cst_46 = arith.constant dense<0.000000e+00> : vector<5xf32>
    %124 = vector.multi_reduction <add>, %123, %cst_46 [1] : vector<5x32xf32> to vector<5xf32>
    %125 = vector.shape_cast %124 : vector<5xf32> to vector<5x1xf32>
    %cst_47 = arith.constant 3.200000e+01 : f32
    %126 = vector.broadcast %cst_47 : f32 to vector<5x1xf32>
    %127 = arith.divf %125, %126 : vector<5x1xf32>
    %128 = vector.broadcast %120 : vector<5x1xf32> to vector<5x32xf32>
    %129 = arith.subf %116, %128 : vector<5x32xf32>
    %cst_48 = arith.constant 9.99999997E-7 : f32
    %130 = vector.broadcast %cst_48 : f32 to vector<5x1xf32>
    %131 = arith.addf %127, %130 : vector<5x1xf32>
    %132 = math.rsqrt %131 : vector<5x1xf32>
    %133 = vector.broadcast %132 : vector<5x1xf32> to vector<5x32xf32>
    %134 = arith.mulf %129, %133 : vector<5x32xf32>
    %c0_49 = arith.constant 0 : index
    %c0_50 = arith.constant 0 : index
    %135 = vector.load %arg8[%c0_49, %c0_50] : memref<1x32xf32, #tpu.memory_space<vmem>>, vector<1x32xf32>
    %136 = vector.broadcast %135 : vector<1x32xf32> to vector<5x32xf32>
    %137 = arith.mulf %134, %136 : vector<5x32xf32>
    %c0_51 = arith.constant 0 : index
    %c0_52 = arith.constant 0 : index
    %138 = vector.load %arg9[%c0_51, %c0_52] : memref<1x32xf32, #tpu.memory_space<vmem>>, vector<1x32xf32>
    %139 = vector.broadcast %138 : vector<1x32xf32> to vector<5x32xf32>
    %140 = arith.addf %137, %139 : vector<5x32xf32>
    %c0_53 = arith.constant 0 : index
    %c0_54 = arith.constant 0 : index
    %141 = vector.load %arg10[%c0_53, %c0_54] : memref<32x128xf32, #tpu.memory_space<vmem>>, vector<32x128xf32>
    %cst_55 = arith.constant dense<0.000000e+00> : vector<5x128xf32>
    %142 = tpu.matmul %140, %141, %cst_55 {dimension_numbers = #tpu.dot_dimension_numbers<[1], [0], [0], [1], [0, 0, 1, 1], [], []>} : vector<5x32xf32>, vector<32x128xf32>, vector<5x128xf32> -> vector<5x128xf32>
    %c0_56 = arith.constant 0 : index
    %c0_57 = arith.constant 0 : index
    %143 = vector.load %arg11[%c0_56, %c0_57] : memref<1x128xf32, #tpu.memory_space<vmem>>, vector<1x128xf32>
    %144 = vector.broadcast %143 : vector<1x128xf32> to vector<5x128xf32>
    %145 = arith.addf %142, %144 : vector<5x128xf32>
    %146 = arith.mulf %145, %145 : vector<5x128xf32>
    %147 = arith.mulf %145, %146 : vector<5x128xf32>
    %cst_58 = arith.constant 4.471500e-02 : f32
    %148 = vector.broadcast %cst_58 : f32 to vector<5x128xf32>
    %149 = arith.mulf %148, %147 : vector<5x128xf32>
    %150 = arith.addf %145, %149 : vector<5x128xf32>
    %cst_59 = arith.constant 0.797884583 : f32
    %151 = vector.broadcast %cst_59 : f32 to vector<5x128xf32>
    %152 = arith.mulf %151, %150 : vector<5x128xf32>
    %153 = math.tanh %152 : vector<5x128xf32>
    %cst_60 = arith.constant 1.000000e+00 : f32
    %154 = vector.broadcast %cst_60 : f32 to vector<5x128xf32>
    %155 = arith.addf %154, %153 : vector<5x128xf32>
    %cst_61 = arith.constant 5.000000e-01 : f32
    %156 = vector.broadcast %cst_61 : f32 to vector<5x128xf32>
    %157 = arith.mulf %156, %155 : vector<5x128xf32>
    %158 = arith.mulf %145, %157 : vector<5x128xf32>
    %c0_62 = arith.constant 0 : index
    %c0_63 = arith.constant 0 : index
    %159 = vector.load %arg12[%c0_62, %c0_63] : memref<128x32xf32, #tpu.memory_space<vmem>>, vector<128x32xf32>
    %cst_64 = arith.constant dense<0.000000e+00> : vector<5x32xf32>
    %160 = tpu.matmul %158, %159, %cst_64 {dimension_numbers = #tpu.dot_dimension_numbers<[1], [0], [0], [1], [0, 0, 1, 1], [], []>} : vector<5x128xf32>, vector<128x32xf32>, vector<5x32xf32> -> vector<5x32xf32>
    %c0_65 = arith.constant 0 : index
    %c0_66 = arith.constant 0 : index
    %161 = vector.load %arg13[%c0_65, %c0_66] : memref<1x32xf32, #tpu.memory_space<vmem>>, vector<1x32xf32>
    %162 = vector.broadcast %161 : vector<1x32xf32> to vector<5x32xf32>
    %163 = arith.addf %160, %162 : vector<5x32xf32>
    %164 = arith.addf %116, %163 : vector<5x32xf32>
    %cst_67 = arith.constant dense<0.000000e+00> : vector<5xf32>
    %165 = vector.multi_reduction <add>, %164, %cst_67 [1] : vector<5x32xf32> to vector<5xf32>
    %166 = vector.shape_cast %165 : vector<5xf32> to vector<5x1xf32>
    %cst_68 = arith.constant 3.200000e+01 : f32
    %167 = vector.broadcast %cst_68 : f32 to vector<5x1xf32>
    %168 = arith.divf %166, %167 : vector<5x1xf32>
    %169 = vector.broadcast %168 : vector<5x1xf32> to vector<5x32xf32>
    %170 = arith.subf %164, %169 : vector<5x32xf32>
    %171 = arith.mulf %170, %170 : vector<5x32xf32>
    %cst_69 = arith.constant dense<0.000000e+00> : vector<5xf32>
    %172 = vector.multi_reduction <add>, %171, %cst_69 [1] : vector<5x32xf32> to vector<5xf32>
    %173 = vector.shape_cast %172 : vector<5xf32> to vector<5x1xf32>
    %cst_70 = arith.constant 3.200000e+01 : f32
    %174 = vector.broadcast %cst_70 : f32 to vector<5x1xf32>
    %175 = arith.divf %173, %174 : vector<5x1xf32>
    %176 = vector.broadcast %168 : vector<5x1xf32> to vector<5x32xf32>
    %177 = arith.subf %164, %176 : vector<5x32xf32>
    %cst_71 = arith.constant 9.99999997E-7 : f32
    %178 = vector.broadcast %cst_71 : f32 to vector<5x1xf32>
    %179 = arith.addf %175, %178 : vector<5x1xf32>
    %180 = math.rsqrt %179 : vector<5x1xf32>
    %181 = vector.broadcast %180 : vector<5x1xf32> to vector<5x32xf32>
    %182 = arith.mulf %177, %181 : vector<5x32xf32>
    %c0_72 = arith.constant 0 : index
    %c0_73 = arith.constant 0 : index
    %183 = vector.load %arg14[%c0_72, %c0_73] : memref<1x32xf32, #tpu.memory_space<vmem>>, vector<1x32xf32>
    %184 = vector.broadcast %183 : vector<1x32xf32> to vector<5x32xf32>
    %185 = arith.mulf %182, %184 : vector<5x32xf32>
    %c0_74 = arith.constant 0 : index
    %c0_75 = arith.constant 0 : index
    %186 = vector.load %arg15[%c0_74, %c0_75] : memref<1x32xf32, #tpu.memory_space<vmem>>, vector<1x32xf32>
    %187 = vector.broadcast %186 : vector<1x32xf32> to vector<5x32xf32>
    %188 = arith.addf %185, %187 : vector<5x32xf32>
    %c0_76 = arith.constant 0 : index
    %c0_77 = arith.constant 0 : index
    %c0_78 = arith.constant 0 : index
    %189 = vector.load %arg16[%c0_76, %c0_77, %c0_78] : memref<1x5x32xf32, #tpu.memory_space<vmem>>, vector<1x5x32xf32>
    %190 = vector.shape_cast %189 : vector<1x5x32xf32> to vector<5x32xf32>
    %191 = vector.shape_cast %188 : vector<5x32xf32> to vector<1x5x32xf32>
    tpu.vector_store %arg16[%c0_76, %c0_77, %c0_78], %191 {strides = array<i32>} : memref<1x5x32xf32, #tpu.memory_space<vmem>>, vector<1x5x32xf32>,
    return
  }
  func.func @transform_0(%arg0: i32) -> (i32, i32, i32) {
    %c0_i32 = arith.constant 0 : i32
    %c0_i32_0 = arith.constant 0 : i32
    %c0_i32_1 = arith.constant 0 : i32
    return %arg0, %c0_i32, %c0_i32_0 : i32, i32, i32
  }
  func.func @transform_1(%arg0: i32) -> (i32, i32) {
    %c0_i32 = arith.constant 0 : i32
    %c0_i32_0 = arith.constant 0 : i32
    %c0_i32_1 = arith.constant 0 : i32
    return %c0_i32, %c0_i32_0 : i32, i32
  }
  func.func @transform_2(%arg0: i32) -> (i32, i32) {
    %c0_i32 = arith.constant 0 : i32
    %c0_i32_0 = arith.constant 0 : i32
    %c0_i32_1 = arith.constant 0 : i32
    return %c0_i32, %c0_i32_0 : i32, i32
  }
  func.func @transform_3(%arg0: i32) -> (i32, i32) {
    %c0_i32 = arith.constant 0 : i32
    %c0_i32_0 = arith.constant 0 : i32
    %c0_i32_1 = arith.constant 0 : i32
    return %c0_i32, %c0_i32_0 : i32, i32
  }
  func.func @transform_4(%arg0: i32) -> (i32, i32) {
    %c0_i32 = arith.constant 0 : i32
    %c0_i32_0 = arith.constant 0 : i32
    %c0_i32_1 = arith.constant 0 : i32
    return %c0_i32, %c0_i32_0 : i32, i32
  }
  func.func @transform_5(%arg0: i32) -> (i32, i32) {
    %c0_i32 = arith.constant 0 : i32
    %c0_i32_0 = arith.constant 0 : i32
    %c0_i32_1 = arith.constant 0 : i32
    return %c0_i32, %c0_i32_0 : i32, i32
  }
  func.func @transform_6(%arg0: i32) -> (i32, i32) {
    %c0_i32 = arith.constant 0 : i32
    %c0_i32_0 = arith.constant 0 : i32
    %c0_i32_1 = arith.constant 0 : i32
    return %c0_i32, %c0_i32_0 : i32, i32
  }
  func.func @transform_7(%arg0: i32) -> (i32, i32) {
    %c0_i32 = arith.constant 0 : i32
    %c0_i32_0 = arith.constant 0 : i32
    %c0_i32_1 = arith.constant 0 : i32
    return %c0_i32, %c0_i32_0 : i32, i32
  }
  func.func @transform_8(%arg0: i32) -> (i32, i32) {
    %c0_i32 = arith.constant 0 : i32
    %c0_i32_0 = arith.constant 0 : i32
    %c0_i32_1 = arith.constant 0 : i32
    return %c0_i32, %c0_i32_0 : i32, i32
  }
  func.func @transform_9(%arg0: i32) -> (i32, i32) {
    %c0_i32 = arith.constant 0 : i32
    %c0_i32_0 = arith.constant 0 : i32
    %c0_i32_1 = arith.constant 0 : i32
    return %c0_i32, %c0_i32_0 : i32, i32
  }
  func.func @transform_10(%arg0: i32) -> (i32, i32) {
    %c0_i32 = arith.constant 0 : i32
    %c0_i32_0 = arith.constant 0 : i32
    %c0_i32_1 = arith.constant 0 : i32
    return %c0_i32, %c0_i32_0 : i32, i32
  }
  func.func @transform_11(%arg0: i32) -> (i32, i32) {
    %c0_i32 = arith.constant 0 : i32
    %c0_i32_0 = arith.constant 0 : i32
    %c0_i32_1 = arith.constant 0 : i32
    return %c0_i32, %c0_i32_0 : i32, i32
  }
  func.func @transform_12(%arg0: i32) -> (i32, i32) {
    %c0_i32 = arith.constant 0 : i32
    %c0_i32_0 = arith.constant 0 : i32
    %c0_i32_1 = arith.constant 0 : i32
    return %c0_i32, %c0_i32_0 : i32, i32
  }
  func.func @transform_13(%arg0: i32) -> (i32, i32) {
    %c0_i32 = arith.constant 0 : i32
    %c0_i32_0 = arith.constant 0 : i32
    %c0_i32_1 = arith.constant 0 : i32
    return %c0_i32, %c0_i32_0 : i32, i32
  }
  func.func @transform_14(%arg0: i32) -> (i32, i32) {
    %c0_i32 = arith.constant 0 : i32
    %c0_i32_0 = arith.constant 0 : i32
    %c0_i32_1 = arith.constant 0 : i32
    return %c0_i32, %c0_i32_0 : i32, i32
  }
  func.func @transform_15(%arg0: i32) -> (i32, i32, i32) {
    %c0_i32 = arith.constant 0 : i32
    %c0_i32_0 = arith.constant 0 : i32
    %c0_i32_1 = arith.constant 0 : i32
    return %arg0, %c0_i32, %c0_i32_0 : i32, i32, i32
  }
}

module attributes {stable_mosaic.version = 11 : i64} {
  func.func @_linear_kernel(%arg0: i32, %arg1: memref<10x32xf32, #tpu.memory_space<vmem>>, %arg2: memref<32x16xf32, #tpu.memory_space<vmem>>, %arg3: memref<1x16xf32, #tpu.memory_space<vmem>>, %arg4: memref<10x16xf32, #tpu.memory_space<vmem>>) attributes {dimension_semantics = [#tpu.dimension_semantics<arbitrary>], iteration_bounds = array<i64: 1>, scalar_prefetch = 0 : i64, scratch_operands = 0 : i64, tpu.core_type = #tpu.core_type<tc>, window_params = [{pipeline_mode = #tpu.pipeline_mode<synchronous>, transform_indices = @transform_0, window_bounds = array<i64: 10, 32>}, {pipeline_mode = #tpu.pipeline_mode<synchronous>, transform_indices = @transform_1, window_bounds = array<i64: 32, 16>}, {pipeline_mode = #tpu.pipeline_mode<synchronous>, transform_indices = @transform_2, window_bounds = array<i64: 1, 16>}, {pipeline_mode = #tpu.pipeline_mode<synchronous>, transform_indices = @transform_3, window_bounds = array<i64: 10, 16>}]} {
    %c0 = arith.constant 0 : index
    %c0_0 = arith.constant 0 : index
    %0 = vector.load %arg1[%c0, %c0_0] : memref<10x32xf32, #tpu.memory_space<vmem>>, vector<10x32xf32>
    %c0_1 = arith.constant 0 : index
    %c0_2 = arith.constant 0 : index
    %1 = vector.load %arg2[%c0_1, %c0_2] : memref<32x16xf32, #tpu.memory_space<vmem>>, vector<32x16xf32>
    %cst = arith.constant dense<0.000000e+00> : vector<10x16xf32>
    %2 = tpu.matmul %0, %1, %cst {dimension_numbers = #tpu.dot_dimension_numbers<[1], [0], [0], [1], [0, 0, 1, 1], [], []>} : vector<10x32xf32>, vector<32x16xf32>, vector<10x16xf32> -> vector<10x16xf32>
    %c0_3 = arith.constant 0 : index
    %c0_4 = arith.constant 0 : index
    %3 = vector.load %arg3[%c0_3, %c0_4] : memref<1x16xf32, #tpu.memory_space<vmem>>, vector<1x16xf32>
    %4 = vector.broadcast %3 : vector<1x16xf32> to vector<10x16xf32>
    %5 = arith.addf %2, %4 : vector<10x16xf32>
    %c0_5 = arith.constant 0 : index
    %c0_6 = arith.constant 0 : index
    %6 = vector.load %arg4[%c0_5, %c0_6] : memref<10x16xf32, #tpu.memory_space<vmem>>, vector<10x16xf32>
    tpu.vector_store %arg4[%c0_5, %c0_6], %5 {strides = array<i32>} : memref<10x16xf32, #tpu.memory_space<vmem>>, vector<10x16xf32>,
    return
  }
  func.func @transform_0(%arg0: i32) -> (i32, i32) {
    %c0_i32 = arith.constant 0 : i32
    %c0_i32_0 = arith.constant 0 : i32
    %c0_i32_1 = arith.constant 0 : i32
    return %c0_i32, %c0_i32_0 : i32, i32
  }
  func.func @transform_1(%arg0: i32) -> (i32, i32) {
    %c0_i32 = arith.constant 0 : i32
    %c0_i32_0 = arith.constant 0 : i32
    %c0_i32_1 = arith.constant 0 : i32
    return %c0_i32, %c0_i32_0 : i32, i32
  }
  func.func @transform_2(%arg0: i32) -> (i32, i32) {
    %c0_i32 = arith.constant 0 : i32
    %c0_i32_0 = arith.constant 0 : i32
    %c0_i32_1 = arith.constant 0 : i32
    return %c0_i32, %c0_i32_0 : i32, i32
  }
  func.func @transform_3(%arg0: i32) -> (i32, i32) {
    %c0_i32 = arith.constant 0 : i32
    %c0_i32_0 = arith.constant 0 : i32
    %c0_i32_1 = arith.constant 0 : i32
    return %c0_i32, %c0_i32_0 : i32, i32
  }
}

module attributes {stable_mosaic.version = 11 : i64} {
  func.func @_dec_head_kernel(%arg0: i32, %arg1: memref<2x16x16xf32, #tpu.memory_space<vmem>>, %arg2: memref<1x16xf32, #tpu.memory_space<vmem>>, %arg3: memref<1x16xf32, #tpu.memory_space<vmem>>, %arg4: memref<16x48xf32, #tpu.memory_space<vmem>>, %arg5: memref<1x48xf32, #tpu.memory_space<vmem>>, %arg6: memref<2x16x48xf32, #tpu.memory_space<vmem>>, %arg7: memref<2x16x1xf32, #tpu.memory_space<vmem>>, %arg8: memref<2x16x48xf32, #tpu.memory_space<vmem>>, %arg9: memref<1x1xf32, #tpu.memory_space<vmem>>) attributes {dimension_semantics = [#tpu.dimension_semantics<arbitrary>], iteration_bounds = array<i64: 1>, scalar_prefetch = 0 : i64, scratch_operands = 0 : i64, tpu.core_type = #tpu.core_type<tc>, window_params = [{pipeline_mode = #tpu.pipeline_mode<synchronous>, transform_indices = @transform_0, window_bounds = array<i64: 2, 16, 16>}, {pipeline_mode = #tpu.pipeline_mode<synchronous>, transform_indices = @transform_1, window_bounds = array<i64: 1, 16>}, {pipeline_mode = #tpu.pipeline_mode<synchronous>, transform_indices = @transform_2, window_bounds = array<i64: 1, 16>}, {pipeline_mode = #tpu.pipeline_mode<synchronous>, transform_indices = @transform_3, window_bounds = array<i64: 16, 48>}, {pipeline_mode = #tpu.pipeline_mode<synchronous>, transform_indices = @transform_4, window_bounds = array<i64: 1, 48>}, {pipeline_mode = #tpu.pipeline_mode<synchronous>, transform_indices = @transform_5, window_bounds = array<i64: 2, 16, 48>}, {pipeline_mode = #tpu.pipeline_mode<synchronous>, transform_indices = @transform_6, window_bounds = array<i64: 2, 16, 1>}, {pipeline_mode = #tpu.pipeline_mode<synchronous>, transform_indices = @transform_7, window_bounds = array<i64: 2, 16, 48>}, {pipeline_mode = #tpu.pipeline_mode<synchronous>, transform_indices = @transform_8, window_bounds = array<i64: 1, 1>}]} {
    %c0 = arith.constant 0 : index
    %c0_0 = arith.constant 0 : index
    %0 = vector.load %arg4[%c0, %c0_0] : memref<16x48xf32, #tpu.memory_space<vmem>>, vector<16x48xf32>
    %c0_1 = arith.constant 0 : index
    %c0_2 = arith.constant 0 : index
    %1 = vector.load %arg2[%c0_1, %c0_2] : memref<1x16xf32, #tpu.memory_space<vmem>>, vector<1x16xf32>
    %c0_3 = arith.constant 0 : index
    %c0_4 = arith.constant 0 : index
    %2 = vector.load %arg3[%c0_3, %c0_4] : memref<1x16xf32, #tpu.memory_space<vmem>>, vector<1x16xf32>
    %c0_5 = arith.constant 0 : index
    %c0_6 = arith.constant 0 : index
    %3 = vector.load %arg5[%c0_5, %c0_6] : memref<1x48xf32, #tpu.memory_space<vmem>>, vector<1x48xf32>
    %cst = arith.constant 0.000000e+00 : f32
    %4 = vector.broadcast %cst : f32 to vector<1x1xf32>
    %cst_7 = arith.constant 0.000000e+00 : f32
    %5 = vector.broadcast %cst_7 : f32 to vector<1x1xf32>
    %c0_8 = arith.constant 0 : index
    %c0_9 = arith.constant 0 : index
    %c0_10 = arith.constant 0 : index
    %6 = vector.load %arg1[%c0_8, %c0_9, %c0_10] : memref<2x16x16xf32, #tpu.memory_space<vmem>>, vector<1x16x16xf32>
    %7 = vector.shape_cast %6 : vector<1x16x16xf32> to vector<16x16xf32>
    %cst_11 = arith.constant dense<0.000000e+00> : vector<16xf32>
    %8 = vector.multi_reduction <add>, %7, %cst_11 [1] : vector<16x16xf32> to vector<16xf32>
    %9 = vector.shape_cast %8 : vector<16xf32> to vector<16x1xf32>
    %cst_12 = arith.constant 1.600000e+01 : f32
    %10 = vector.broadcast %cst_12 : f32 to vector<16x1xf32>
    %11 = arith.divf %9, %10 : vector<16x1xf32>
    %12 = vector.broadcast %11 : vector<16x1xf32> to vector<16x16xf32>
    %13 = arith.subf %7, %12 : vector<16x16xf32>
    %14 = arith.mulf %13, %13 : vector<16x16xf32>
    %cst_13 = arith.constant dense<0.000000e+00> : vector<16xf32>
    %15 = vector.multi_reduction <add>, %14, %cst_13 [1] : vector<16x16xf32> to vector<16xf32>
    %16 = vector.shape_cast %15 : vector<16xf32> to vector<16x1xf32>
    %cst_14 = arith.constant 1.600000e+01 : f32
    %17 = vector.broadcast %cst_14 : f32 to vector<16x1xf32>
    %18 = arith.divf %16, %17 : vector<16x1xf32>
    %19 = vector.broadcast %11 : vector<16x1xf32> to vector<16x16xf32>
    %20 = arith.subf %7, %19 : vector<16x16xf32>
    %cst_15 = arith.constant 9.99999997E-7 : f32
    %21 = vector.broadcast %cst_15 : f32 to vector<16x1xf32>
    %22 = arith.addf %18, %21 : vector<16x1xf32>
    %23 = math.rsqrt %22 : vector<16x1xf32>
    %24 = vector.broadcast %23 : vector<16x1xf32> to vector<16x16xf32>
    %25 = arith.mulf %20, %24 : vector<16x16xf32>
    %26 = vector.broadcast %1 : vector<1x16xf32> to vector<16x16xf32>
    %27 = arith.mulf %25, %26 : vector<16x16xf32>
    %28 = vector.broadcast %2 : vector<1x16xf32> to vector<16x16xf32>
    %29 = arith.addf %27, %28 : vector<16x16xf32>
    %cst_16 = arith.constant dense<0.000000e+00> : vector<16x48xf32>
    %30 = tpu.matmul %29, %0, %cst_16 {dimension_numbers = #tpu.dot_dimension_numbers<[1], [0], [0], [1], [0, 0, 1, 1], [], []>} : vector<16x16xf32>, vector<16x48xf32>, vector<16x48xf32> -> vector<16x48xf32>
    %31 = vector.broadcast %3 : vector<1x48xf32> to vector<16x48xf32>
    %32 = arith.addf %30, %31 : vector<16x48xf32>
    %c0_17 = arith.constant 0 : index
    %c0_18 = arith.constant 0 : index
    %c0_19 = arith.constant 0 : index
    %33 = vector.load %arg8[%c0_17, %c0_18, %c0_19] : memref<2x16x48xf32, #tpu.memory_space<vmem>>, vector<1x16x48xf32>
    %34 = vector.shape_cast %33 : vector<1x16x48xf32> to vector<16x48xf32>
    %35 = vector.shape_cast %32 : vector<16x48xf32> to vector<1x16x48xf32>
    tpu.vector_store %arg8[%c0_17, %c0_18, %c0_19], %35 {strides = array<i32>} : memref<2x16x48xf32, #tpu.memory_space<vmem>>, vector<1x16x48xf32>,
    %c0_20 = arith.constant 0 : index
    %c0_21 = arith.constant 0 : index
    %c0_22 = arith.constant 0 : index
    %36 = vector.load %arg6[%c0_20, %c0_21, %c0_22] : memref<2x16x48xf32, #tpu.memory_space<vmem>>, vector<1x16x48xf32>
    %37 = vector.shape_cast %36 : vector<1x16x48xf32> to vector<16x48xf32>
    %38 = arith.subf %32, %37 : vector<16x48xf32>
    %39 = arith.mulf %38, %38 : vector<16x48xf32>
    %cst_23 = arith.constant dense<0.000000e+00> : vector<16xf32>
    %40 = vector.multi_reduction <add>, %39, %cst_23 [1] : vector<16x48xf32> to vector<16xf32>
    %41 = vector.shape_cast %40 : vector<16xf32> to vector<16x1xf32>
    %cst_24 = arith.constant 4.800000e+01 : f32
    %42 = vector.broadcast %cst_24 : f32 to vector<16x1xf32>
    %43 = arith.divf %41, %42 : vector<16x1xf32>
    %c0_25 = arith.constant 0 : index
    %c0_26 = arith.constant 0 : index
    %c0_27 = arith.constant 0 : index
    %44 = vector.load %arg7[%c0_25, %c0_26, %c0_27] : memref<2x16x1xf32, #tpu.memory_space<vmem>>, vector<1x16x1xf32>
    %45 = vector.shape_cast %44 : vector<1x16x1xf32> to vector<16x1xf32>
    %46 = arith.mulf %43, %45 : vector<16x1xf32>
    %47 = vector.shape_cast %46 : vector<16x1xf32> to vector<1x16x1xf32>
    %cst_28 = arith.constant dense<0.000000e+00> : vector<1xf32>
    %48 = vector.multi_reduction <add>, %47, %cst_28 [1, 2] : vector<1x16x1xf32> to vector<1xf32>
    %49 = vector.shape_cast %48 : vector<1xf32> to vector<1x1x1xf32>
    %50 = vector.extract %49[0, 0, 0] : f32 from vector<1x1x1xf32>
    %51 = vector.broadcast %50 : f32 to vector<1x1xf32>
    %52 = arith.addf %4, %51 : vector<1x1xf32>
    %53 = vector.shape_cast %45 : vector<16x1xf32> to vector<1x16x1xf32>
    %cst_29 = arith.constant dense<0.000000e+00> : vector<1xf32>
    %54 = vector.multi_reduction <add>, %53, %cst_29 [1, 2] : vector<1x16x1xf32> to vector<1xf32>
    %55 = vector.shape_cast %54 : vector<1xf32> to vector<1x1x1xf32>
    %56 = vector.extract %55[0, 0, 0] : f32 from vector<1x1x1xf32>
    %57 = vector.broadcast %56 : f32 to vector<1x1xf32>
    %58 = arith.addf %5, %57 : vector<1x1xf32>
    %c1 = arith.constant 1 : index
    %c0_30 = arith.constant 0 : index
    %c0_31 = arith.constant 0 : index
    %59 = vector.load %arg1[%c1, %c0_30, %c0_31] : memref<2x16x16xf32, #tpu.memory_space<vmem>>, vector<1x16x16xf32>
    %60 = vector.shape_cast %59 : vector<1x16x16xf32> to vector<16x16xf32>
    %cst_32 = arith.constant dense<0.000000e+00> : vector<16xf32>
    %61 = vector.multi_reduction <add>, %60, %cst_32 [1] : vector<16x16xf32> to vector<16xf32>
    %62 = vector.shape_cast %61 : vector<16xf32> to vector<16x1xf32>
    %cst_33 = arith.constant 1.600000e+01 : f32
    %63 = vector.broadcast %cst_33 : f32 to vector<16x1xf32>
    %64 = arith.divf %62, %63 : vector<16x1xf32>
    %65 = vector.broadcast %64 : vector<16x1xf32> to vector<16x16xf32>
    %66 = arith.subf %60, %65 : vector<16x16xf32>
    %67 = arith.mulf %66, %66 : vector<16x16xf32>
    %cst_34 = arith.constant dense<0.000000e+00> : vector<16xf32>
    %68 = vector.multi_reduction <add>, %67, %cst_34 [1] : vector<16x16xf32> to vector<16xf32>
    %69 = vector.shape_cast %68 : vector<16xf32> to vector<16x1xf32>
    %cst_35 = arith.constant 1.600000e+01 : f32
    %70 = vector.broadcast %cst_35 : f32 to vector<16x1xf32>
    %71 = arith.divf %69, %70 : vector<16x1xf32>
    %72 = vector.broadcast %64 : vector<16x1xf32> to vector<16x16xf32>
    %73 = arith.subf %60, %72 : vector<16x16xf32>
    %cst_36 = arith.constant 9.99999997E-7 : f32
    %74 = vector.broadcast %cst_36 : f32 to vector<16x1xf32>
    %75 = arith.addf %71, %74 : vector<16x1xf32>
    %76 = math.rsqrt %75 : vector<16x1xf32>
    %77 = vector.broadcast %76 : vector<16x1xf32> to vector<16x16xf32>
    %78 = arith.mulf %73, %77 : vector<16x16xf32>
    %79 = vector.broadcast %1 : vector<1x16xf32> to vector<16x16xf32>
    %80 = arith.mulf %78, %79 : vector<16x16xf32>
    %81 = vector.broadcast %2 : vector<1x16xf32> to vector<16x16xf32>
    %82 = arith.addf %80, %81 : vector<16x16xf32>
    %cst_37 = arith.constant dense<0.000000e+00> : vector<16x48xf32>
    %83 = tpu.matmul %82, %0, %cst_37 {dimension_numbers = #tpu.dot_dimension_numbers<[1], [0], [0], [1], [0, 0, 1, 1], [], []>} : vector<16x16xf32>, vector<16x48xf32>, vector<16x48xf32> -> vector<16x48xf32>
    %84 = vector.broadcast %3 : vector<1x48xf32> to vector<16x48xf32>
    %85 = arith.addf %83, %84 : vector<16x48xf32>
    %c1_38 = arith.constant 1 : index
    %c0_39 = arith.constant 0 : index
    %c0_40 = arith.constant 0 : index
    %86 = vector.load %arg8[%c1_38, %c0_39, %c0_40] : memref<2x16x48xf32, #tpu.memory_space<vmem>>, vector<1x16x48xf32>
    %87 = vector.shape_cast %86 : vector<1x16x48xf32> to vector<16x48xf32>
    %88 = vector.shape_cast %85 : vector<16x48xf32> to vector<1x16x48xf32>
    tpu.vector_store %arg8[%c1_38, %c0_39, %c0_40], %88 {strides = array<i32>} : memref<2x16x48xf32, #tpu.memory_space<vmem>>, vector<1x16x48xf32>,
    %c1_41 = arith.constant 1 : index
    %c0_42 = arith.constant 0 : index
    %c0_43 = arith.constant 0 : index
    %89 = vector.load %arg6[%c1_41, %c0_42, %c0_43] : memref<2x16x48xf32, #tpu.memory_space<vmem>>, vector<1x16x48xf32>
    %90 = vector.shape_cast %89 : vector<1x16x48xf32> to vector<16x48xf32>
    %91 = arith.subf %85, %90 : vector<16x48xf32>
    %92 = arith.mulf %91, %91 : vector<16x48xf32>
    %cst_44 = arith.constant dense<0.000000e+00> : vector<16xf32>
    %93 = vector.multi_reduction <add>, %92, %cst_44 [1] : vector<16x48xf32> to vector<16xf32>
    %94 = vector.shape_cast %93 : vector<16xf32> to vector<16x1xf32>
    %cst_45 = arith.constant 4.800000e+01 : f32
    %95 = vector.broadcast %cst_45 : f32 to vector<16x1xf32>
    %96 = arith.divf %94, %95 : vector<16x1xf32>
    %c1_46 = arith.constant 1 : index
    %c0_47 = arith.constant 0 : index
    %c0_48 = arith.constant 0 : index
    %97 = vector.load %arg7[%c1_46, %c0_47, %c0_48] : memref<2x16x1xf32, #tpu.memory_space<vmem>>, vector<1x16x1xf32>
    %98 = vector.shape_cast %97 : vector<1x16x1xf32> to vector<16x1xf32>
    %99 = arith.mulf %96, %98 : vector<16x1xf32>
    %100 = vector.shape_cast %99 : vector<16x1xf32> to vector<1x16x1xf32>
    %cst_49 = arith.constant dense<0.000000e+00> : vector<1xf32>
    %101 = vector.multi_reduction <add>, %100, %cst_49 [1, 2] : vector<1x16x1xf32> to vector<1xf32>
    %102 = vector.shape_cast %101 : vector<1xf32> to vector<1x1x1xf32>
    %103 = vector.extract %102[0, 0, 0] : f32 from vector<1x1x1xf32>
    %104 = vector.broadcast %103 : f32 to vector<1x1xf32>
    %105 = arith.addf %52, %104 : vector<1x1xf32>
    %106 = vector.shape_cast %98 : vector<16x1xf32> to vector<1x16x1xf32>
    %cst_50 = arith.constant dense<0.000000e+00> : vector<1xf32>
    %107 = vector.multi_reduction <add>, %106, %cst_50 [1, 2] : vector<1x16x1xf32> to vector<1xf32>
    %108 = vector.shape_cast %107 : vector<1xf32> to vector<1x1x1xf32>
    %109 = vector.extract %108[0, 0, 0] : f32 from vector<1x1x1xf32>
    %110 = vector.broadcast %109 : f32 to vector<1x1xf32>
    %111 = arith.addf %58, %110 : vector<1x1xf32>
    %112 = arith.divf %105, %111 : vector<1x1xf32>
    %c0_51 = arith.constant 0 : index
    %c0_52 = arith.constant 0 : index
    %113 = vector.load %arg9[%c0_51, %c0_52] : memref<1x1xf32, #tpu.memory_space<vmem>>, vector<1x1xf32>
    tpu.vector_store %arg9[%c0_51, %c0_52], %112 {strides = array<i32>} : memref<1x1xf32, #tpu.memory_space<vmem>>, vector<1x1xf32>,
    return
  }
  func.func @transform_0(%arg0: i32) -> (i32, i32, i32) {
    %c0_i32 = arith.constant 0 : i32
    %c0_i32_0 = arith.constant 0 : i32
    %c0_i32_1 = arith.constant 0 : i32
    %c0_i32_2 = arith.constant 0 : i32
    return %c0_i32, %c0_i32_0, %c0_i32_1 : i32, i32, i32
  }
  func.func @transform_1(%arg0: i32) -> (i32, i32) {
    %c0_i32 = arith.constant 0 : i32
    %c0_i32_0 = arith.constant 0 : i32
    %c0_i32_1 = arith.constant 0 : i32
    return %c0_i32, %c0_i32_0 : i32, i32
  }
  func.func @transform_2(%arg0: i32) -> (i32, i32) {
    %c0_i32 = arith.constant 0 : i32
    %c0_i32_0 = arith.constant 0 : i32
    %c0_i32_1 = arith.constant 0 : i32
    return %c0_i32, %c0_i32_0 : i32, i32
  }
  func.func @transform_3(%arg0: i32) -> (i32, i32) {
    %c0_i32 = arith.constant 0 : i32
    %c0_i32_0 = arith.constant 0 : i32
    %c0_i32_1 = arith.constant 0 : i32
    return %c0_i32, %c0_i32_0 : i32, i32
  }
  func.func @transform_4(%arg0: i32) -> (i32, i32) {
    %c0_i32 = arith.constant 0 : i32
    %c0_i32_0 = arith.constant 0 : i32
    %c0_i32_1 = arith.constant 0 : i32
    return %c0_i32, %c0_i32_0 : i32, i32
  }
  func.func @transform_5(%arg0: i32) -> (i32, i32, i32) {
    %c0_i32 = arith.constant 0 : i32
    %c0_i32_0 = arith.constant 0 : i32
    %c0_i32_1 = arith.constant 0 : i32
    %c0_i32_2 = arith.constant 0 : i32
    return %c0_i32, %c0_i32_0, %c0_i32_1 : i32, i32, i32
  }
  func.func @transform_6(%arg0: i32) -> (i32, i32, i32) {
    %c0_i32 = arith.constant 0 : i32
    %c0_i32_0 = arith.constant 0 : i32
    %c0_i32_1 = arith.constant 0 : i32
    %c0_i32_2 = arith.constant 0 : i32
    return %c0_i32, %c0_i32_0, %c0_i32_1 : i32, i32, i32
  }
  func.func @transform_7(%arg0: i32) -> (i32, i32, i32) {
    %c0_i32 = arith.constant 0 : i32
    %c0_i32_0 = arith.constant 0 : i32
    %c0_i32_1 = arith.constant 0 : i32
    %c0_i32_2 = arith.constant 0 : i32
    return %c0_i32, %c0_i32_0, %c0_i32_1 : i32, i32, i32
  }
  func.func @transform_8(%arg0: i32) -> (i32, i32) {
    %c0_i32 = arith.constant 0 : i32
    %c0_i32_0 = arith.constant 0 : i32
    %c0_i32_1 = arith.constant 0 : i32
    return %c0_i32, %c0_i32_0 : i32, i32
  }
}

module attributes {stable_mosaic.version = 11 : i64} {
  func.func @_block_kernel(%arg0: i32, %arg1: memref<1x17x16xf32, #tpu.memory_space<vmem>>, %arg2: memref<1x16xf32, #tpu.memory_space<vmem>>, %arg3: memref<1x16xf32, #tpu.memory_space<vmem>>, %arg4: memref<16x48xf32, #tpu.memory_space<vmem>>, %arg5: memref<1x48xf32, #tpu.memory_space<vmem>>, %arg6: memref<16x16xf32, #tpu.memory_space<vmem>>, %arg7: memref<1x16xf32, #tpu.memory_space<vmem>>, %arg8: memref<1x16xf32, #tpu.memory_space<vmem>>, %arg9: memref<1x16xf32, #tpu.memory_space<vmem>>, %arg10: memref<16x64xf32, #tpu.memory_space<vmem>>, %arg11: memref<1x64xf32, #tpu.memory_space<vmem>>, %arg12: memref<64x16xf32, #tpu.memory_space<vmem>>, %arg13: memref<1x16xf32, #tpu.memory_space<vmem>>, %arg14: memref<1x17x16xf32, #tpu.memory_space<vmem>>) attributes {dimension_semantics = [#tpu.dimension_semantics<parallel>], iteration_bounds = array<i64: 2>, scalar_prefetch = 0 : i64, scratch_operands = 0 : i64, tpu.core_type = #tpu.core_type<tc>, window_params = [{transform_indices = @transform_0, window_bounds = array<i64: 1, 17, 16>}, {pipeline_mode = #tpu.pipeline_mode<synchronous>, transform_indices = @transform_1, window_bounds = array<i64: 1, 16>}, {pipeline_mode = #tpu.pipeline_mode<synchronous>, transform_indices = @transform_2, window_bounds = array<i64: 1, 16>}, {pipeline_mode = #tpu.pipeline_mode<synchronous>, transform_indices = @transform_3, window_bounds = array<i64: 16, 48>}, {pipeline_mode = #tpu.pipeline_mode<synchronous>, transform_indices = @transform_4, window_bounds = array<i64: 1, 48>}, {pipeline_mode = #tpu.pipeline_mode<synchronous>, transform_indices = @transform_5, window_bounds = array<i64: 16, 16>}, {pipeline_mode = #tpu.pipeline_mode<synchronous>, transform_indices = @transform_6, window_bounds = array<i64: 1, 16>}, {pipeline_mode = #tpu.pipeline_mode<synchronous>, transform_indices = @transform_7, window_bounds = array<i64: 1, 16>}, {pipeline_mode = #tpu.pipeline_mode<synchronous>, transform_indices = @transform_8, window_bounds = array<i64: 1, 16>}, {pipeline_mode = #tpu.pipeline_mode<synchronous>, transform_indices = @transform_9, window_bounds = array<i64: 16, 64>}, {pipeline_mode = #tpu.pipeline_mode<synchronous>, transform_indices = @transform_10, window_bounds = array<i64: 1, 64>}, {pipeline_mode = #tpu.pipeline_mode<synchronous>, transform_indices = @transform_11, window_bounds = array<i64: 64, 16>}, {pipeline_mode = #tpu.pipeline_mode<synchronous>, transform_indices = @transform_12, window_bounds = array<i64: 1, 16>}, {transform_indices = @transform_13, window_bounds = array<i64: 1, 17, 16>}]} {
    %c0 = arith.constant 0 : index
    %c0_0 = arith.constant 0 : index
    %c0_1 = arith.constant 0 : index
    %0 = vector.load %arg1[%c0, %c0_0, %c0_1] : memref<1x17x16xf32, #tpu.memory_space<vmem>>, vector<1x17x16xf32>
    %1 = vector.shape_cast %0 : vector<1x17x16xf32> to vector<17x16xf32>
    %cst = arith.constant dense<0.000000e+00> : vector<17xf32>
    %2 = vector.multi_reduction <add>, %1, %cst [1] : vector<17x16xf32> to vector<17xf32>
    %3 = vector.shape_cast %2 : vector<17xf32> to vector<17x1xf32>
    %cst_2 = arith.constant 1.600000e+01 : f32
    %4 = vector.broadcast %cst_2 : f32 to vector<17x1xf32>
    %5 = arith.divf %3, %4 : vector<17x1xf32>
    %6 = vector.broadcast %5 : vector<17x1xf32> to vector<17x16xf32>
    %7 = arith.subf %1, %6 : vector<17x16xf32>
    %8 = arith.mulf %7, %7 : vector<17x16xf32>
    %cst_3 = arith.constant dense<0.000000e+00> : vector<17xf32>
    %9 = vector.multi_reduction <add>, %8, %cst_3 [1] : vector<17x16xf32> to vector<17xf32>
    %10 = vector.shape_cast %9 : vector<17xf32> to vector<17x1xf32>
    %cst_4 = arith.constant 1.600000e+01 : f32
    %11 = vector.broadcast %cst_4 : f32 to vector<17x1xf32>
    %12 = arith.divf %10, %11 : vector<17x1xf32>
    %13 = vector.broadcast %5 : vector<17x1xf32> to vector<17x16xf32>
    %14 = arith.subf %1, %13 : vector<17x16xf32>
    %cst_5 = arith.constant 9.99999997E-7 : f32
    %15 = vector.broadcast %cst_5 : f32 to vector<17x1xf32>
    %16 = arith.addf %12, %15 : vector<17x1xf32>
    %17 = math.rsqrt %16 : vector<17x1xf32>
    %18 = vector.broadcast %17 : vector<17x1xf32> to vector<17x16xf32>
    %19 = arith.mulf %14, %18 : vector<17x16xf32>
    %c0_6 = arith.constant 0 : index
    %c0_7 = arith.constant 0 : index
    %20 = vector.load %arg2[%c0_6, %c0_7] : memref<1x16xf32, #tpu.memory_space<vmem>>, vector<1x16xf32>
    %21 = vector.broadcast %20 : vector<1x16xf32> to vector<17x16xf32>
    %22 = arith.mulf %19, %21 : vector<17x16xf32>
    %c0_8 = arith.constant 0 : index
    %c0_9 = arith.constant 0 : index
    %23 = vector.load %arg3[%c0_8, %c0_9] : memref<1x16xf32, #tpu.memory_space<vmem>>, vector<1x16xf32>
    %24 = vector.broadcast %23 : vector<1x16xf32> to vector<17x16xf32>
    %25 = arith.addf %22, %24 : vector<17x16xf32>
    %c0_10 = arith.constant 0 : index
    %c0_11 = arith.constant 0 : index
    %26 = vector.load %arg4[%c0_10, %c0_11] : memref<16x48xf32, #tpu.memory_space<vmem>>, vector<16x48xf32>
    %cst_12 = arith.constant dense<0.000000e+00> : vector<17x48xf32>
    %27 = tpu.matmul %25, %26, %cst_12 {dimension_numbers = #tpu.dot_dimension_numbers<[1], [0], [0], [1], [0, 0, 1, 1], [], []>} : vector<17x16xf32>, vector<16x48xf32>, vector<17x48xf32> -> vector<17x48xf32>
    %c0_13 = arith.constant 0 : index
    %c0_14 = arith.constant 0 : index
    %28 = vector.load %arg5[%c0_13, %c0_14] : memref<1x48xf32, #tpu.memory_space<vmem>>, vector<1x48xf32>
    %29 = vector.broadcast %28 : vector<1x48xf32> to vector<17x48xf32>
    %30 = arith.addf %27, %29 : vector<17x48xf32>
    %c0_15 = arith.constant 0 : index
    %c0_16 = arith.constant 0 : index
    %31 = vector.load %arg6[%c0_15, %c0_16] : memref<16x16xf32, #tpu.memory_space<vmem>>, vector<16x16xf32>
    %cst_17 = arith.constant 0.000000e+00 : f32
    %32 = vector.broadcast %cst_17 : f32 to vector<17x16xf32>
    %33 = vector.extract_strided_slice %30 {offsets = [0, 0], sizes = [17, 4], strides = [1, 1]} : vector<17x48xf32> to vector<17x4xf32>
    %34 = vector.extract_strided_slice %30 {offsets = [0, 16], sizes = [17, 4], strides = [1, 1]} : vector<17x48xf32> to vector<17x4xf32>
    %35 = vector.extract_strided_slice %30 {offsets = [0, 32], sizes = [17, 4], strides = [1, 1]} : vector<17x48xf32> to vector<17x4xf32>
    %cst_18 = arith.constant dense<0.000000e+00> : vector<17x17xf32>
    %36 = tpu.matmul %33, %34, %cst_18 {dimension_numbers = #tpu.dot_dimension_numbers<[1], [1], [0], [0], [0, 0, 1, 0], [], []>} : vector<17x4xf32>, vector<17x4xf32>, vector<17x17xf32> -> vector<17x17xf32>
    %cst_19 = arith.constant 5.000000e-01 : f32
    %37 = vector.broadcast %cst_19 : f32 to vector<17x17xf32>
    %38 = arith.mulf %36, %37 : vector<17x17xf32>
    %cst_20 = arith.constant dense<0xFF800000> : vector<17xf32>
    %39 = vector.multi_reduction <maximumf>, %38, %cst_20 [1] : vector<17x17xf32> to vector<17xf32>
    %40 = vector.shape_cast %39 : vector<17xf32> to vector<17x1xf32>
    %41 = vector.broadcast %40 : vector<17x1xf32> to vector<17x17xf32>
    %42 = arith.subf %38, %41 : vector<17x17xf32>
    %43 = math.exp %42 : vector<17x17xf32>
    %cst_21 = arith.constant dense<0.000000e+00> : vector<17xf32>
    %44 = vector.multi_reduction <add>, %43, %cst_21 [1] : vector<17x17xf32> to vector<17xf32>
    %45 = vector.shape_cast %44 : vector<17xf32> to vector<17x1xf32>
    %46 = tpu.reciprocal %45 {approx = true} : vector<17x1xf32> -> vector<17x1xf32>
    %47 = vector.broadcast %46 : vector<17x1xf32> to vector<17x17xf32>
    %48 = arith.mulf %43, %47 : vector<17x17xf32>
    %cst_22 = arith.constant dense<0.000000e+00> : vector<17x4xf32>
    %49 = tpu.matmul %48, %35, %cst_22 {dimension_numbers = #tpu.dot_dimension_numbers<[1], [0], [0], [1], [0, 0, 1, 1], [], []>} : vector<17x17xf32>, vector<17x4xf32>, vector<17x4xf32> -> vector<17x4xf32>
    %50 = vector.extract_strided_slice %31 {offsets = [0, 0], sizes = [4, 16], strides = [1, 1]} : vector<16x16xf32> to vector<4x16xf32>
    %cst_23 = arith.constant dense<0.000000e+00> : vector<17x16xf32>
    %51 = tpu.matmul %49, %50, %cst_23 {dimension_numbers = #tpu.dot_dimension_numbers<[1], [0], [0], [1], [0, 0, 1, 1], [], []>} : vector<17x4xf32>, vector<4x16xf32>, vector<17x16xf32> -> vector<17x16xf32>
    %52 = arith.addf %32, %51 : vector<17x16xf32>
    %53 = vector.extract_strided_slice %30 {offsets = [0, 4], sizes = [17, 4], strides = [1, 1]} : vector<17x48xf32> to vector<17x4xf32>
    %54 = vector.extract_strided_slice %30 {offsets = [0, 20], sizes = [17, 4], strides = [1, 1]} : vector<17x48xf32> to vector<17x4xf32>
    %55 = vector.extract_strided_slice %30 {offsets = [0, 36], sizes = [17, 4], strides = [1, 1]} : vector<17x48xf32> to vector<17x4xf32>
    %cst_24 = arith.constant dense<0.000000e+00> : vector<17x17xf32>
    %56 = tpu.matmul %53, %54, %cst_24 {dimension_numbers = #tpu.dot_dimension_numbers<[1], [1], [0], [0], [0, 0, 1, 0], [], []>} : vector<17x4xf32>, vector<17x4xf32>, vector<17x17xf32> -> vector<17x17xf32>
    %cst_25 = arith.constant 5.000000e-01 : f32
    %57 = vector.broadcast %cst_25 : f32 to vector<17x17xf32>
    %58 = arith.mulf %56, %57 : vector<17x17xf32>
    %cst_26 = arith.constant dense<0xFF800000> : vector<17xf32>
    %59 = vector.multi_reduction <maximumf>, %58, %cst_26 [1] : vector<17x17xf32> to vector<17xf32>
    %60 = vector.shape_cast %59 : vector<17xf32> to vector<17x1xf32>
    %61 = vector.broadcast %60 : vector<17x1xf32> to vector<17x17xf32>
    %62 = arith.subf %58, %61 : vector<17x17xf32>
    %63 = math.exp %62 : vector<17x17xf32>
    %cst_27 = arith.constant dense<0.000000e+00> : vector<17xf32>
    %64 = vector.multi_reduction <add>, %63, %cst_27 [1] : vector<17x17xf32> to vector<17xf32>
    %65 = vector.shape_cast %64 : vector<17xf32> to vector<17x1xf32>
    %66 = tpu.reciprocal %65 {approx = true} : vector<17x1xf32> -> vector<17x1xf32>
    %67 = vector.broadcast %66 : vector<17x1xf32> to vector<17x17xf32>
    %68 = arith.mulf %63, %67 : vector<17x17xf32>
    %cst_28 = arith.constant dense<0.000000e+00> : vector<17x4xf32>
    %69 = tpu.matmul %68, %55, %cst_28 {dimension_numbers = #tpu.dot_dimension_numbers<[1], [0], [0], [1], [0, 0, 1, 1], [], []>} : vector<17x17xf32>, vector<17x4xf32>, vector<17x4xf32> -> vector<17x4xf32>
    %70 = vector.extract_strided_slice %31 {offsets = [4, 0], sizes = [4, 16], strides = [1, 1]} : vector<16x16xf32> to vector<4x16xf32>
    %cst_29 = arith.constant dense<0.000000e+00> : vector<17x16xf32>
    %71 = tpu.matmul %69, %70, %cst_29 {dimension_numbers = #tpu.dot_dimension_numbers<[1], [0], [0], [1], [0, 0, 1, 1], [], []>} : vector<17x4xf32>, vector<4x16xf32>, vector<17x16xf32> -> vector<17x16xf32>
    %72 = arith.addf %52, %71 : vector<17x16xf32>
    %73 = vector.extract_strided_slice %30 {offsets = [0, 8], sizes = [17, 4], strides = [1, 1]} : vector<17x48xf32> to vector<17x4xf32>
    %74 = vector.extract_strided_slice %30 {offsets = [0, 24], sizes = [17, 4], strides = [1, 1]} : vector<17x48xf32> to vector<17x4xf32>
    %75 = vector.extract_strided_slice %30 {offsets = [0, 40], sizes = [17, 4], strides = [1, 1]} : vector<17x48xf32> to vector<17x4xf32>
    %cst_30 = arith.constant dense<0.000000e+00> : vector<17x17xf32>
    %76 = tpu.matmul %73, %74, %cst_30 {dimension_numbers = #tpu.dot_dimension_numbers<[1], [1], [0], [0], [0, 0, 1, 0], [], []>} : vector<17x4xf32>, vector<17x4xf32>, vector<17x17xf32> -> vector<17x17xf32>
    %cst_31 = arith.constant 5.000000e-01 : f32
    %77 = vector.broadcast %cst_31 : f32 to vector<17x17xf32>
    %78 = arith.mulf %76, %77 : vector<17x17xf32>
    %cst_32 = arith.constant dense<0xFF800000> : vector<17xf32>
    %79 = vector.multi_reduction <maximumf>, %78, %cst_32 [1] : vector<17x17xf32> to vector<17xf32>
    %80 = vector.shape_cast %79 : vector<17xf32> to vector<17x1xf32>
    %81 = vector.broadcast %80 : vector<17x1xf32> to vector<17x17xf32>
    %82 = arith.subf %78, %81 : vector<17x17xf32>
    %83 = math.exp %82 : vector<17x17xf32>
    %cst_33 = arith.constant dense<0.000000e+00> : vector<17xf32>
    %84 = vector.multi_reduction <add>, %83, %cst_33 [1] : vector<17x17xf32> to vector<17xf32>
    %85 = vector.shape_cast %84 : vector<17xf32> to vector<17x1xf32>
    %86 = tpu.reciprocal %85 {approx = true} : vector<17x1xf32> -> vector<17x1xf32>
    %87 = vector.broadcast %86 : vector<17x1xf32> to vector<17x17xf32>
    %88 = arith.mulf %83, %87 : vector<17x17xf32>
    %cst_34 = arith.constant dense<0.000000e+00> : vector<17x4xf32>
    %89 = tpu.matmul %88, %75, %cst_34 {dimension_numbers = #tpu.dot_dimension_numbers<[1], [0], [0], [1], [0, 0, 1, 1], [], []>} : vector<17x17xf32>, vector<17x4xf32>, vector<17x4xf32> -> vector<17x4xf32>
    %90 = vector.extract_strided_slice %31 {offsets = [8, 0], sizes = [4, 16], strides = [1, 1]} : vector<16x16xf32> to vector<4x16xf32>
    %cst_35 = arith.constant dense<0.000000e+00> : vector<17x16xf32>
    %91 = tpu.matmul %89, %90, %cst_35 {dimension_numbers = #tpu.dot_dimension_numbers<[1], [0], [0], [1], [0, 0, 1, 1], [], []>} : vector<17x4xf32>, vector<4x16xf32>, vector<17x16xf32> -> vector<17x16xf32>
    %92 = arith.addf %72, %91 : vector<17x16xf32>
    %93 = vector.extract_strided_slice %30 {offsets = [0, 12], sizes = [17, 4], strides = [1, 1]} : vector<17x48xf32> to vector<17x4xf32>
    %94 = vector.extract_strided_slice %30 {offsets = [0, 28], sizes = [17, 4], strides = [1, 1]} : vector<17x48xf32> to vector<17x4xf32>
    %95 = vector.extract_strided_slice %30 {offsets = [0, 44], sizes = [17, 4], strides = [1, 1]} : vector<17x48xf32> to vector<17x4xf32>
    %cst_36 = arith.constant dense<0.000000e+00> : vector<17x17xf32>
    %96 = tpu.matmul %93, %94, %cst_36 {dimension_numbers = #tpu.dot_dimension_numbers<[1], [1], [0], [0], [0, 0, 1, 0], [], []>} : vector<17x4xf32>, vector<17x4xf32>, vector<17x17xf32> -> vector<17x17xf32>
    %cst_37 = arith.constant 5.000000e-01 : f32
    %97 = vector.broadcast %cst_37 : f32 to vector<17x17xf32>
    %98 = arith.mulf %96, %97 : vector<17x17xf32>
    %cst_38 = arith.constant dense<0xFF800000> : vector<17xf32>
    %99 = vector.multi_reduction <maximumf>, %98, %cst_38 [1] : vector<17x17xf32> to vector<17xf32>
    %100 = vector.shape_cast %99 : vector<17xf32> to vector<17x1xf32>
    %101 = vector.broadcast %100 : vector<17x1xf32> to vector<17x17xf32>
    %102 = arith.subf %98, %101 : vector<17x17xf32>
    %103 = math.exp %102 : vector<17x17xf32>
    %cst_39 = arith.constant dense<0.000000e+00> : vector<17xf32>
    %104 = vector.multi_reduction <add>, %103, %cst_39 [1] : vector<17x17xf32> to vector<17xf32>
    %105 = vector.shape_cast %104 : vector<17xf32> to vector<17x1xf32>
    %106 = tpu.reciprocal %105 {approx = true} : vector<17x1xf32> -> vector<17x1xf32>
    %107 = vector.broadcast %106 : vector<17x1xf32> to vector<17x17xf32>
    %108 = arith.mulf %103, %107 : vector<17x17xf32>
    %cst_40 = arith.constant dense<0.000000e+00> : vector<17x4xf32>
    %109 = tpu.matmul %108, %95, %cst_40 {dimension_numbers = #tpu.dot_dimension_numbers<[1], [0], [0], [1], [0, 0, 1, 1], [], []>} : vector<17x17xf32>, vector<17x4xf32>, vector<17x4xf32> -> vector<17x4xf32>
    %110 = vector.extract_strided_slice %31 {offsets = [12, 0], sizes = [4, 16], strides = [1, 1]} : vector<16x16xf32> to vector<4x16xf32>
    %cst_41 = arith.constant dense<0.000000e+00> : vector<17x16xf32>
    %111 = tpu.matmul %109, %110, %cst_41 {dimension_numbers = #tpu.dot_dimension_numbers<[1], [0], [0], [1], [0, 0, 1, 1], [], []>} : vector<17x4xf32>, vector<4x16xf32>, vector<17x16xf32> -> vector<17x16xf32>
    %112 = arith.addf %92, %111 : vector<17x16xf32>
    %113 = arith.addf %1, %112 : vector<17x16xf32>
    %c0_42 = arith.constant 0 : index
    %c0_43 = arith.constant 0 : index
    %114 = vector.load %arg7[%c0_42, %c0_43] : memref<1x16xf32, #tpu.memory_space<vmem>>, vector<1x16xf32>
    %115 = vector.broadcast %114 : vector<1x16xf32> to vector<17x16xf32>
    %116 = arith.addf %113, %115 : vector<17x16xf32>
    %cst_44 = arith.constant dense<0.000000e+00> : vector<17xf32>
    %117 = vector.multi_reduction <add>, %116, %cst_44 [1] : vector<17x16xf32> to vector<17xf32>
    %118 = vector.shape_cast %117 : vector<17xf32> to vector<17x1xf32>
    %cst_45 = arith.constant 1.600000e+01 : f32
    %119 = vector.broadcast %cst_45 : f32 to vector<17x1xf32>
    %120 = arith.divf %118, %119 : vector<17x1xf32>
    %121 = vector.broadcast %120 : vector<17x1xf32> to vector<17x16xf32>
    %122 = arith.subf %116, %121 : vector<17x16xf32>
    %123 = arith.mulf %122, %122 : vector<17x16xf32>
    %cst_46 = arith.constant dense<0.000000e+00> : vector<17xf32>
    %124 = vector.multi_reduction <add>, %123, %cst_46 [1] : vector<17x16xf32> to vector<17xf32>
    %125 = vector.shape_cast %124 : vector<17xf32> to vector<17x1xf32>
    %cst_47 = arith.constant 1.600000e+01 : f32
    %126 = vector.broadcast %cst_47 : f32 to vector<17x1xf32>
    %127 = arith.divf %125, %126 : vector<17x1xf32>
    %128 = vector.broadcast %120 : vector<17x1xf32> to vector<17x16xf32>
    %129 = arith.subf %116, %128 : vector<17x16xf32>
    %cst_48 = arith.constant 9.99999997E-7 : f32
    %130 = vector.broadcast %cst_48 : f32 to vector<17x1xf32>
    %131 = arith.addf %127, %130 : vector<17x1xf32>
    %132 = math.rsqrt %131 : vector<17x1xf32>
    %133 = vector.broadcast %132 : vector<17x1xf32> to vector<17x16xf32>
    %134 = arith.mulf %129, %133 : vector<17x16xf32>
    %c0_49 = arith.constant 0 : index
    %c0_50 = arith.constant 0 : index
    %135 = vector.load %arg8[%c0_49, %c0_50] : memref<1x16xf32, #tpu.memory_space<vmem>>, vector<1x16xf32>
    %136 = vector.broadcast %135 : vector<1x16xf32> to vector<17x16xf32>
    %137 = arith.mulf %134, %136 : vector<17x16xf32>
    %c0_51 = arith.constant 0 : index
    %c0_52 = arith.constant 0 : index
    %138 = vector.load %arg9[%c0_51, %c0_52] : memref<1x16xf32, #tpu.memory_space<vmem>>, vector<1x16xf32>
    %139 = vector.broadcast %138 : vector<1x16xf32> to vector<17x16xf32>
    %140 = arith.addf %137, %139 : vector<17x16xf32>
    %c0_53 = arith.constant 0 : index
    %c0_54 = arith.constant 0 : index
    %141 = vector.load %arg10[%c0_53, %c0_54] : memref<16x64xf32, #tpu.memory_space<vmem>>, vector<16x64xf32>
    %cst_55 = arith.constant dense<0.000000e+00> : vector<17x64xf32>
    %142 = tpu.matmul %140, %141, %cst_55 {dimension_numbers = #tpu.dot_dimension_numbers<[1], [0], [0], [1], [0, 0, 1, 1], [], []>} : vector<17x16xf32>, vector<16x64xf32>, vector<17x64xf32> -> vector<17x64xf32>
    %c0_56 = arith.constant 0 : index
    %c0_57 = arith.constant 0 : index
    %143 = vector.load %arg11[%c0_56, %c0_57] : memref<1x64xf32, #tpu.memory_space<vmem>>, vector<1x64xf32>
    %144 = vector.broadcast %143 : vector<1x64xf32> to vector<17x64xf32>
    %145 = arith.addf %142, %144 : vector<17x64xf32>
    %146 = arith.mulf %145, %145 : vector<17x64xf32>
    %147 = arith.mulf %145, %146 : vector<17x64xf32>
    %cst_58 = arith.constant 4.471500e-02 : f32
    %148 = vector.broadcast %cst_58 : f32 to vector<17x64xf32>
    %149 = arith.mulf %148, %147 : vector<17x64xf32>
    %150 = arith.addf %145, %149 : vector<17x64xf32>
    %cst_59 = arith.constant 0.797884583 : f32
    %151 = vector.broadcast %cst_59 : f32 to vector<17x64xf32>
    %152 = arith.mulf %151, %150 : vector<17x64xf32>
    %153 = math.tanh %152 : vector<17x64xf32>
    %cst_60 = arith.constant 1.000000e+00 : f32
    %154 = vector.broadcast %cst_60 : f32 to vector<17x64xf32>
    %155 = arith.addf %154, %153 : vector<17x64xf32>
    %cst_61 = arith.constant 5.000000e-01 : f32
    %156 = vector.broadcast %cst_61 : f32 to vector<17x64xf32>
    %157 = arith.mulf %156, %155 : vector<17x64xf32>
    %158 = arith.mulf %145, %157 : vector<17x64xf32>
    %c0_62 = arith.constant 0 : index
    %c0_63 = arith.constant 0 : index
    %159 = vector.load %arg12[%c0_62, %c0_63] : memref<64x16xf32, #tpu.memory_space<vmem>>, vector<64x16xf32>
    %cst_64 = arith.constant dense<0.000000e+00> : vector<17x16xf32>
    %160 = tpu.matmul %158, %159, %cst_64 {dimension_numbers = #tpu.dot_dimension_numbers<[1], [0], [0], [1], [0, 0, 1, 1], [], []>} : vector<17x64xf32>, vector<64x16xf32>, vector<17x16xf32> -> vector<17x16xf32>
    %c0_65 = arith.constant 0 : index
    %c0_66 = arith.constant 0 : index
    %161 = vector.load %arg13[%c0_65, %c0_66] : memref<1x16xf32, #tpu.memory_space<vmem>>, vector<1x16xf32>
    %162 = vector.broadcast %161 : vector<1x16xf32> to vector<17x16xf32>
    %163 = arith.addf %160, %162 : vector<17x16xf32>
    %164 = arith.addf %116, %163 : vector<17x16xf32>
    %c0_67 = arith.constant 0 : index
    %c0_68 = arith.constant 0 : index
    %c0_69 = arith.constant 0 : index
    %165 = vector.load %arg14[%c0_67, %c0_68, %c0_69] : memref<1x17x16xf32, #tpu.memory_space<vmem>>, vector<1x17x16xf32>
    %166 = vector.shape_cast %165 : vector<1x17x16xf32> to vector<17x16xf32>
    %167 = vector.shape_cast %164 : vector<17x16xf32> to vector<1x17x16xf32>
    tpu.vector_store %arg14[%c0_67, %c0_68, %c0_69], %167 {strides = array<i32>} : memref<1x17x16xf32, #tpu.memory_space<vmem>>, vector<1x17x16xf32>,
    return
  }
  func.func @transform_0(%arg0: i32) -> (i32, i32, i32) {
    %c0_i32 = arith.constant 0 : i32
    %c0_i32_0 = arith.constant 0 : i32
    %c0_i32_1 = arith.constant 0 : i32
    return %arg0, %c0_i32, %c0_i32_0 : i32, i32, i32
  }
  func.func @transform_1(%arg0: i32) -> (i32, i32) {
    %c0_i32 = arith.constant 0 : i32
    %c0_i32_0 = arith.constant 0 : i32
    %c0_i32_1 = arith.constant 0 : i32
    return %c0_i32, %c0_i32_0 : i32, i32
  }
  func.func @transform_2(%arg0: i32) -> (i32, i32) {
    %c0_i32 = arith.constant 0 : i32
    %c0_i32_0 = arith.constant 0 : i32
    %c0_i32_1 = arith.constant 0 : i32
    return %c0_i32, %c0_i32_0 : i32, i32
  }
  func.func @transform_3(%arg0: i32) -> (i32, i32) {
    %c0_i32 = arith.constant 0 : i32
    %c0_i32_0 = arith.constant 0 : i32
    %c0_i32_1 = arith.constant 0 : i32
    return %c0_i32, %c0_i32_0 : i32, i32
  }
  func.func @transform_4(%arg0: i32) -> (i32, i32) {
    %c0_i32 = arith.constant 0 : i32
    %c0_i32_0 = arith.constant 0 : i32
    %c0_i32_1 = arith.constant 0 : i32
    return %c0_i32, %c0_i32_0 : i32, i32
  }
  func.func @transform_5(%arg0: i32) -> (i32, i32) {
    %c0_i32 = arith.constant 0 : i32
    %c0_i32_0 = arith.constant 0 : i32
    %c0_i32_1 = arith.constant 0 : i32
    return %c0_i32, %c0_i32_0 : i32, i32
  }
  func.func @transform_6(%arg0: i32) -> (i32, i32) {
    %c0_i32 = arith.constant 0 : i32
    %c0_i32_0 = arith.constant 0 : i32
    %c0_i32_1 = arith.constant 0 : i32
    return %c0_i32, %c0_i32_0 : i32, i32
  }
  func.func @transform_7(%arg0: i32) -> (i32, i32) {
    %c0_i32 = arith.constant 0 : i32
    %c0_i32_0 = arith.constant 0 : i32
    %c0_i32_1 = arith.constant 0 : i32
    return %c0_i32, %c0_i32_0 : i32, i32
  }
  func.func @transform_8(%arg0: i32) -> (i32, i32) {
    %c0_i32 = arith.constant 0 : i32
    %c0_i32_0 = arith.constant 0 : i32
    %c0_i32_1 = arith.constant 0 : i32
    return %c0_i32, %c0_i32_0 : i32, i32
  }
  func.func @transform_9(%arg0: i32) -> (i32, i32) {
    %c0_i32 = arith.constant 0 : i32
    %c0_i32_0 = arith.constant 0 : i32
    %c0_i32_1 = arith.constant 0 : i32
    return %c0_i32, %c0_i32_0 : i32, i32
  }
  func.func @transform_10(%arg0: i32) -> (i32, i32) {
    %c0_i32 = arith.constant 0 : i32
    %c0_i32_0 = arith.constant 0 : i32
    %c0_i32_1 = arith.constant 0 : i32
    return %c0_i32, %c0_i32_0 : i32, i32
  }
  func.func @transform_11(%arg0: i32) -> (i32, i32) {
    %c0_i32 = arith.constant 0 : i32
    %c0_i32_0 = arith.constant 0 : i32
    %c0_i32_1 = arith.constant 0 : i32
    return %c0_i32, %c0_i32_0 : i32, i32
  }
  func.func @transform_12(%arg0: i32) -> (i32, i32) {
    %c0_i32 = arith.constant 0 : i32
    %c0_i32_0 = arith.constant 0 : i32
    %c0_i32_1 = arith.constant 0 : i32
    return %c0_i32, %c0_i32_0 : i32, i32
  }
  func.func @transform_13(%arg0: i32) -> (i32, i32, i32) {
    %c0_i32 = arith.constant 0 : i32
    %c0_i32_0 = arith.constant 0 : i32
    %c0_i32_1 = arith.constant 0 : i32
    return %arg0, %c0_i32, %c0_i32_0 : i32, i32, i32
  }
}

module attributes {stable_mosaic.version = 11 : i64} {
  func.func @_ema_kernel(%arg0: i32, %arg1: memref<64x128xf32, #tpu.memory_space<vmem>>, %arg2: memref<64x128xf32, #tpu.memory_space<vmem>>, %arg3: memref<64x128xf32, #tpu.memory_space<vmem>>) attributes {dimension_semantics = [#tpu.dimension_semantics<parallel>], iteration_bounds = array<i64: 4>, scalar_prefetch = 0 : i64, scratch_operands = 0 : i64, tpu.core_type = #tpu.core_type<tc>, window_params = [{transform_indices = @transform_0, window_bounds = array<i64: 64, 128>}, {transform_indices = @transform_1, window_bounds = array<i64: 64, 128>}, {transform_indices = @transform_2, window_bounds = array<i64: 64, 128>}]} {
    %c0 = arith.constant 0 : index
    %c0_0 = arith.constant 0 : index
    %0 = vector.load %arg1[%c0, %c0_0] : memref<64x128xf32, #tpu.memory_space<vmem>>, vector<64x128xf32>
    %cst = arith.constant 9.990000e-01 : f32
    %1 = vector.broadcast %cst : f32 to vector<64x128xf32>
    %2 = arith.mulf %1, %0 : vector<64x128xf32>
    %c0_1 = arith.constant 0 : index
    %c0_2 = arith.constant 0 : index
    %3 = vector.load %arg2[%c0_1, %c0_2] : memref<64x128xf32, #tpu.memory_space<vmem>>, vector<64x128xf32>
    %cst_3 = arith.constant 1.000000e-03 : f32
    %4 = vector.broadcast %cst_3 : f32 to vector<64x128xf32>
    %5 = arith.mulf %4, %3 : vector<64x128xf32>
    %6 = arith.addf %2, %5 : vector<64x128xf32>
    %c0_4 = arith.constant 0 : index
    %c0_5 = arith.constant 0 : index
    %7 = vector.load %arg3[%c0_4, %c0_5] : memref<64x128xf32, #tpu.memory_space<vmem>>, vector<64x128xf32>
    tpu.vector_store %arg3[%c0_4, %c0_5], %6 {strides = array<i32>} : memref<64x128xf32, #tpu.memory_space<vmem>>, vector<64x128xf32>,
    return
  }
  func.func @transform_0(%arg0: i32) -> (i32, i32) {
    %c0_i32 = arith.constant 0 : i32
    %c0_i32_0 = arith.constant 0 : i32
    return %arg0, %c0_i32 : i32, i32
  }
  func.func @transform_1(%arg0: i32) -> (i32, i32) {
    %c0_i32 = arith.constant 0 : i32
    %c0_i32_0 = arith.constant 0 : i32
    return %arg0, %c0_i32 : i32, i32
  }
  func.func @transform_2(%arg0: i32) -> (i32, i32) {
    %c0_i32 = arith.constant 0 : i32
    %c0_i32_0 = arith.constant 0 : i32
    return %arg0, %c0_i32 : i32, i32
  }
}

</mosaic_0001>

<bundles_post_ra>
// kernel: ema_mae_forward.7
= control target key start
LH: loop header
LB: loop body
LE: loop exit
PB: predicated region body
PF: predicated region fallthrough
CT: control target
= control target key end

     0   :  { %s365_s15 = smov 0   ;;  %s412_s0 = inlined_call_operand.vmem [shape: f32[2,16,48], index: 0, kind: input, shape index: {}]   ;;  %s413_s1 = inlined_call_operand.vmem [shape: f32[48,32], index: 1, kind: input, shape index: {}]   ;;  %s414_s2 = inlined_call_operand.vmem [shape: f32[1,32], index: 2, kind: input, shape index: {}]   ;;  %s415_s3 = inlined_call_operand.vmem [shape: f32[1,16,32], index: 3, kind: input, shape index: {}]   ;;  %s416_s4 = inlined_call_operand.vmem [shape: f32[2,16,32], index: 4, kind: output, shape index: {}]  }
   0x1 LB: > { %s302_s16 = sadd.s32 4294967295, %s338_s15   ;;  %p306_p0 = scmp.ge.s32.totalorder %s338_s15, 1  ;;  %s338_s15 = sphi %s365_s15, %s14_s15  }
   0x2   : > { %p162_p1 = scmp.lt.s32.totalorder %s338_s15, 3 }
   0x4   : > { %p163_p2 = pnand %p306_p0, %p162_p1 }
   0x5   : > { %p188_p3 = scmp.lt.s32.totalorder (!%p163_p2), %s302_s16, 1 }
   0x6   : > { %166 = sbr.rel (%p163_p2) target bundleno = 155 (0x9b), region = 36 }
   0xb   : > { %v205_v0 = vld [vmem:[%s413_s1 + $0x28] sm:$0xff]  ;;  %v204_v1 = vld [vmem:[%s413_s1 + $0x20] sm:$0xff]  ;;  %v203_v2 = vld [vmem:[%s413_s1 + $0x18] sm:$0xff]  ;;  %s418_s16 = smov (!%p188_p3, %s302_s16), 1  ;;  %vm210_vm0 = vcmask 392192   ;;  %vm244_vm1 = vcmask 261120  }
   0xc   : > { %227 = vmatpush.msra.mxu0 %v205_v0  ;;  %317 = vmatpush.msra.mxu1 %v205_v0  ;;  %v202_v3 = vld [vmem:[%s413_s1 + $0x10] sm:$0xff]  ;;  %s315_s25 = sshll.u32 %s418_s16, 4  ;;  %v201_v4 = vld [vmem:[%s413_s1 + $0x8] sm:$0xff]  ;;  %v200_v5 = vld [vmem:[%s413_s1] sm:$0xff] }
   0xd   : > { %s192_s30 = scalar_lea.vmem %s412_s0, %s315_s25  ;;  %v331_v8 = vld [vmem:[%s414_s2] ss:$0 sm:$0xff]  ;;  %v241_v12 = vld [vmem:[%s415_s3 + $0x8] sm:$0xff]  ;;  %s197_s16 = scalar_lea.vmem %s416_s4, %s315_s25 }
   0xe   : > { %228 = vmatpush.msra.mxu0 %v204_v1  ;;  %318 = vmatpush.msra.mxu1 %v204_v1  ;;  %v198_v6 = vld [vmem:[%s192_s30] sm:$0xff]  ;;  %v199_v7 = vld [vmem:[%s192_s30 + $0x8] sm:$0xff] }
   0xf   : > { %v240_v10 = vld [vmem:[%s415_s3] sm:$0xff] }
  0x10   : > { %229 = vmatpush.msra.mxu0 %v203_v2  ;;  %319 = vmatpush.msra.mxu1 %v203_v2 }
  0x12   : > { %230 = vmatpush.msra.mxu0 %v202_v3  ;;  %320 = vmatpush.msra.mxu1 %v202_v3 }
  0x14   : > { %231 = vmatpush.msra.mxu0 %v201_v4  ;;  %321 = vmatpush.msra.mxu1 %v201_v4 }
  0x16   : > { %232 = vmatpush.msra.mxu0 %v200_v5  ;;  %322 = vmatpush.msra.mxu1 %v200_v5 }
  0x17   : > { %311 = vmatmul.msk.f32.vlgmr.msra.gmra.mxu0 %vm210_vm0, %v198_v6  ;;  %312 = vmatmul.msk.f32.vlgmr.msra.gmra.mxu1 %vm210_vm0, %v199_v7 }
  0x94   : > { %v234_v9 = vpop.f32.mrf.mxu0  ;;  %v237_v11 = vpop.f32.mrf.mxu1 }
  0x95   : > { %v235_v13 = vadd.f32 %v331_v8, %v234_v9  ;;  %v238_v14 = vadd.f32 %v331_v8, %v237_v11 }
  0x97   : > { %v242_v15 = vadd.f32 %v240_v10, %v235_v13  ;;  %v243_v16 = vadd.f32 %v241_v12, %v238_v14 }
  0x99   : > { %245 = vst.msk [vmem:[%s197_s16] sm:$0xff] %vm244_vm1, %v242_v15 }
  0x9a   : > { %246 = vst.msk [vmem:[%s197_s16 + $0x8] sm:$0xff] %vm244_vm1, %v243_v16 }
  0x9b PF: > { %s14_s15 = sadd.s32 1, %s338_s15  }
  0x9c   : > { %p11_p4 = scmp.ge.s32.totalorder %s14_s15, 4  }
  0x9e   :  { %13 = sbr.rel (!%p11_p4) target bundleno = 1 (0x1), region = 66 }

// kernel: ema_mae_forward.10
= control target key start
LH: loop header
LB: loop body
LE: loop exit
PB: predicated region body
PF: predicated region fallthrough
CT: control target
= control target key end

     0   :  { %vm24_vm0 = vcmask 261120   ;;  %vm54_vm1 = vcmask 130048   ;;  %vm56_vm2 = vcmask 123904   ;;  %s116_s1 = inlined_call_operand.vmem [shape: f32[32,16], index: 1, kind: input, shape index: {}]   ;;  %s117_s2 = inlined_call_operand.vmem [shape: f32[1,16], index: 2, kind: input, shape index: {}]   ;;  %s118_s0 = inlined_call_operand.vmem [shape: f32[10,32], index: 0, kind: input, shape index: {}]   ;;  %s119_s3 = inlined_call_operand.vmem [shape: f32[10,16], index: 3, kind: output, shape index: {}]  }
   0x1   :  { %v19_v0 = vld [vmem:[%s116_s1 + $0x18] sm:$0xff]  ;;  %v18_v1 = vld [vmem:[%s116_s1 + $0x10] sm:$0xff]  ;;  %v17_v2 = vld [vmem:[%s116_s1 + $0x8] sm:$0xff] }
   0x2   :  { %43 = vmatpush.msra.mxu0 %v19_v0  ;;  %64 = vmatpush.msra.mxu1 %v19_v0  ;;  %v16_v3 = vld [vmem:[%s116_s1] sm:$0xff]  ;;  %v15_v5 = vld [vmem:[%s118_s0 + $0x8] sm:$0x3] }
   0x3   :  { %v14_v4 = vld [vmem:[%s118_s0] sm:$0xff] }
   0x4   :  { %44 = vmatpush.msra.mxu0 %v18_v1  ;;  %65 = vmatpush.msra.mxu1 %v18_v1  ;;  %v68_v6 = vld [vmem:[%s117_s2] ss:$0 sm:$0xff] }
   0x6   :  { %45 = vmatpush.msra.mxu0 %v17_v2  ;;  %66 = vmatpush.msra.mxu1 %v17_v2 }
   0x8   :  { %46 = vmatpush.msra.mxu0 %v16_v3  ;;  %67 = vmatpush.msra.mxu1 %v16_v3 }
   0x9   :  { %62 = vmatmul.msk.f32.vlgmr.msra.gmra.mxu0 %vm24_vm0, %v14_v4  ;;  %63 = vmatmul.msk.f32.vlgmr.msra.gmra.mxu1 %vm24_vm0, %v15_v5 }
  0x86   :  { %v48_v7 = vpop.f32.mrf.mxu0  ;;  %v51_v8 = vpop.f32.mrf.mxu1 }
  0x87   :  { %v49_v9 = vadd.f32 %v68_v6, %v48_v7  ;;  %v52_v10 = vadd.f32 %v68_v6, %v51_v8 }
  0x89   :  { %55 = vst.msk [vmem:[%s119_s3] sm:$0xff] %vm54_vm1, %v49_v9 }
  0x8a   :  { %57 = vst.msk [vmem:[%s119_s3 + $0x8] sm:$0x3] %vm56_vm2, %v52_v10 }

// kernel: ema_mae_forward.8
= control target key start
LH: loop header
LB: loop body
LE: loop exit
PB: predicated region body
PF: predicated region fallthrough
CT: control target
= control target key end

     0   :  { %s1224_s25 = smov 0   ;;  %s1421_s0 = inlined_call_operand.vmem [shape: f32[2,5,32], index: 0, kind: input, shape index: {}]   ;;  %s1422_s1 = inlined_call_operand.vmem [shape: f32[1,32], index: 1, kind: input, shape index: {}]   ;;  %s1423_s2 = inlined_call_operand.vmem [shape: f32[1,32], index: 2, kind: input, shape index: {}]   ;;  %s1424_s3 = inlined_call_operand.vmem [shape: f32[32,96], index: 3, kind: input, shape index: {}]   ;;  %s1425_s4 = inlined_call_operand.vmem [shape: f32[1,96], index: 4, kind: input, shape index: {}]   ;;  %s1426_s5 = inlined_call_operand.vmem [shape: f32[32,32], index: 5, kind: input, shape index: {}]   ;;  %s1427_s6 = inlined_call_operand.vmem [shape: f32[1,32], index: 6, kind: input, shape index: {}]   ;;  %s1428_s7 = inlined_call_operand.vmem [shape: f32[1,32], index: 7, kind: input, shape index: {}]   ;;  %s1429_s8 = inlined_call_operand.vmem [shape: f32[1,32], index: 8, kind: input, shape index: {}]   ;;  %s1430_s9 = inlined_call_operand.vmem [shape: f32[32,128], index: 9, kind: input, shape index: {}]   ;;  %s1431_s10 = inlined_call_operand.vmem [shape: f32[1,128], index: 10, kind: input, shape index: {}]   ;;  %s1432_s11 = inlined_call_operand.vmem [shape: f32[128,32], index: 11, kind: input, shape index: {}]   ;;  %s1433_s12 = inlined_call_operand.vmem [shape: f32[1,32], index: 12, kind: input, shape index: {}]   ;;  %s1434_s13 = inlined_call_operand.vmem [shape: f32[2,5,32], index: 13, kind: output, shape index: {}]  }
   0x1 LB: > { %s1051_s26 = sadd.s32 4294967295, %s1140_s25   ;;  %p1055_p0 = scmp.ge.s32.totalorder %s1140_s25, 1  ;;  %s1140_s25 = sphi %s1224_s25, %s23_s25  }
   0x2   : > { %p386_p1 = scmp.lt.s32.totalorder %s1140_s25, 3 }
   0x4   : > { %p387_p2 = pnand %p1055_p0, %p386_p1 }
   0x5   : > { %p428_p3 = scmp.lt.s32.totalorder (!%p387_p2), %s1051_s26, 1  ;;  %s1143_s14 = smov (!%p387_p2), 112  }
   0x6   : > { %390 = sbr.rel (%p387_p2) target bundleno = 2168 (0x878), region = 72  ;;  %s1144_s15 = smov (!%p387_p2), 120  }
   0x7   : > { %s1145_s16 = smov (!%p387_p2), 96   ;;  %s1146_s17 = smov (!%p387_p2), 80  }
   0x8   : > { %s1147_s18 = smov (!%p387_p2), 88   ;;  %s1148_s19 = smov (!%p387_p2), 64  }
   0x9   : > { %s1149_s20 = smov (!%p387_p2), 48   ;;  %s1150_s21 = smov (!%p387_p2), 72  }
   0xa   : > { %s1151_s22 = smov (!%p387_p2), 104   ;;  %s1152_s23 = smov (!%p387_p2), 40  }
   0xb   : > { %s1436_s26 = smov (!%p428_p3, %s1051_s26), 1  ;;  %vm437_vm0 = vcmask 258048   ;;  %v1142_v2 = vmov 32.0   ;;  %v480_v14 = vld [vmem:[%s1424_s3 + $0x18] sm:$0xff]  ;;  %v479_v15 = vld [vmem:[%s1424_s3 + $0x10] sm:$0xff]  ;;  %v478_v16 = vld [vmem:[%s1424_s3 + $0x8] sm:$0xff] }
   0xc   : > { %s1056_s27 = sshll.u32 %s1436_s26, 3  ;;  %1110 = vrcp.f32 %v1142_v2  ;;  %501 = vmatpush.msra.mxu0 %v480_v14  ;;  %v477_v17 = vld [vmem:[%s1424_s3] sm:$0xff]  ;;  %vm485_vm5 = vcmask 261120   ;;  %vm516_vm6 = vcmask 64512   ;;  %vm542_vm7 = vcmask 36864   ;;  %s1153_s24 = smov 56  }
   0xd   : > { %s431_s30 = scalar_lea.vmem %s1421_s0, %s1056_s27  ;;  %v1102_v27 = vld [vmem:[%s1422_s1] ss:$0 sm:$0xff]  ;;  %vm560_vm8 = vcmask 1044480   ;;  %vm556_vm9 = vcmask 39936  }
   0xe   : > { %v1240_v0 = vld [vmem:[%s431_s30] sm:$0x1f]  ;;  %502 = vmatpush.msra.mxu0 %v479_v15 }
   0xf   : > { %v438_v1 = vsel %vm437_vm0, %v1240_v0, 0.0  ;;  %v1103_v30 = vld [vmem:[%s1423_s2] ss:$0 sm:$0xff] }
  0x10   : > { %439 = vadd.xlane.f32.xlu0 %v438_v1  ;;  %503 = vmatpush.msra.mxu0 %v478_v16  ;;  %v1104_v33 = vld [vmem:[%s1425_s4] ss:$0 sm:$0xff] }
  0x12   : > { %v1111_v3 = vpop.eup %1110  ;;  %504 = vmatpush.msra.mxu0 %v477_v17 }
  0x13   : > { %v442_v4 = vmul.f32 32.0, %v1111_v3  ;;  %vm446_vm1 = vweird.f32 %v1111_v3 }
  0x15   : > { %v443_v5 = vsub.f32 1.0, %v442_v4 }
  0x17   : > { %v444_v6 = vmul.f32 %v1111_v3, %v443_v5 }
  0x19   : > { %v445_v7 = vadd.f32 %v1111_v3, %v444_v6 }
  0x1b   : > { %v1244_v8 = vsel %vm446_vm1, %v1111_v3, %v445_v7 }
  0x83   : > { %v440_v9 = vpop.xlane.xlu0 %439 }
  0x84   : > { %v448_v10 = vmul.f32 %v1244_v8, %v440_v9 }
  0x86   : > { %v449_v11 = vsub.f32 %v1240_v0, %v448_v10 }
  0x88   : > { %v450_v12 = vmul.f32 %v449_v11, %v449_v11 }
  0x8a   : > { %v451_v13 = vsel %vm437_vm0, %v450_v12, 0.0 }
  0x8b   : > { %452 = vadd.xlane.f32.xlu0 %v451_v13 }
  0xfe   : > { %v453_v18 = vpop.xlane.xlu0 %452 }
  0xff   : > { %v454_v19 = vmul.f32 %v453_v18, %v1244_v8  ;;  %v509_v18 = vld [vmem:[%s1426_s5] sm:$0xff] }
 0x100   : > { %691 = vmatpush.msra.mxu3 %v509_v18  ;;  %v961_v18 = vld [vmem:[%s1432_s11 + $0x28] sm:$0xff] }
 0x101   : > { %v455_v20 = vadd.f32 1e-06, %v454_v19 }
 0x103   : > { %1112 = vrsqrt.f32 %v455_v20  ;;  %vm462_vm3 = vweird.f32 %v455_v20 }
 0x109   : > { %v1113_v21 = vpop.eup %1112 }
 0x10a   : > { %v457_v22 = vmul.f32 %v1113_v21, %v455_v20  ;;  %vm463_vm2 = vweird.f32 %v1113_v21  ;;  %v510_v20 = vld [vmem:[%s1426_s5 + $0x8] sm:$0xff] }
 0x10b   : > { %vm464_vm4 = vmor %vm462_vm3, %vm463_vm2 }
 0x10c   : > { %v458_v23 = vmul.f32 %v1113_v21, %v457_v22 }
 0x10e   : > { %v459_v24 = vmul.f32 0.5, %v458_v23 }
 0x110   : > { %v460_v25 = vsub.f32 1.5, %v459_v24 }
 0x112   : > { %v461_v26 = vmul.f32 %v1113_v21, %v460_v25 }
 0x114   : > { %v465_v28 = vsel %vm464_vm4, %v1113_v21, %v461_v26  ;;  %v511_v21 = vld [vmem:[%s1426_s5 + $0x10] sm:$0xff] }
 0x115   : > { %v466_v29 = vmul.f32 %v465_v28, %v449_v11 }
 0x117   : > { %v471_v31 = vmul.f32 %v1102_v27, %v466_v29 }
 0x119   : > { %v476_v32 = vadd.f32 %v1103_v30, %v471_v31 }
 0x11b   : > { %1058 = vmatmul.msk.f32.vlgmr.msra.gmra.mxu0 %vm485_vm5, %v476_v32 }
 0x198   : > { %v506_v34 = vpop.f32.mrf.mxu0 }
 0x199   : > { %v1272_v35 = vadd.f32 %v1104_v33, %v506_v34 }
 0x19b   : > { %696 = vrot.lane.b32.xlu0 %v1272_v35, %s1143_s14  ;;  %583 = vrot.lane.b32.xlu2 %v1272_v35, %s1144_s15  ;;  %s435_s15 = scalar_lea.vmem %s1434_s13, %s1056_s27 }
 0x19c   : > { %514 = vrot.lane.b32.xlu1 %v1272_v35, %s1145_s16 }
 0x1a3   : > { %698 = vrot.lane.b32.xlu2 %v1272_v35, %s1146_s17 }
 0x1a4   : > { %585 = vrot.lane.b32.xlu1 %v1272_v35, %s1147_s18 }
 0x1f5   : > { %v584_v36 = vpop.permute.xlu2 %583 }
 0x1fd   : > { %v699_v39 = vpop.permute.xlu2 %698 }
 0x20d   : > { %v697_v40 = vpop.permute.xlu0 %696 }
 0x20e   : > { %v515_v37 = vpop.permute.xlu1 %514 }
 0x20f   : > { %1059 = vmatpush.xpose.msk.msra.mxu1 %vm516_vm6, %v515_v37 }
 0x212   : > { %1060 = vmatmul.msk.f32.vlgmr.msra.gmra.mxu1 %vm516_vm6, %v1272_v35 }
 0x213   : > { %668 = vmatpush.msrb.mxu1 %v510_v20  ;;  %v959_v20 = vld [vmem:[%s1432_s11 + $0x18] sm:$0xff] }
 0x215   : > { %781 = vmatpush.msra.mxu1 %v511_v21  ;;  %v958_v21 = vld [vmem:[%s1432_s11 + $0x10] sm:$0xff] }
 0x216   : > { %v586_v38 = vpop.permute.xlu1 %585 }
 0x217   : > { %1063 = vmatpush.xpose.msk.msrb.mxu0 %vm516_vm6, %v586_v38 }
 0x21a   : > { %1064 = vmatmul.msk.f32.vlgmr.msrb.gmra.mxu0 %vm516_vm6, %v584_v36 }
 0x21b   : > { %1069 = vmatpush.xpose.msk.msra.mxu0 %vm516_vm6, %v699_v39 }
 0x222   : > { %1070 = vmatmul.msk.f32.vlgmr.msra.gmra.mxu0 %vm516_vm6, %v697_v40 }
 0x28f   : > { %v538_v41 = vpop.f32.mrf.mxu1 }
 0x290   : > { %v541_v42 = vmul.f32 0.35355338, %v538_v41 }
 0x292   : > { %v543_v43 = vsel %vm542_vm7, %v541_v42, -inf }
 0x293   : > { %544 = vmax.xlane.f32.xlu1 %v543_v43 }
 0x297   : > { %v608_v44 = vpop.f32.mrf.mxu0 }
 0x298   : > { %v611_v45 = vmul.f32 0.35355338, %v608_v44  ;;  %v1105_v44 = vld [vmem:[%s1427_s6] ss:$0 sm:$0xff] }
 0x29a   : > { %v612_v46 = vsel %vm542_vm7, %v611_v45, -inf }
 0x29b   : > { %613 = vmax.xlane.f32.xlu2 %v612_v46 }
 0x29f   : > { %v721_v47 = vpop.f32.mrf.mxu0 }
 0x2a0   : > { %v724_v48 = vmul.f32 0.35355338, %v721_v47 }
 0x2a2   : > { %v725_v49 = vsel %vm542_vm7, %v724_v48, -inf }
 0x2a3   : > { %726 = vmax.xlane.f32.xlu0 %v725_v49 }
 0x2b3   : > { %554 = vrot.lane.b32.xlu2 %v1272_v35, %s1148_s19 }
 0x2b7   : > { %736 = vrot.lane.b32.xlu0 %v1272_v35, %s1149_s20 }
 0x306   : > { %v545_v50 = vpop.xlane.xlu1 %544 }
 0x307   : > { %v546_v51 = vsub.f32 %v541_v42, %v545_v50 }
 0x309   : > { %v547_v52 = vmul.f32 1.442695, %v546_v51 }
 0x30b   : > { %1114 = vpow2.f32 %v547_v52 }
 0x30e   : > { %v614_v53 = vpop.xlane.xlu2 %613 }
 0x30f   : > { %v615_v54 = vsub.f32 %v611_v45, %v614_v53  ;;  %v919_v53 = vld [vmem:[%s1430_s9 + $0x18] sm:$0xff] }
 0x311   : > { %v1115_v55 = vpop.eup %1114  ;;  %v616_v56 = vmul.f32 1.442695, %v615_v54  ;;  %v917_v54 = vld [vmem:[%s1430_s9 + $0x8] sm:$0xff] }
 0x312   : > { %v549_v57 = vsel %vm542_vm7, %v1115_v55, 0.0 }
 0x313   : > { %1116 = vpow2.f32 %v616_v56  ;;  %550 = vadd.xlane.f32.xlu2 %v549_v57  ;;  %v971_v56 = vld [vmem:[%s1432_s11 + $0x78] sm:$0xff]  ;;  %v970_v57 = vld [vmem:[%s1432_s11 + $0x70] sm:$0xff] }
 0x314   : > { %976 = vmatpush.msrb.mxu3 %v971_v56 }
 0x316   : > { %v727_v58 = vpop.xlane.xlu0 %726  ;;  %v555_v59 = vpop.permute.xlu2 %554  ;;  %977 = vmatpush.msrb.mxu3 %v970_v57 }
 0x317   : > { %v728_v60 = vsub.f32 %v724_v48, %v727_v58  ;;  %1061 = vmatpush.msk.msra.mxu2 %vm560_vm8, %v555_v59  ;;  %v969_v58 = vld [vmem:[%s1432_s11 + $0x68] sm:$0xff] }
 0x318   : > { %978 = vmatpush.msrb.mxu3 %v969_v58 }
 0x319   : > { %v1117_v61 = vpop.eup %1116  ;;  %v729_v62 = vmul.f32 1.442695, %v728_v60 }
 0x31a   : > { %v618_v63 = vsel %vm542_vm7, %v1117_v61, 0.0 }
 0x31b   : > { %1118 = vpow2.f32 %v729_v62  ;;  %619 = vadd.xlane.f32.xlu1 %v618_v63 }
 0x321   : > { %v1119_v1 = vpop.eup %1118 }
 0x322   : > { %v731_v2 = vsel %vm542_vm7, %v1119_v1, 0.0 }
 0x323   : > { %732 = vadd.xlane.f32.xlu1 %v731_v2 }
 0x329   : > { %v737_v15 = vpop.permute.xlu0 %736 }
 0x32b   : > { %789 = vrot.lane.b32.xlu2 %v1272_v35, %s1150_s21 }
 0x333   : > { %787 = vrot.lane.b32.xlu2 %v1272_v35, %s1151_s22 }
 0x33b   : > { %827 = vrot.lane.b32.xlu2 %v1272_v35, %s1152_s23 }
 0x33c   : > { %623 = vrot.lane.b32.xlu1 %v1272_v35, %s1153_s24  ;;  %v512_v35 = vld [vmem:[%s1426_s5 + $0x18] sm:$0xff] }
 0x386   : > { %v551_v3 = vpop.xlane.xlu2 %550 }
 0x387   : > { %1120 = vrcp.f32 %v551_v3 }
 0x38d   : > { %v1121_v4 = vpop.eup %1120 }
 0x38e   : > { %v790_v5 = vpop.permute.xlu2 %789  ;;  %v553_v6 = vmul.f32 %v1121_v4, %v1115_v55  ;;  %v620_v9 = vpop.xlane.xlu1 %619  ;;  %v916_v55 = vld [vmem:[%s1430_s9] sm:$0xff] }
 0x38f   : > { %1122 = vrcp.f32 %v620_v9 }
 0x390   : > { %1062 = vmatmul.msk.f32.vlgmr.msra.gmra.mxu2 %vm556_vm9, %v553_v6 }
 0x395   : > { %v1123_v12 = vpop.eup %1122 }
 0x396   : > { %v788_v7 = vpop.permute.xlu2 %787  ;;  %v733_v11 = vpop.xlane.xlu1 %732  ;;  %v622_v14 = vmul.f32 %v1123_v12, %v1117_v61  ;;  %v967_v12 = vld [vmem:[%s1432_s11 + $0x58] sm:$0xff] }
 0x397   : > { %1124 = vrcp.f32 %v733_v11  ;;  %v968_v11 = vld [vmem:[%s1432_s11 + $0x60] sm:$0xff] }
 0x398   : > { %979 = vmatpush.msrb.mxu3 %v968_v11 }
 0x39a   : > { %980 = vmatpush.msrb.mxu3 %v967_v12 }
 0x39d   : > { %v1125_v16 = vpop.eup %1124 }
 0x39e   : > { %v828_v10 = vpop.permute.xlu2 %827  ;;  %v735_v17 = vmul.f32 %v1125_v16, %v1119_v1  ;;  %v963_v16 = vld [vmem:[%s1432_s11 + $0x38] sm:$0xff] }
 0x39f   : > { %1076 = vmatpush.msk.msrb.mxu0 %vm560_vm8, %v828_v10 }
 0x3ae   : > { %v624_v13 = vpop.permute.xlu1 %623 }
 0x3af   : > { %1065 = vmatpush.msk.msrb.mxu2 %vm560_vm8, %v624_v13  ;;  %v966_v13 = vld [vmem:[%s1432_s11 + $0x50] sm:$0xff] }
 0x3b0   : > { %1066 = vmatmul.msk.f32.vlgmr.msrb.gmra.mxu2 %vm556_vm9, %v622_v14  ;;  %981 = vmatpush.msrb.mxu3 %v966_v13  ;;  %v965_v14 = vld [vmem:[%s1432_s11 + $0x48] sm:$0xff] }
 0x3b1   : > { %1071 = vmatpush.msk.msra.mxu2 %vm560_vm8, %v737_v15  ;;  %v964_v15 = vld [vmem:[%s1432_s11 + $0x40] sm:$0xff] }
 0x3b2   : > { %982 = vmatpush.msrb.mxu3 %v965_v14 }
 0x3b3   : > { %1074 = vmatpush.xpose.msk.msrb.mxu2 %vm516_vm6, %v790_v5  ;;  %v1106_v5 = vld [vmem:[%s1428_s7] ss:$0 sm:$0xff] }
 0x3b4   : > { %983 = vmatpush.msrb.mxu3 %v964_v15 }
 0x3b6   : > { %984 = vmatpush.msrb.mxu3 %v963_v16 }
 0x3b8   : > { %1072 = vmatmul.msk.f32.vlgmr.msra.gmra.mxu2 %vm556_vm9, %v735_v17  ;;  %v962_v17 = vld [vmem:[%s1432_s11 + $0x30] sm:$0xff] }
 0x3b9   : > { %872 = vmatpush.msra.mxu2 %v512_v35  ;;  %985 = vmatpush.msrb.mxu3 %v962_v17 }
 0x3bb   : > { %986 = vmatpush.msrb.mxu3 %v961_v18 }
 0x3c0   : > { %1075 = vmatmul.msk.f32.vlgmr.msrb.gmra.mxu2 %vm516_vm6, %v788_v7 }
 0x413   : > { %v580_v19 = vpop.f32.mrf.mxu2 }
 0x414   : > { %1068 = vmatmul.msk.f32.vlgmr.msra.gmra.mxu3 %vm516_vm6, %v580_v19  ;;  %v960_v19 = vld [vmem:[%s1432_s11 + $0x20] sm:$0xff] }
 0x415   : > { %987 = vmatpush.msrb.mxu3 %v960_v19 }
 0x417   : > { %988 = vmatpush.msrb.mxu3 %v959_v20 }
 0x419   : > { %989 = vmatpush.msrb.mxu3 %v958_v21 }
 0x433   : > { %v647_v22 = vpop.f32.mrf.mxu2 }
 0x434   : > { %1067 = vmatmul.msk.f32.vlgmr.msrb.gmra.mxu1 %vm516_vm6, %v647_v22  ;;  %v957_v22 = vld [vmem:[%s1432_s11 + $0x8] sm:$0xff] }
 0x435   : > { %939 = vmatpush.msrb.mxu1 %v919_v53  ;;  %990 = vmatpush.msrb.mxu3 %v957_v22 }
 0x43b   : > { %v760_v23 = vpop.f32.mrf.mxu2 }
 0x43c   : > { %1073 = vmatmul.msk.f32.vlgmr.msra.gmra.mxu1 %vm516_vm6, %v760_v23  ;;  %v956_v23 = vld [vmem:[%s1432_s11] sm:$0xff] }
 0x43d   : > { %991 = vmatpush.msrb.mxu3 %v956_v23 }
 0x443   : > { %v812_v24 = vpop.f32.mrf.mxu2 }
 0x444   : > { %v815_v25 = vmul.f32 0.35355338, %v812_v24  ;;  %v1108_v24 = vld [vmem:[%s1431_s10] ss:$0 sm:$0xff] }
 0x446   : > { %v816_v26 = vsel %vm542_vm7, %v815_v25, -inf }
 0x447   : > { %817 = vmax.xlane.f32.xlu0 %v816_v26 }
 0x497   : > { %v693_v38 = vpop.f32.mrf.mxu3 }
 0x4b1   : > { %v670_v37 = vpop.f32.mrf.mxu1 }
 0x4b2   : > { %v694_v40 = vadd.f32 %v693_v38, %v670_v37 }
 0x4b9   : > { %v783_v39 = vpop.f32.mrf.mxu1 }
 0x4ba   : > { %v818_v27 = vpop.xlane.xlu0 %817  ;;  %v786_v41 = vadd.f32 %v783_v39, %v694_v40 }
 0x4bb   : > { %v819_v28 = vsub.f32 %v815_v25, %v818_v27 }
 0x4bd   : > { %v820_v29 = vmul.f32 1.442695, %v819_v28 }
 0x4bf   : > { %1126 = vpow2.f32 %v820_v29 }
 0x4c5   : > { %v1127_v30 = vpop.eup %1126 }
 0x4c6   : > { %v822_v31 = vsel %vm542_vm7, %v1127_v30, 0.0 }
 0x4c7   : > { %823 = vadd.xlane.f32.xlu1 %v822_v31 }
 0x53a   : > { %v824_v32 = vpop.xlane.xlu1 %823 }
 0x53b   : > { %1128 = vrcp.f32 %v824_v32 }
 0x541   : > { %v1129_v33 = vpop.eup %1128 }
 0x542   : > { %v826_v34 = vmul.f32 %v1129_v33, %v1127_v30 }
 0x544   : > { %1077 = vmatmul.msk.f32.vlgmr.msrb.gmra.mxu0 %vm556_vm9, %v826_v34 }
 0x5c1   : > { %v851_v36 = vpop.f32.mrf.mxu0 }
 0x5c2   : > { %1078 = vmatmul.msk.f32.vlgmr.msra.gmra.mxu2 %vm516_vm6, %v851_v36  ;;  %v1109_v36 = vld [vmem:[%s1433_s12] ss:$0 sm:$0xff] }
 0x645   : > { %v874_v42 = vpop.f32.mrf.mxu2 }
 0x646   : > { %v877_v43 = vadd.f32 %v874_v42, %v786_v41 }
 0x648   : > { %v878_v45 = vadd.f32 %v877_v43, %v1240_v0  ;;  %v918_v0 = vld [vmem:[%s1430_s9 + $0x10] sm:$0xff] }
 0x649   : > { %940 = vmatpush.msrb.mxu1 %v918_v0 }
 0x64a   : > { %v1330_v46 = vadd.f32 %v1105_v44, %v878_v45 }
 0x64b   : > { %941 = vmatpush.msrb.mxu1 %v917_v54 }
 0x64c   : > { %v884_v47 = vsel %vm437_vm0, %v1330_v46, 0.0 }
 0x64d   : > { %885 = vadd.xlane.f32.xlu2 %v884_v47  ;;  %942 = vmatpush.msrb.mxu1 %v916_v55 }
 0x6c0   : > { %v886_v48 = vpop.xlane.xlu2 %885 }
 0x6c1   : > { %v887_v49 = vmul.f32 %v886_v48, %v1244_v8 }
 0x6c3   : > { %v888_v50 = vsub.f32 %v1330_v46, %v887_v49 }
 0x6c5   : > { %v889_v51 = vmul.f32 %v888_v50, %v888_v50 }
 0x6c7   : > { %v890_v52 = vsel %vm437_vm0, %v889_v51, 0.0 }
 0x6c8   : > { %891 = vadd.xlane.f32.xlu0 %v890_v52 }
 0x73b   : > { %v892_v59 = vpop.xlane.xlu0 %891 }
 0x73c   : > { %v893_v60 = vmul.f32 %v892_v59, %v1244_v8  ;;  %v1107_v8 = vld [vmem:[%s1429_s8] ss:$0 sm:$0xff] }
 0x73e   : > { %v894_v61 = vadd.f32 1e-06, %v893_v60 }
 0x740   : > { %1130 = vrsqrt.f32 %v894_v61  ;;  %vm901_vm11 = vweird.f32 %v894_v61 }
 0x746   : > { %v1131_v62 = vpop.eup %1130 }
 0x747   : > { %v896_v63 = vmul.f32 %v1131_v62, %v894_v61  ;;  %vm902_vm10 = vweird.f32 %v1131_v62 }
 0x748   : > { %vm903_vm12 = vmor %vm901_vm11, %vm902_vm10 }
 0x749   : > { %v897_v1 = vmul.f32 %v1131_v62, %v896_v63 }
 0x74b   : > { %v898_v2 = vmul.f32 0.5, %v897_v1 }
 0x74d   : > { %v899_v3 = vsub.f32 1.5, %v898_v2 }
 0x74f   : > { %v900_v4 = vmul.f32 %v1131_v62, %v899_v3 }
 0x751   : > { %v904_v6 = vsel %vm903_vm12, %v1131_v62, %v900_v4 }
 0x752   : > { %v905_v7 = vmul.f32 %v904_v6, %v888_v50 }
 0x754   : > { %v910_v9 = vmul.f32 %v1106_v5, %v905_v7 }
 0x756   : > { %v915_v10 = vadd.f32 %v1107_v8, %v910_v9 }
 0x758   : > { %1079 = vmatmul.msk.f32.vlgmr.msrb.gmra.mxu1 %vm485_vm5, %v915_v10 }
 0x7d5   : > { %v944_v25 = vpop.f32.mrf.mxu1 }
 0x7d6   : > { %v945_v26 = vadd.f32 %v1108_v24, %v944_v25 }
 0x7d8   : > { %v947_v27 = vmul.f32 %v945_v26, %v945_v26 }
 0x7da   : > { %v948_v28 = vmul.f32 %v947_v27, %v945_v26 }
 0x7dc   : > { %v949_v29 = vmul.f32 0.044715, %v948_v28 }
 0x7de   : > { %v950_v30 = vadd.f32 %v949_v29, %v945_v26 }
 0x7e0   : > { %v951_v31 = vmul.f32 0.7978846, %v950_v30 }
 0x7e2   : > { %1132 = vtanh.f32 %v951_v31 }
 0x7e8   : > { %v1133_v32 = vpop.eup %1132 }
 0x7e9   : > { %v953_v33 = vadd.f32 1.0, %v1133_v32 }
 0x7eb   : > { %v954_v34 = vmul.f32 0.5, %v953_v33 }
 0x7ed   : > { %v955_v35 = vmul.f32 %v954_v34, %v945_v26 }
 0x7ef   : > { %992 = vmatmul.f32.vlgmr.msrb.gmra.mxu3 %v955_v35 }
 0x872   : > { %v993_v37 = vpop.f32.mrf.mxu3 }
 0x873   : > { %v994_v38 = vadd.f32 %v1109_v36, %v993_v37 }
 0x875   : > { %v996_v39 = vadd.f32 %v994_v38, %v1330_v46 }
 0x877   : > { %997 = vst.msk [vmem:[%s435_s15] sm:$0x1f] %vm437_vm0, %v996_v39 }
 0x878 PF: > { %s23_s25 = sadd.s32 1, %s1140_s25  }
 0x879   : > { %p20_p4 = scmp.ge.s32.totalorder %s23_s25, 4  }
 0x87b   :  { %22 = sbr.rel (!%p20_p4) target bundleno = 1 (0x1), region = 102 }

// kernel: ema_mae_forward.9
= control target key start
LH: loop header
LB: loop body
LE: loop exit
PB: predicated region body
PF: predicated region fallthrough
CT: control target
= control target key end

     0   :  { %s1324_s18 = smov 0   ;;  %s1531_s0 = inlined_call_operand.vmem [shape: f32[2,5,32], index: 0, kind: input, shape index: {}]   ;;  %s1532_s1 = inlined_call_operand.vmem [shape: f32[1,32], index: 1, kind: input, shape index: {}]   ;;  %s1533_s2 = inlined_call_operand.vmem [shape: f32[1,32], index: 2, kind: input, shape index: {}]   ;;  %s1534_s3 = inlined_call_operand.vmem [shape: f32[32,96], index: 3, kind: input, shape index: {}]   ;;  %s1535_s4 = inlined_call_operand.vmem [shape: f32[1,96], index: 4, kind: input, shape index: {}]   ;;  %s1536_s5 = inlined_call_operand.vmem [shape: f32[32,32], index: 5, kind: input, shape index: {}]   ;;  %s1537_s6 = inlined_call_operand.vmem [shape: f32[1,32], index: 6, kind: input, shape index: {}]   ;;  %s1538_s7 = inlined_call_operand.vmem [shape: f32[1,32], index: 7, kind: input, shape index: {}]   ;;  %s1539_s8 = inlined_call_operand.vmem [shape: f32[1,32], index: 8, kind: input, shape index: {}]   ;;  %s1540_s9 = inlined_call_operand.vmem [shape: f32[32,128], index: 9, kind: input, shape index: {}]   ;;  %s1541_s10 = inlined_call_operand.vmem [shape: f32[1,128], index: 10, kind: input, shape index: {}]   ;;  %s1542_s11 = inlined_call_operand.vmem [shape: f32[128,32], index: 11, kind: input, shape index: {}]   ;;  %s1543_s12 = inlined_call_operand.vmem [shape: f32[1,32], index: 12, kind: input, shape index: {}]   ;;  %s1544_s13 = inlined_call_operand.vmem [shape: f32[1,32], index: 13, kind: input, shape index: {}]   ;;  %s1545_s14 = inlined_call_operand.vmem [shape: f32[1,32], index: 14, kind: input, shape index: {}]   ;;  %s1546_s15 = inlined_call_operand.vmem [shape: f32[2,5,32], index: 15, kind: output, shape index: {}]  }
   0x1 LB: > { %s1137_s19 = sadd.s32 4294967295, %s1230_s18   ;;  %p1141_p0 = scmp.ge.s32.totalorder %s1230_s18, 1  ;;  %s1230_s18 = sphi %s1324_s18, %s25_s18  }
   0x2   : > { %p436_p1 = scmp.lt.s32.totalorder %s1230_s18, 3 }
   0x4   : > { %p437_p2 = pnand %p1141_p0, %p436_p1 }
   0x5   : > { %p482_p3 = scmp.lt.s32.totalorder (!%p437_p2), %s1137_s19, 1  ;;  %s1233_s26 = smov (!%p437_p2), 112  }
   0x6   : > { %440 = sbr.rel (%p437_p2) target bundleno = 2436 (0x984), region = 80  ;;  %s1234_s27 = smov (!%p437_p2), 120  }
   0x7   : > { %s1235_s28 = smov (!%p437_p2), 96   ;;  %s1236_s29 = smov (!%p437_p2), 80  }
   0x8   : > { %s1237_s30 = smov (!%p437_p2), 88   ;;  %s1238_s16 = smov (!%p437_p2), 64  }
   0x9   : > { %s1239_s17 = smov (!%p437_p2), 48   ;;  %s1240_s21 = smov (!%p437_p2), 72  }
   0xa   : > { %s1241_s22 = smov (!%p437_p2), 104   ;;  %s1243_s24 = smov (!%p437_p2), 56  }
   0xb   : > { %s1548_s19 = smov (!%p482_p3, %s1137_s19), 1  ;;  %vm491_vm0 = vcmask 258048   ;;  %v1232_v2 = vmov 32.0   ;;  %v534_v14 = vld [vmem:[%s1534_s3 + $0x18] sm:$0xff]  ;;  %v533_v15 = vld [vmem:[%s1534_s3 + $0x10] sm:$0xff]  ;;  %v532_v16 = vld [vmem:[%s1534_s3 + $0x8] sm:$0xff] }
   0xc   : > { %s1142_s20 = sshll.u32 %s1548_s19, 3  ;;  %1198 = vrcp.f32 %v1232_v2  ;;  %555 = vmatpush.msra.mxu0 %v534_v14  ;;  %v531_v17 = vld [vmem:[%s1534_s3] sm:$0xff]  ;;  %vm539_vm5 = vcmask 261120   ;;  %vm570_vm6 = vcmask 64512   ;;  %vm596_vm7 = vcmask 36864  }
   0xd   : > { %s485_s23 = scalar_lea.vmem %s1531_s0, %s1142_s20  ;;  %v1188_v27 = vld [vmem:[%s1532_s1] ss:$0 sm:$0xff]  ;;  %vm614_vm8 = vcmask 1044480   ;;  %vm610_vm9 = vcmask 39936  }
   0xe   : > { %v1340_v0 = vld [vmem:[%s485_s23] sm:$0x1f]  ;;  %556 = vmatpush.msra.mxu0 %v533_v15  ;;  %s1242_s23 = smov 40  }
   0xf   : > { %v492_v1 = vsel %vm491_vm0, %v1340_v0, 0.0  ;;  %v1189_v30 = vld [vmem:[%s1533_s2] ss:$0 sm:$0xff] }
  0x10   : > { %493 = vadd.xlane.f32.xlu0 %v492_v1  ;;  %557 = vmatpush.msra.mxu0 %v532_v16  ;;  %v1190_v33 = vld [vmem:[%s1535_s4] ss:$0 sm:$0xff] }
  0x12   : > { %v1199_v3 = vpop.eup %1198  ;;  %558 = vmatpush.msra.mxu0 %v531_v17 }
  0x13   : > { %v496_v4 = vmul.f32 32.0, %v1199_v3  ;;  %vm500_vm1 = vweird.f32 %v1199_v3 }
  0x15   : > { %v497_v5 = vsub.f32 1.0, %v496_v4 }
  0x17   : > { %v498_v6 = vmul.f32 %v1199_v3, %v497_v5 }
  0x19   : > { %v499_v7 = vadd.f32 %v1199_v3, %v498_v6 }
  0x1b   : > { %v1344_v8 = vsel %vm500_vm1, %v1199_v3, %v499_v7 }
  0x83   : > { %v494_v9 = vpop.xlane.xlu0 %493 }
  0x84   : > { %v502_v10 = vmul.f32 %v1344_v8, %v494_v9 }
  0x86   : > { %v503_v11 = vsub.f32 %v1340_v0, %v502_v10 }
  0x88   : > { %v504_v12 = vmul.f32 %v503_v11, %v503_v11 }
  0x8a   : > { %v505_v13 = vsel %vm491_vm0, %v504_v12, 0.0 }
  0x8b   : > { %506 = vadd.xlane.f32.xlu0 %v505_v13 }
  0xfe   : > { %v507_v18 = vpop.xlane.xlu0 %506 }
  0xff   : > { %v508_v19 = vmul.f32 %v507_v18, %v1344_v8  ;;  %v563_v18 = vld [vmem:[%s1536_s5] sm:$0xff] }
 0x100   : > { %745 = vmatpush.msra.mxu3 %v563_v18  ;;  %v1016_v18 = vld [vmem:[%s1542_s11 + $0x30] sm:$0xff] }
 0x101   : > { %v509_v20 = vadd.f32 1e-06, %v508_v19 }
 0x103   : > { %1200 = vrsqrt.f32 %v509_v20  ;;  %vm516_vm3 = vweird.f32 %v509_v20 }
 0x109   : > { %v1201_v21 = vpop.eup %1200 }
 0x10a   : > { %v511_v22 = vmul.f32 %v1201_v21, %v509_v20  ;;  %vm517_vm2 = vweird.f32 %v1201_v21  ;;  %v564_v20 = vld [vmem:[%s1536_s5 + $0x8] sm:$0xff] }
 0x10b   : > { %vm518_vm4 = vmor %vm516_vm3, %vm517_vm2 }
 0x10c   : > { %v512_v23 = vmul.f32 %v1201_v21, %v511_v22 }
 0x10e   : > { %v513_v24 = vmul.f32 0.5, %v512_v23 }
 0x110   : > { %v514_v25 = vsub.f32 1.5, %v513_v24 }
 0x112   : > { %v515_v26 = vmul.f32 %v1201_v21, %v514_v25 }
 0x114   : > { %v519_v28 = vsel %vm518_vm4, %v1201_v21, %v515_v26  ;;  %v565_v21 = vld [vmem:[%s1536_s5 + $0x10] sm:$0xff] }
 0x115   : > { %v520_v29 = vmul.f32 %v519_v28, %v503_v11 }
 0x117   : > { %v525_v31 = vmul.f32 %v1188_v27, %v520_v29 }
 0x119   : > { %v530_v32 = vadd.f32 %v1189_v30, %v525_v31 }
 0x11b   : > { %1144 = vmatmul.msk.f32.vlgmr.msra.gmra.mxu0 %vm539_vm5, %v530_v32 }
 0x198   : > { %v560_v34 = vpop.f32.mrf.mxu0 }
 0x199   : > { %v1372_v35 = vadd.f32 %v1190_v33, %v560_v34 }
 0x19b   : > { %750 = vrot.lane.b32.xlu0 %v1372_v35, %s1233_s26  ;;  %637 = vrot.lane.b32.xlu2 %v1372_v35, %s1234_s27 }
 0x19c   : > { %568 = vrot.lane.b32.xlu1 %v1372_v35, %s1235_s28 }
 0x1a3   : > { %752 = vrot.lane.b32.xlu2 %v1372_v35, %s1236_s29  ;;  %s489_s29 = scalar_lea.vmem %s1546_s15, %s1142_s20 }
 0x1a4   : > { %639 = vrot.lane.b32.xlu1 %v1372_v35, %s1237_s30 }
 0x1f5   : > { %v638_v36 = vpop.permute.xlu2 %637 }
 0x1fd   : > { %v753_v39 = vpop.permute.xlu2 %752 }
 0x20d   : > { %v751_v40 = vpop.permute.xlu0 %750 }
 0x20e   : > { %v569_v37 = vpop.permute.xlu1 %568 }
 0x20f   : > { %1145 = vmatpush.xpose.msk.msra.mxu1 %vm570_vm6, %v569_v37 }
 0x212   : > { %1146 = vmatmul.msk.f32.vlgmr.msra.gmra.mxu1 %vm570_vm6, %v1372_v35 }
 0x213   : > { %722 = vmatpush.msrb.mxu1 %v564_v20  ;;  %v1014_v20 = vld [vmem:[%s1542_s11 + $0x20] sm:$0xff] }
 0x215   : > { %835 = vmatpush.msra.mxu1 %v565_v21  ;;  %v1013_v21 = vld [vmem:[%s1542_s11 + $0x18] sm:$0xff] }
 0x216   : > { %v640_v38 = vpop.permute.xlu1 %639 }
 0x217   : > { %1149 = vmatpush.xpose.msk.msrb.mxu0 %vm570_vm6, %v640_v38 }
 0x21a   : > { %1150 = vmatmul.msk.f32.vlgmr.msrb.gmra.mxu0 %vm570_vm6, %v638_v36 }
 0x21b   : > { %1155 = vmatpush.xpose.msk.msra.mxu0 %vm570_vm6, %v753_v39 }
 0x222   : > { %1156 = vmatmul.msk.f32.vlgmr.msra.gmra.mxu0 %vm570_vm6, %v751_v40 }
 0x28f   : > { %v592_v41 = vpop.f32.mrf.mxu1 }
 0x290   : > { %v595_v42 = vmul.f32 0.35355338, %v592_v41 }
 0x292   : > { %v597_v43 = vsel %vm596_vm7, %v595_v42, -inf }
 0x293   : > { %598 = vmax.xlane.f32.xlu1 %v597_v43 }
 0x297   : > { %v662_v44 = vpop.f32.mrf.mxu0 }
 0x298   : > { %v665_v45 = vmul.f32 0.35355338, %v662_v44  ;;  %v1191_v44 = vld [vmem:[%s1537_s6] ss:$0 sm:$0xff] }
 0x29a   : > { %v666_v46 = vsel %vm596_vm7, %v665_v45, -inf }
 0x29b   : > { %667 = vmax.xlane.f32.xlu2 %v666_v46 }
 0x29f   : > { %v775_v47 = vpop.f32.mrf.mxu0 }
 0x2a0   : > { %v778_v48 = vmul.f32 0.35355338, %v775_v47 }
 0x2a2   : > { %v779_v49 = vsel %vm596_vm7, %v778_v48, -inf }
 0x2a3   : > { %780 = vmax.xlane.f32.xlu0 %v779_v49 }
 0x2b3   : > { %608 = vrot.lane.b32.xlu2 %v1372_v35, %s1238_s16 }
 0x2b7   : > { %790 = vrot.lane.b32.xlu0 %v1372_v35, %s1239_s17 }
 0x306   : > { %v599_v50 = vpop.xlane.xlu1 %598 }
 0x307   : > { %v600_v51 = vsub.f32 %v595_v42, %v599_v50 }
 0x309   : > { %v601_v52 = vmul.f32 1.442695, %v600_v51 }
 0x30b   : > { %1202 = vpow2.f32 %v601_v52 }
 0x30e   : > { %v668_v53 = vpop.xlane.xlu2 %667 }
 0x30f   : > { %v669_v54 = vsub.f32 %v665_v45, %v668_v53  ;;  %v973_v53 = vld [vmem:[%s1540_s9 + $0x18] sm:$0xff] }
 0x311   : > { %v1203_v55 = vpop.eup %1202  ;;  %v670_v56 = vmul.f32 1.442695, %v669_v54  ;;  %v971_v54 = vld [vmem:[%s1540_s9 + $0x8] sm:$0xff] }
 0x312   : > { %v603_v57 = vsel %vm596_vm7, %v1203_v55, 0.0 }
 0x313   : > { %1204 = vpow2.f32 %v670_v56  ;;  %604 = vadd.xlane.f32.xlu2 %v603_v57  ;;  %v1025_v56 = vld [vmem:[%s1542_s11 + $0x78] sm:$0xff]  ;;  %v1024_v57 = vld [vmem:[%s1542_s11 + $0x70] sm:$0xff] }
 0x314   : > { %1030 = vmatpush.msrb.mxu3 %v1025_v56 }
 0x316   : > { %v781_v58 = vpop.xlane.xlu0 %780  ;;  %v609_v59 = vpop.permute.xlu2 %608  ;;  %1031 = vmatpush.msrb.mxu3 %v1024_v57 }
 0x317   : > { %v782_v60 = vsub.f32 %v778_v48, %v781_v58  ;;  %1147 = vmatpush.msk.msra.mxu2 %vm614_vm8, %v609_v59  ;;  %v1023_v58 = vld [vmem:[%s1542_s11 + $0x68] sm:$0xff] }
 0x318   : > { %1032 = vmatpush.msrb.mxu3 %v1023_v58 }
 0x319   : > { %v1205_v61 = vpop.eup %1204  ;;  %v783_v62 = vmul.f32 1.442695, %v782_v60 }
 0x31a   : > { %v672_v63 = vsel %vm596_vm7, %v1205_v61, 0.0 }
 0x31b   : > { %1206 = vpow2.f32 %v783_v62  ;;  %673 = vadd.xlane.f32.xlu1 %v672_v63 }
 0x321   : > { %v1207_v1 = vpop.eup %1206 }
 0x322   : > { %v785_v2 = vsel %vm596_vm7, %v1207_v1, 0.0 }
 0x323   : > { %786 = vadd.xlane.f32.xlu1 %v785_v2 }
 0x329   : > { %v791_v15 = vpop.permute.xlu0 %790 }
 0x32b   : > { %843 = vrot.lane.b32.xlu2 %v1372_v35, %s1240_s21 }
 0x333   : > { %841 = vrot.lane.b32.xlu2 %v1372_v35, %s1241_s22 }
 0x33b   : > { %881 = vrot.lane.b32.xlu2 %v1372_v35, %s1242_s23 }
 0x33c   : > { %677 = vrot.lane.b32.xlu1 %v1372_v35, %s1243_s24  ;;  %v566_v35 = vld [vmem:[%s1536_s5 + $0x18] sm:$0xff] }
 0x386   : > { %v605_v3 = vpop.xlane.xlu2 %604 }
 0x387   : > { %1208 = vrcp.f32 %v605_v3 }
 0x38d   : > { %v1209_v4 = vpop.eup %1208 }
 0x38e   : > { %v844_v5 = vpop.permute.xlu2 %843  ;;  %v607_v6 = vmul.f32 %v1209_v4, %v1203_v55  ;;  %v674_v9 = vpop.xlane.xlu1 %673  ;;  %v970_v55 = vld [vmem:[%s1540_s9] sm:$0xff] }
 0x38f   : > { %1210 = vrcp.f32 %v674_v9  ;;  %v1193_v9 = vld [vmem:[%s1539_s8] ss:$0 sm:$0xff] }
 0x390   : > { %1148 = vmatmul.msk.f32.vlgmr.msra.gmra.mxu2 %vm610_vm9, %v607_v6 }
 0x395   : > { %v1211_v12 = vpop.eup %1210 }
 0x396   : > { %v842_v7 = vpop.permute.xlu2 %841  ;;  %v787_v11 = vpop.xlane.xlu1 %786  ;;  %v676_v14 = vmul.f32 %v1211_v12, %v1205_v61  ;;  %v1022_v12 = vld [vmem:[%s1542_s11 + $0x60] sm:$0xff] }
 0x397   : > { %1212 = vrcp.f32 %v787_v11  ;;  %1033 = vmatpush.msrb.mxu3 %v1022_v12 }
 0x39d   : > { %v1213_v16 = vpop.eup %1212 }
 0x39e   : > { %v882_v10 = vpop.permute.xlu2 %881  ;;  %v789_v17 = vmul.f32 %v1213_v16, %v1207_v1  ;;  %v1018_v16 = vld [vmem:[%s1542_s11 + $0x40] sm:$0xff] }
 0x39f   : > { %1162 = vmatpush.msk.msrb.mxu0 %vm614_vm8, %v882_v10 }
 0x3ae   : > { %v678_v13 = vpop.permute.xlu1 %677 }
 0x3af   : > { %1151 = vmatpush.msk.msrb.mxu2 %vm614_vm8, %v678_v13  ;;  %v1021_v13 = vld [vmem:[%s1542_s11 + $0x58] sm:$0xff] }
 0x3b0   : > { %1152 = vmatmul.msk.f32.vlgmr.msrb.gmra.mxu2 %vm610_vm9, %v676_v14  ;;  %1034 = vmatpush.msrb.mxu3 %v1021_v13  ;;  %v1020_v14 = vld [vmem:[%s1542_s11 + $0x50] sm:$0xff] }
 0x3b1   : > { %1157 = vmatpush.msk.msra.mxu2 %vm614_vm8, %v791_v15  ;;  %v1019_v15 = vld [vmem:[%s1542_s11 + $0x48] sm:$0xff] }
 0x3b2   : > { %1035 = vmatpush.msrb.mxu3 %v1020_v14 }
 0x3b3   : > { %1160 = vmatpush.xpose.msk.msrb.mxu2 %vm570_vm6, %v844_v5  ;;  %v1192_v5 = vld [vmem:[%s1538_s7] ss:$0 sm:$0xff] }
 0x3b4   : > { %1036 = vmatpush.msrb.mxu3 %v1019_v15 }
 0x3b6   : > { %1037 = vmatpush.msrb.mxu3 %v1018_v16 }
 0x3b8   : > { %1158 = vmatmul.msk.f32.vlgmr.msra.gmra.mxu2 %vm610_vm9, %v789_v17  ;;  %v1017_v17 = vld [vmem:[%s1542_s11 + $0x38] sm:$0xff] }
 0x3b9   : > { %926 = vmatpush.msra.mxu2 %v566_v35  ;;  %1038 = vmatpush.msrb.mxu3 %v1017_v17 }
 0x3bb   : > { %1039 = vmatpush.msrb.mxu3 %v1016_v18 }
 0x3c0   : > { %1161 = vmatmul.msk.f32.vlgmr.msrb.gmra.mxu2 %vm570_vm6, %v842_v7 }
 0x413   : > { %v634_v19 = vpop.f32.mrf.mxu2 }
 0x414   : > { %1154 = vmatmul.msk.f32.vlgmr.msra.gmra.mxu3 %vm570_vm6, %v634_v19  ;;  %v1015_v19 = vld [vmem:[%s1542_s11 + $0x28] sm:$0xff] }
 0x415   : > { %1040 = vmatpush.msrb.mxu3 %v1015_v19 }
 0x417   : > { %1041 = vmatpush.msrb.mxu3 %v1014_v20 }
 0x419   : > { %1042 = vmatpush.msrb.mxu3 %v1013_v21 }
 0x433   : > { %v701_v22 = vpop.f32.mrf.mxu2 }
 0x434   : > { %1153 = vmatmul.msk.f32.vlgmr.msrb.gmra.mxu1 %vm570_vm6, %v701_v22  ;;  %v1012_v22 = vld [vmem:[%s1542_s11 + $0x10] sm:$0xff] }
 0x435   : > { %993 = vmatpush.msrb.mxu1 %v973_v53  ;;  %1043 = vmatpush.msrb.mxu3 %v1012_v22 }
 0x43b   : > { %v814_v23 = vpop.f32.mrf.mxu2 }
 0x43c   : > { %1159 = vmatmul.msk.f32.vlgmr.msra.gmra.mxu1 %vm570_vm6, %v814_v23  ;;  %v1011_v23 = vld [vmem:[%s1542_s11 + $0x8] sm:$0xff] }
 0x43d   : > { %1044 = vmatpush.msrb.mxu3 %v1011_v23 }
 0x443   : > { %v866_v24 = vpop.f32.mrf.mxu2 }
 0x444   : > { %v869_v25 = vmul.f32 0.35355338, %v866_v24  ;;  %v1010_v24 = vld [vmem:[%s1542_s11] sm:$0xff] }
 0x445   : > { %1045 = vmatpush.msrb.mxu3 %v1010_v24 }
 0x446   : > { %v870_v26 = vsel %vm596_vm7, %v869_v25, -inf }
 0x447   : > { %871 = vmax.xlane.f32.xlu0 %v870_v26 }
 0x497   : > { %v747_v38 = vpop.f32.mrf.mxu3 }
 0x4b1   : > { %v724_v37 = vpop.f32.mrf.mxu1 }
 0x4b2   : > { %v748_v40 = vadd.f32 %v747_v38, %v724_v37  ;;  %v1195_v37 = vld [vmem:[%s1543_s12] ss:$0 sm:$0xff] }
 0x4b9   : > { %v837_v39 = vpop.f32.mrf.mxu1 }
 0x4ba   : > { %v872_v27 = vpop.xlane.xlu0 %871  ;;  %v840_v41 = vadd.f32 %v837_v39, %v748_v40 }
 0x4bb   : > { %v873_v28 = vsub.f32 %v869_v25, %v872_v27  ;;  %v1194_v25 = vld [vmem:[%s1541_s10] ss:$0 sm:$0xff] }
 0x4bd   : > { %v874_v29 = vmul.f32 1.442695, %v873_v28 }
 0x4bf   : > { %1214 = vpow2.f32 %v874_v29 }
 0x4c5   : > { %v1215_v30 = vpop.eup %1214 }
 0x4c6   : > { %v876_v31 = vsel %vm596_vm7, %v1215_v30, 0.0 }
 0x4c7   : > { %877 = vadd.xlane.f32.xlu1 %v876_v31 }
 0x53a   : > { %v878_v32 = vpop.xlane.xlu1 %877 }
 0x53b   : > { %1216 = vrcp.f32 %v878_v32 }
 0x541   : > { %v1217_v33 = vpop.eup %1216 }
 0x542   : > { %v880_v34 = vmul.f32 %v1217_v33, %v1215_v30 }
 0x544   : > { %1163 = vmatmul.msk.f32.vlgmr.msrb.gmra.mxu0 %vm610_vm9, %v880_v34 }
 0x5c1   : > { %v905_v36 = vpop.f32.mrf.mxu0 }
 0x5c2   : > { %1164 = vmatmul.msk.f32.vlgmr.msra.gmra.mxu2 %vm570_vm6, %v905_v36 }
 0x645   : > { %v928_v42 = vpop.f32.mrf.mxu2 }
 0x646   : > { %v931_v43 = vadd.f32 %v928_v42, %v840_v41 }
 0x648   : > { %v932_v45 = vadd.f32 %v931_v43, %v1340_v0  ;;  %v972_v0 = vld [vmem:[%s1540_s9 + $0x10] sm:$0xff] }
 0x649   : > { %994 = vmatpush.msrb.mxu1 %v972_v0 }
 0x64a   : > { %v1430_v46 = vadd.f32 %v1191_v44, %v932_v45 }
 0x64b   : > { %995 = vmatpush.msrb.mxu1 %v971_v54 }
 0x64c   : > { %v938_v47 = vsel %vm491_vm0, %v1430_v46, 0.0 }
 0x64d   : > { %939 = vadd.xlane.f32.xlu2 %v938_v47  ;;  %996 = vmatpush.msrb.mxu1 %v970_v55  ;;  %v1196_v55 = vld [vmem:[%s1544_s13] ss:$0 sm:$0xff] }
 0x6c0   : > { %v940_v48 = vpop.xlane.xlu2 %939 }
 0x6c1   : > { %v941_v49 = vmul.f32 %v940_v48, %v1344_v8 }
 0x6c3   : > { %v942_v50 = vsub.f32 %v1430_v46, %v941_v49 }
 0x6c5   : > { %v943_v51 = vmul.f32 %v942_v50, %v942_v50 }
 0x6c7   : > { %v944_v52 = vsel %vm491_vm0, %v943_v51, 0.0 }
 0x6c8   : > { %945 = vadd.xlane.f32.xlu0 %v944_v52 }
 0x73b   : > { %v946_v59 = vpop.xlane.xlu0 %945 }
 0x73c   : > { %v947_v60 = vmul.f32 %v946_v59, %v1344_v8 }
 0x73e   : > { %v948_v61 = vadd.f32 1e-06, %v947_v60 }
 0x740   : > { %1218 = vrsqrt.f32 %v948_v61  ;;  %vm955_vm11 = vweird.f32 %v948_v61 }
 0x746   : > { %v1219_v62 = vpop.eup %1218 }
 0x747   : > { %v950_v63 = vmul.f32 %v1219_v62, %v948_v61  ;;  %vm956_vm10 = vweird.f32 %v1219_v62 }
 0x748   : > { %vm957_vm12 = vmor %vm955_vm11, %vm956_vm10 }
 0x749   : > { %v951_v1 = vmul.f32 %v1219_v62, %v950_v63 }
 0x74b   : > { %v952_v2 = vmul.f32 0.5, %v951_v1 }
 0x74d   : > { %v953_v3 = vsub.f32 1.5, %v952_v2 }
 0x74f   : > { %v954_v4 = vmul.f32 %v1219_v62, %v953_v3 }
 0x751   : > { %v958_v6 = vsel %vm957_vm12, %v1219_v62, %v954_v4 }
 0x752   : > { %v959_v7 = vmul.f32 %v958_v6, %v942_v50 }
 0x754   : > { %v964_v10 = vmul.f32 %v1192_v5, %v959_v7 }
 0x756   : > { %v969_v11 = vadd.f32 %v1193_v9, %v964_v10 }
 0x758   : > { %1165 = vmatmul.msk.f32.vlgmr.msrb.gmra.mxu1 %vm539_vm5, %v969_v11 }
 0x7d5   : > { %v998_v26 = vpop.f32.mrf.mxu1 }
 0x7d6   : > { %v999_v27 = vadd.f32 %v1194_v25, %v998_v26 }
 0x7d8   : > { %v1001_v28 = vmul.f32 %v999_v27, %v999_v27 }
 0x7da   : > { %v1002_v29 = vmul.f32 %v1001_v28, %v999_v27 }
 0x7dc   : > { %v1003_v30 = vmul.f32 0.044715, %v1002_v29 }
 0x7de   : > { %v1004_v31 = vadd.f32 %v1003_v30, %v999_v27 }
 0x7e0   : > { %v1005_v32 = vmul.f32 0.7978846, %v1004_v31 }
 0x7e2   : > { %1220 = vtanh.f32 %v1005_v32 }
 0x7e8   : > { %v1221_v33 = vpop.eup %1220 }
 0x7e9   : > { %v1007_v34 = vadd.f32 1.0, %v1221_v33 }
 0x7eb   : > { %v1008_v35 = vmul.f32 0.5, %v1007_v34 }
 0x7ed   : > { %v1009_v36 = vmul.f32 %v1008_v35, %v999_v27 }
 0x7ef   : > { %1046 = vmatmul.f32.vlgmr.msrb.gmra.mxu3 %v1009_v36 }
 0x872   : > { %v1047_v38 = vpop.f32.mrf.mxu3 }
 0x873   : > { %v1048_v39 = vadd.f32 %v1195_v37, %v1047_v38 }
 0x875   : > { %v1050_v40 = vadd.f32 %v1048_v39, %v1430_v46 }
 0x877   : > { %v1051_v41 = vsel %vm491_vm0, %v1050_v40, 0.0 }
 0x878   : > { %1052 = vadd.xlane.f32.xlu1 %v1051_v41 }
 0x8eb   : > { %v1053_v42 = vpop.xlane.xlu1 %1052 }
 0x8ec   : > { %v1054_v43 = vmul.f32 %v1053_v42, %v1344_v8 }
 0x8ee   : > { %v1055_v44 = vsub.f32 %v1050_v40, %v1054_v43 }
 0x8f0   : > { %v1056_v45 = vmul.f32 %v1055_v44, %v1055_v44 }
 0x8f2   : > { %v1057_v47 = vsel %vm491_vm0, %v1056_v45, 0.0 }
 0x8f3   : > { %1058 = vadd.xlane.f32.xlu0 %v1057_v47 }
 0x966   : > { %v1059_v48 = vpop.xlane.xlu0 %1058 }
 0x967   : > { %v1060_v49 = vmul.f32 %v1059_v48, %v1344_v8  ;;  %v1197_v8 = vld [vmem:[%s1545_s14] ss:$0 sm:$0xff] }
 0x969   : > { %v1061_v50 = vadd.f32 1e-06, %v1060_v49 }
 0x96b   : > { %1222 = vrsqrt.f32 %v1061_v50  ;;  %vm1068_vm14 = vweird.f32 %v1061_v50 }
 0x971   : > { %v1223_v51 = vpop.eup %1222 }
 0x972   : > { %v1063_v52 = vmul.f32 %v1223_v51, %v1061_v50  ;;  %vm1069_vm13 = vweird.f32 %v1223_v51 }
 0x973   : > { %vm1070_vm15 = vmor %vm1068_vm14, %vm1069_vm13 }
 0x974   : > { %v1064_v46 = vmul.f32 %v1223_v51, %v1063_v52 }
 0x976   : > { %v1065_v53 = vmul.f32 0.5, %v1064_v46 }
 0x978   : > { %v1066_v0 = vsub.f32 1.5, %v1065_v53 }
 0x97a   : > { %v1067_v54 = vmul.f32 %v1223_v51, %v1066_v0 }
 0x97c   : > { %v1071_v56 = vsel %vm1070_vm15, %v1223_v51, %v1067_v54 }
 0x97d   : > { %v1072_v57 = vmul.f32 %v1071_v56, %v1055_v44 }
 0x97f   : > { %v1077_v58 = vmul.f32 %v1196_v55, %v1072_v57 }
 0x981   : > { %v1082_v59 = vadd.f32 %v1197_v8, %v1077_v58 }
 0x983   : > { %1083 = vst.msk [vmem:[%s489_s29] sm:$0x1f] %vm491_vm0, %v1082_v59 }
 0x984 PF: > { %s25_s18 = sadd.s32 1, %s1230_s18  }
 0x985   : > { %p22_p4 = scmp.ge.s32.totalorder %s25_s18, 4  }
 0x987   :  { %24 = sbr.rel (!%p22_p4) target bundleno = 1 (0x1), region = 110 }

// kernel: ema_mae_forward.12
= control target key start
LH: loop header
LB: loop body
LE: loop exit
PB: predicated region body
PF: predicated region fallthrough
CT: control target
= control target key end

     0   :  { %14 = vsyncpa [#allocation3], 0  ;;  %vm37_vm0 = vcmask 130048   ;;  %s623_s0 = inlined_call_operand.vmem [shape: f32[2,16,16], index: 0, kind: input, shape index: {}]   ;;  %s624_s1 = inlined_call_operand.vmem [shape: f32[1,16], index: 1, kind: input, shape index: {}]   ;;  %s625_s2 = inlined_call_operand.vmem [shape: f32[1,16], index: 2, kind: input, shape index: {}]   ;;  %s626_s3 = inlined_call_operand.vmem [shape: f32[16,48], index: 3, kind: input, shape index: {}]   ;;  %s627_s4 = inlined_call_operand.vmem [shape: f32[1,48], index: 4, kind: input, shape index: {}]   ;;  %s628_s5 = inlined_call_operand.vmem [shape: f32[2,16,48], index: 5, kind: input, shape index: {}]   ;;  %s629_s6 = inlined_call_operand.vmem [shape: f32[2,16,1], index: 6, kind: input, shape index: {}]   ;;  %s630_s7 = inlined_call_operand.hbm [shape: f32[2,16,48], index: 7, kind: output, shape index: {0}]   ;;  %s631_s8 = inlined_call_operand.hbm [shape: f32[1,1], index: 8, kind: output, shape index: {1}]  }
   0x1   :  { %v36_v0 = vld [vmem:[%s623_s0 + $0x8] sm:$0xff]  ;;  %v35_v1 = vld [vmem:[%s623_s0] sm:$0xff] }
   0x2   :  { %v41_v2 = vsel %vm37_vm0, %v36_v0, 0.0  ;;  %v38_v3 = vsel %vm37_vm0, %v35_v1, 0.0 }
   0x3   :  { %42 = vadd.xlane.f32.xlu0 %v41_v2  ;;  %39 = vadd.xlane.f32.xlu1 %v38_v3 }
   0x4   :  { %15 = vsyncpa [#allocation5], 0  ;;  %v373_v4 = vld [vmem:[%s623_s0 + $0x18] sm:$0xff]  ;;  %v372_v5 = vld [vmem:[%s623_s0 + $0x10] sm:$0xff]  ;;  %v467_v8 = vmov 16.0   ;;  %vm131_vm14 = vcmask 392192  }
   0x5   :  { %v194_v6 = vsel %vm37_vm0, %v373_v4, 0.0  ;;  %v191_v7 = vsel %vm37_vm0, %v372_v5, 0.0  ;;  %401 = vrcp.f32 %v467_v8  ;;  %v31_v35 = vld [vmem:[%s626_s3 + $0x8] sm:$0xff]  ;;  %v30_v36 = vld [vmem:[%s626_s3] sm:$0xff]  ;;  %vm159_vm15 = vcmask 7168   ;;  %s469_s0 = smov [#allocation2]  }
   0x6   :  { %122 = vmatpush.msra.mxu0 %v31_v35  ;;  %380 = vmatpush.msra.mxu2 %v31_v35  ;;  %s340_s13 = sshll.u32 %s469_s0, 4  ;;  %s470_s14 = smov 128   ;;  %s341_s13 = int_to_ptr.vmem [resolvable:$true] %s340_s13 }
   0x7   :  { %259 = vmatpush.msra.mxu1 %v31_v35  ;;  %382 = vmatpush.msra.mxu3 %v31_v35  ;;  %s471_s15 = smov 8   ;;  %s472_s18 = smov [#allocation4]  }
   0x8   :  { %123 = vmatpush.msra.mxu0 %v30_v36  ;;  %381 = vmatpush.msra.mxu2 %v30_v36  ;;  %s356_s20 = sshll.u32 %s631_s8, 4  ;;  %s357_s20 = int_to_ptr.hbm [resolvable:$true] %s356_s20 }
   0x9   :  { %260 = vmatpush.msra.mxu1 %v30_v36  ;;  %383 = vmatpush.msra.mxu3 %v30_v36 }
   0xb   :  { %195 = vadd.xlane.f32.xlu0 %v194_v6  ;;  %192 = vadd.xlane.f32.xlu1 %v191_v7  ;;  %v402_v9 = vpop.eup %401  ;;  %v399_v6 = vld [vmem:[%s625_s2] ss:$0 sm:$0xff] }
   0xc   :  { %v45_v10 = vmul.f32 16.0, %v402_v9  ;;  %vm49_vm1 = vweird.f32 %v402_v9 }
   0xe   :  { %v46_v11 = vsub.f32 1.0, %v45_v10 }
  0x10   :  { %v47_v12 = vmul.f32 %v402_v9, %v46_v11 }
  0x12   :  { %v48_v13 = vadd.f32 %v402_v9, %v47_v12 }
  0x14   :  { %v50_v14 = vsel %vm49_vm1, %v402_v9, %v48_v13 }
  0x76   :  { %v43_v15 = vpop.xlane.xlu0 %42  ;;  %v40_v16 = vpop.xlane.xlu1 %39 }
  0x77   :  { %v52_v17 = vmul.f32 %v50_v14, %v43_v15  ;;  %v51_v18 = vmul.f32 %v50_v14, %v40_v16 }
  0x79   :  { %v534_v19 = vsub.f32 %v36_v0, %v52_v17  ;;  %v536_v20 = vsub.f32 %v35_v1, %v51_v18  ;;  %v398_v1 = vld [vmem:[%s624_s1] ss:$0 sm:$0xff]  ;;  %s354_s1 = sshll.u32 %s472_s18, 4  ;;  %s355_s1 = int_to_ptr.vmem [resolvable:$true] %s354_s1 }
  0x7b   :  { %v56_v21 = vmul.f32 %v534_v19, %v534_v19  ;;  %v55_v22 = vmul.f32 %v536_v20, %v536_v20 }
  0x7d   :  { %v60_v23 = vsel %vm37_vm0, %v56_v21, 0.0  ;;  %v57_v24 = vsel %vm37_vm0, %v55_v22, 0.0 }
  0x7e   :  { %61 = vadd.xlane.f32.xlu2 %v60_v23  ;;  %v196_v25 = vpop.xlane.xlu0 %195  ;;  %58 = vadd.xlane.f32.xlu0 %v57_v24  ;;  %v193_v26 = vpop.xlane.xlu1 %192 }
  0x7f   :  { %v198_v27 = vmul.f32 %v196_v25, %v50_v14  ;;  %v197_v28 = vmul.f32 %v193_v26, %v50_v14 }
  0x81   :  { %v544_v29 = vsub.f32 %v373_v4, %v198_v27  ;;  %v546_v30 = vsub.f32 %v372_v5, %v197_v28  ;;  %v400_v27 = vld [vmem:[%s627_s4] ss:$0 sm:$0xff] }
  0x83   :  { %v202_v31 = vmul.f32 %v544_v29, %v544_v29  ;;  %v201_v32 = vmul.f32 %v546_v30, %v546_v30 }
  0x85   :  { %v206_v33 = vsel %vm37_vm0, %v202_v31, 0.0  ;;  %v203_v34 = vsel %vm37_vm0, %v201_v32, 0.0 }
  0x86   :  { %207 = vadd.xlane.f32.xlu2 %v206_v33  ;;  %204 = vadd.xlane.f32.xlu1 %v203_v34  ;;  %v135_v33 = vld [vmem:[%s628_s5 + $0x8] sm:$0xff] }
  0xf1   :  { %v62_v37 = vpop.xlane.xlu2 %61  ;;  %v59_v38 = vpop.xlane.xlu0 %58 }
  0xf2   :  { %v64_v39 = vmul.f32 %v62_v37, %v50_v14  ;;  %v63_v40 = vmul.f32 %v59_v38, %v50_v14 }
  0xf4   :  { %v66_v41 = vadd.f32 1e-06, %v64_v39  ;;  %v65_v42 = vadd.f32 1e-06, %v63_v40  ;;  %v376_v39 = vld [vmem:[%s628_s5 + $0x10] sm:$0xff] }
  0xf6   :  { %403 = vrsqrt.f32 %v66_v41  ;;  %vm73_vm3 = vweird.f32 %v65_v42  ;;  %vm83_vm5 = vweird.f32 %v66_v41 }
  0xf7   :  { %405 = vrsqrt.f32 %v65_v42 }
  0xf9   :  { %v208_v43 = vpop.xlane.xlu2 %207  ;;  %v205_v44 = vpop.xlane.xlu1 %204 }
  0xfa   :  { %v210_v45 = vmul.f32 %v208_v43, %v50_v14  ;;  %v209_v46 = vmul.f32 %v205_v44, %v50_v14 }
  0xfc   :  { %v404_v47 = vpop.eup %403  ;;  %v212_v48 = vadd.f32 1e-06, %v210_v45  ;;  %v211_v49 = vadd.f32 1e-06, %v209_v46  ;;  %v377_v45 = vld [vmem:[%s628_s5 + $0x18] sm:$0xff] }
  0xfd   :  { %v406_v50 = vpop.eup %405  ;;  %v78_v51 = vmul.f32 %v404_v47, %v66_v41  ;;  %vm84_vm2 = vweird.f32 %v404_v47 }
  0xfe   :  { %v68_v52 = vmul.f32 %v406_v50, %v65_v42  ;;  %407 = vrsqrt.f32 %v212_v48  ;;  %vm74_vm4 = vweird.f32 %v406_v50  ;;  %vm85_vm6 = vmor %vm83_vm5, %vm84_vm2  ;;  %vm219_vm9 = vweird.f32 %v211_v49 }
  0xff   :  { %v79_v53 = vmul.f32 %v404_v47, %v78_v51  ;;  %409 = vrsqrt.f32 %v211_v49  ;;  %vm75_vm7 = vmor %vm73_vm3, %vm74_vm4  ;;  %vm229_vm11 = vweird.f32 %v212_v48  ;;  %vm334_vm5 = vcmask 0  }
 0x100   :  { %v69_v54 = vmul.f32 %v406_v50, %v68_v52  ;;  %v468_v52 = vmov 48.0  }
 0x101   :  { %v80_v55 = vmul.f32 0.5, %v79_v53  ;;  %411 = vrcp.f32 %v468_v52 }
 0x102   :  { %v70_v56 = vmul.f32 0.5, %v69_v54  ;;  %v155_v54 = vld [vmem:[%s629_s6] sm:$0xff] }
 0x103   :  { %v81_v57 = vsub.f32 1.5, %v80_v55  ;;  %v156_v55 = vld [vmem:[%s629_s6 + $0x8] sm:$0xff] }
 0x104   :  { %v408_v58 = vpop.eup %407  ;;  %v71_v59 = vsub.f32 1.5, %v70_v56  ;;  %v174_v56 = vsel %vm159_vm15, %v155_v54, 0.0 }
 0x105   :  { %v410_v60 = vpop.eup %409  ;;  %v82_v61 = vmul.f32 %v404_v47, %v81_v57  ;;  %v224_v62 = vmul.f32 %v408_v58, %v212_v48  ;;  %vm230_vm8 = vweird.f32 %v408_v58  ;;  %v175_v57 = vsel %vm159_vm15, %v156_v55, 0.0 }
 0x106   :  { %v72_v63 = vmul.f32 %v406_v50, %v71_v59  ;;  %v214_v0 = vmul.f32 %v410_v60, %v211_v49  ;;  %vm220_vm10 = vweird.f32 %v410_v60  ;;  %vm231_vm12 = vmor %vm229_vm11, %vm230_vm8 }
 0x107   :  { %v86_v2 = vsel %vm85_vm6, %v404_v47, %v82_v61  ;;  %v225_v3 = vmul.f32 %v408_v58, %v224_v62  ;;  %vm221_vm13 = vmor %vm219_vm9, %vm220_vm10  ;;  %v412_v53 = vpop.eup %411 }
 0x108   :  { %v76_v4 = vsel %vm75_vm7, %v406_v50, %v72_v63  ;;  %v215_v5 = vmul.f32 %v410_v60, %v214_v0  ;;  %v88_v7 = vmul.f32 %v86_v2, %v534_v19  ;;  %v147_v59 = vmul.f32 48.0, %v412_v53 }
 0x109   :  { %v226_v8 = vmul.f32 0.5, %v225_v3  ;;  %v87_v9 = vmul.f32 %v76_v4, %v536_v20 }
 0x10a   :  { %v216_v10 = vmul.f32 0.5, %v215_v5  ;;  %v93_v11 = vmul.f32 %v398_v1, %v88_v7 }
 0x10b   :  { %v227_v12 = vsub.f32 1.5, %v226_v8  ;;  %v92_v13 = vmul.f32 %v398_v1, %v87_v9 }
 0x10c   :  { %v217_v14 = vsub.f32 1.5, %v216_v10  ;;  %v98_v15 = vadd.f32 %v399_v6, %v93_v11  ;;  %v378_v10 = vld [vmem:[%s629_s6 + $0x10] sm:$0xff] }
 0x10d   :  { %v228_v16 = vmul.f32 %v408_v58, %v227_v12  ;;  %v97_v17 = vadd.f32 %v399_v6, %v92_v13  ;;  %v379_v12 = vld [vmem:[%s629_s6 + $0x18] sm:$0xff]  ;;  %s342_s6 = sshll.u32 %s630_s7, 4  ;;  %s343_s6 = int_to_ptr.hbm [resolvable:$true] %s342_s6 }
 0x10e   :  { %v218_v18 = vmul.f32 %v410_v60, %v217_v14  ;;  %371 = vmatmul.msk.f32.vlgmr.msra.gmra.mxu2 %vm37_vm0, %v98_v15 }
 0x10f   :  { %v232_v19 = vsel %vm231_vm12, %v408_v58, %v228_v16  ;;  %370 = vmatmul.msk.f32.vlgmr.msra.gmra.mxu0 %vm37_vm0, %v97_v17  ;;  %v176_v58 = vadd.f32 %v175_v57, %v174_v56  ;;  %v305_v16 = vsel %vm159_vm15, %v378_v10, 0.0  ;;  %v306_v17 = vsel %vm159_vm15, %v379_v12, 0.0 }
 0x110   :  { %v222_v20 = vsel %vm221_vm13, %v410_v60, %v218_v18  ;;  %v234_v21 = vmul.f32 %v232_v19, %v544_v29  ;;  %v134_v29 = vld [vmem:[%s628_s5] sm:$0xff]  ;;  %v148_v60 = vsub.f32 1.0, %v147_v59  ;;  %v307_v19 = vadd.f32 %v306_v17, %v305_v16 }
 0x111   :  { %v233_v22 = vmul.f32 %v222_v20, %v546_v30 }
 0x112   :  { %v236_v23 = vmul.f32 %v398_v1, %v234_v21  ;;  %v149_v61 = vmul.f32 %v412_v53, %v148_v60 }
 0x113   :  { %v235_v24 = vmul.f32 %v398_v1, %v233_v22 }
 0x114   :  { %v238_v25 = vadd.f32 %v399_v6, %v236_v23  ;;  %v150_v62 = vadd.f32 %v412_v53, %v149_v61 }
 0x115   :  { %v237_v26 = vadd.f32 %v399_v6, %v235_v24 }
 0x116   :  { %375 = vmatmul.msk.f32.vlgmr.msra.gmra.mxu3 %vm37_vm0, %v238_v25 }
 0x117   :  { %374 = vmatmul.msk.f32.vlgmr.msra.gmra.mxu1 %vm37_vm0, %v237_v26  ;;  %vm151_vm0 = vweird.f32 %v412_v53 }
 0x118   :  { %v152_v63 = vsel %vm151_vm0, %v412_v53, %v150_v62 }
 0x18c   :  { %v125_v28 = vpop.f32.mrf.mxu0 }
 0x18d   :  { %v126_v31 = vadd.f32 %v400_v27, %v125_v28 }
 0x18f   :  { %132 = vst.msk [vmem:[#allocation2] sm:$0xff] %vm131_vm14, %v126_v31  ;;  %v136_v30 = vsub.f32 %v126_v31, %v134_v29 }
 0x191   :  { %v128_v32 = vpop.f32.mrf.mxu2  ;;  %v138_v34 = vmul.f32 %v136_v30, %v136_v30 }
 0x192   :  { %v129_v35 = vadd.f32 %v400_v27, %v128_v32 }
 0x193   :  { %v140_v36 = vsel %vm131_vm14, %v138_v34, 0.0 }
 0x194   :  { %133 = vst.msk [vmem:[#allocation2 + $0x8] sm:$0xff] %vm131_vm14, %v129_v35  ;;  %v137_v37 = vsub.f32 %v129_v35, %v135_v33  ;;  %v262_v38 = vpop.f32.mrf.mxu1  ;;  %141 = vadd.xlane.f32.xlu2 %v140_v36 }
 0x195   :  { %v263_v40 = vadd.f32 %v400_v27, %v262_v38 }
 0x196   :  { %v139_v41 = vmul.f32 %v137_v37, %v137_v37 }
 0x197   :  { %269 = vst.msk [vmem:[#allocation2 + $0x10] sm:$0xff] %vm131_vm14, %v263_v40  ;;  %v274_v42 = vsub.f32 %v263_v40, %v376_v39 }
 0x198   :  { %v143_v43 = vsel %vm131_vm14, %v139_v41, 0.0 }
 0x199   :  { %v265_v44 = vpop.f32.mrf.mxu3  ;;  %144 = vadd.xlane.f32.xlu0 %v143_v43  ;;  %v276_v46 = vmul.f32 %v274_v42, %v274_v42 }
 0x19a   :  { %v266_v47 = vadd.f32 %v400_v27, %v265_v44 }
 0x19b   :  { %v278_v48 = vsel %vm131_vm14, %v276_v46, 0.0 }
 0x19c   :  { %270 = vst.msk [vmem:[#allocation2 + $0x18] sm:$0xff] %vm131_vm14, %v266_v47  ;;  %v275_v49 = vsub.f32 %v266_v47, %v377_v45  ;;  %279 = vadd.xlane.f32.xlu1 %v278_v48 }
 0x19d   :  { %348 = dma.vmem_to_hbm [thread:$0]  %s341_s13, 512, %s343_s6, [#allocation3], %s470_s14, %s470_s14, %s471_s15  }
 0x19e   :  { %v277_v50 = vmul.f32 %v275_v49, %v275_v49 }
 0x1a0   :  { %v281_v51 = vsel %vm131_vm14, %v277_v50, 0.0 }
 0x1a1   :  { %282 = vadd.xlane.f32.xlu2 %v281_v51 }
 0x1a4   :  { %177 = vadd.xlane.f32.xlu1 %v176_v58 }
 0x207   :  { %v142_v0 = vpop.xlane.xlu2 %141 }
 0x208   :  { %v153_v1 = vmul.f32 %v152_v63, %v142_v0 }
 0x20a   :  { %v157_v3 = vmul.f32 %v155_v54, %v153_v1 }
 0x20c   :  { %v145_v2 = vpop.xlane.xlu0 %144  ;;  %v160_v8 = vsel %vm159_vm15, %v157_v3, 0.0 }
 0x20d   :  { %v154_v4 = vmul.f32 %v152_v63, %v145_v2 }
 0x20f   :  { %v158_v5 = vmul.f32 %v156_v55, %v154_v4  ;;  %v280_v6 = vpop.xlane.xlu1 %279 }
 0x210   :  { %v284_v7 = vmul.f32 %v280_v6, %v152_v63 }
 0x211   :  { %v161_v9 = vsel %vm159_vm15, %v158_v5, 0.0 }
 0x212   :  { %v162_v11 = vadd.f32 %v161_v9, %v160_v8  ;;  %v289_v14 = vmul.f32 %v378_v10, %v284_v7 }
 0x214   :  { %163 = vadd.xlane.f32.xlu0 %v162_v11  ;;  %v283_v13 = vpop.xlane.xlu2 %282  ;;  %v291_v20 = vsel %vm159_vm15, %v289_v14, 0.0 }
 0x215   :  { %v285_v15 = vmul.f32 %v283_v13, %v152_v63 }
 0x217   :  { %v290_v18 = vmul.f32 %v379_v12, %v285_v15  ;;  %v178_v23 = vpop.xlane.xlu1 %177 }
 0x218   :  { %v179_v24 = vrot.slane %v178_v23, 4 }
 0x219   :  { %v292_v21 = vsel %vm159_vm15, %v290_v18, 0.0 }
 0x21a   :  { %v293_v22 = vadd.f32 %v292_v21, %v291_v20  ;;  %v180_v25 = vadd.f32 %v179_v24, %v178_v23 }
 0x21c   :  { %308 = vadd.xlane.f32.xlu0 %v307_v19  ;;  %294 = vadd.xlane.f32.xlu2 %v293_v22  ;;  %v181_v26 = vrot.slane %v180_v25, 2 }
 0x21e   :  { %v182_v29 = vadd.f32 %v181_v26, %v180_v25 }
 0x220   :  { %v183_v32 = vrot.slane %v182_v29, 1 }
 0x222   :  { %v184_v39 = vadd.f32 %v183_v32, %v182_v29 }
 0x287   :  { %v164_v27 = vpop.xlane.xlu0 %163 }
 0x288   :  { %v165_v28 = vrot.slane %v164_v27, 4 }
 0x28a   :  { %v166_v31 = vadd.f32 %v165_v28, %v164_v27 }
 0x28c   :  { %v167_v30 = vrot.slane %v166_v31, 2 }
 0x28e   :  { %v168_v33 = vadd.f32 %v167_v30, %v166_v31 }
 0x28f   :  { %v309_v34 = vpop.xlane.xlu0 %308  ;;  %v295_v35 = vpop.xlane.xlu2 %294 }
 0x290   :  { %v310_v36 = vrot.slane %v309_v34, 4  ;;  %v296_v37 = vrot.slane %v295_v35, 4  ;;  %v169_v38 = vrot.slane %v168_v33, 1 }
 0x292   :  { %v311_v40 = vadd.f32 %v310_v36, %v309_v34  ;;  %v297_v41 = vadd.f32 %v296_v37, %v295_v35  ;;  %v170_v42 = vadd.f32 %v169_v38, %v168_v33 }
 0x294   :  { %v312_v43 = vrot.slane %v311_v40, 2  ;;  %v298_v44 = vrot.slane %v297_v41, 2  ;;  %384 = vpush %v170_v42 }
 0x295   :  { %386 = vpush %v184_v39 }
 0x296   :  { %v313_v45 = vadd.f32 %v312_v43, %v311_v40  ;;  %v299_v46 = vadd.f32 %v298_v44, %v297_v41 }
 0x298   :  { %v300_v47 = vrot.slane %v299_v46, 1  ;;  %v314_v48 = vrot.slane %v313_v45, 1 }
 0x29a   :  { %v301_v49 = vadd.f32 %v300_v47, %v299_v46  ;;  %v315_v50 = vadd.f32 %v314_v48, %v313_v45 }
 0x29c   :  { %388 = vpush %v301_v49 }
 0x29d   :  { %390 = vpush %v315_v50 }
 0x2c5   :  { %s385_s7 = spop %384 }
 0x2c6   :  { %s387_s3 = spop %386  ;;  %v172_v62 = vstv %s385_s7 }
 0x2c7   :  { %v186_v51 = vstv %s387_s3 }
 0x2cd   :  { %s389_s16 = spop %388 }
 0x2ce   :  { %s391_s17 = spop %390  ;;  %v303_v60 = vstv %s389_s16 }
 0x2cf   :  { %v317_v52 = vstv %s391_s17  ;;  %v304_v0 = vadd.f32 %v303_v60, %v172_v62 }
 0x2d0   :  { %v318_v53 = vadd.f32 %v317_v52, %v186_v51 }
 0x2d2   :  { %413 = vrcp.f32 %v318_v53  ;;  %v330_v57 = vand.u32 2147483648, %v318_v53  ;;  %v328_v59 = vand.u32 2147483647, %v318_v53  ;;  %vm324_vm2 = vweird.f32 %v318_v53 }
 0x2d4   :  { %v331_v63 = vor.u32 1.1754944e-38, %v330_v57  ;;  %vm329_vm4 = vcmp.eq.f32.partialorder %v328_v59, 8.507059e+37 }
 0x2d8   :  { %v414_v54 = vpop.eup %413 }
 0x2d9   :  { %v320_v55 = vmul.f32 %v414_v54, %v318_v53  ;;  %vm325_vm1 = vweird.f32 %v414_v54 }
 0x2da   :  { %vm326_vm3 = vmor %vm324_vm2, %vm325_vm1 }
 0x2db   :  { %v321_v56 = vsub.f32 1.0, %v320_v55 }
 0x2dd   :  { %v322_v58 = vmul.f32 %v414_v54, %v321_v56 }
 0x2df   :  { %v323_v61 = vadd.f32 %v414_v54, %v322_v58 }
 0x2e1   :  { %v327_v1 = vsel %vm326_vm3, %v414_v54, %v323_v61 }
 0x2e2   :  { %v332_v2 = vsel %vm329_vm4, %v331_v63, %v327_v1 }
 0x2e3   :  { %v333_v3 = vmul.f32 %v332_v2, %v304_v0 }
 0x2e5   :  { %335 = vst.msk [vmem:[#allocation4] sm:$0x1] %vm334_vm5, %v333_v3 }
 0x2e6   :  { %359 = dma.vmem_to_hbm [thread:$0]  %s355_s1, 16, %s357_s20, [#allocation5]  }
 0x2e7   :  { %463 = dma.done.wait [#allocation3], 512  }
 0x2e8   :  { %464 = vsyncadd [#allocation3], 4294966784 }
 0x2e9   :  { %465 = dma.done.wait [#allocation5], 16  }
 0x2ea   :  { %466 = vsyncadd [#allocation5], 4294967280 }
 0x2eb   :  { %368 = vsyncpa [#allocation3], 1 }
 0x2ec   :  { %369 = vsyncpa [#allocation5], 1 }

// kernel: ema_mae_forward.11
= control target key start
LH: loop header
LB: loop body
LE: loop exit
PB: predicated region body
PF: predicated region fallthrough
CT: control target
= control target key end

     0   :  { %s1811_s25 = smov 0   ;;  %s2153_s0 = inlined_call_operand.vmem [shape: f32[2,17,16], index: 0, kind: input, shape index: {}]   ;;  %s2154_s1 = inlined_call_operand.vmem [shape: f32[1,16], index: 1, kind: input, shape index: {}]   ;;  %s2155_s2 = inlined_call_operand.vmem [shape: f32[1,16], index: 2, kind: input, shape index: {}]   ;;  %s2156_s3 = inlined_call_operand.vmem [shape: f32[16,48], index: 3, kind: input, shape index: {}]   ;;  %s2157_s4 = inlined_call_operand.vmem [shape: f32[1,48], index: 4, kind: input, shape index: {}]   ;;  %s2158_s5 = inlined_call_operand.vmem [shape: f32[16,16], index: 5, kind: input, shape index: {}]   ;;  %s2159_s6 = inlined_call_operand.vmem [shape: f32[1,16], index: 6, kind: input, shape index: {}]   ;;  %s2160_s7 = inlined_call_operand.vmem [shape: f32[1,16], index: 7, kind: input, shape index: {}]   ;;  %s2161_s8 = inlined_call_operand.vmem [shape: f32[1,16], index: 8, kind: input, shape index: {}]   ;;  %s2162_s9 = inlined_call_operand.vmem [shape: f32[16,64], index: 9, kind: input, shape index: {}]   ;;  %s2163_s10 = inlined_call_operand.vmem [shape: f32[1,64], index: 10, kind: input, shape index: {}]   ;;  %s2164_s11 = inlined_call_operand.vmem [shape: f32[64,16], index: 11, kind: input, shape index: {}]   ;;  %s2165_s12 = inlined_call_operand.vmem [shape: f32[1,16], index: 12, kind: input, shape index: {}]   ;;  %s2166_s13 = inlined_call_operand.vmem [shape: f32[2,17,16], index: 13, kind: output, shape index: {}]  }
   0x1 LB: > { %s1527_s26 = sadd.s32 4294967295, %s1727_s25   ;;  %p1531_p0 = scmp.ge.s32.totalorder %s1727_s25, 1  ;;  %s1727_s25 = sphi %s1811_s25, %s23_s25  }
   0x2   : > { %p387_p1 = scmp.lt.s32.totalorder %s1727_s25, 3 }
   0x4   : > { %p388_p2 = pnand %p1531_p0, %p387_p1 }
   0x5   : > { %p431_p3 = scmp.lt.s32.totalorder (!%p388_p2), %s1527_s26, 1  ;;  %s1730_s24 = smov (!%p388_p2), 112  }
   0x6   : > { %391 = sbr.rel (%p388_p2) target bundleno = 2403 (0x963), region = 72  ;;  %s1731_s28 = smov (!%p388_p2), 96  }
   0x7   : > { %s1732_s29 = smov (!%p388_p2), 108   ;;  %s1734_s14 = smov (!%p388_p2), 104  }
   0x8   : > { %s1735_s15 = smov (!%p388_p2), 100   ;;  %s1736_s16 = smov (!%p388_p2), 120  }
   0x9   : > { %s1737_s17 = smov (!%p388_p2), 116   ;;  %s1738_s20 = smov (!%p388_p2), 92  }
   0xa   : > { %s1739_s21 = smov (!%p388_p2), 88   ;;  %s1740_s22 = smov (!%p388_p2), 84  }
   0xb   : > { %s2168_s26 = smov (!%p431_p3, %s1527_s26), 1  ;;  %vm444_vm0 = vcmask 130048   ;;  %vm451_vm1 = vcmask 122880   ;;  %v1729_v6 = vmov 16.0   ;;  %v534_v28 = vld [vmem:[%s2156_s3 + $0x8] sm:$0xff]  ;;  %v533_v29 = vld [vmem:[%s2156_s3] sm:$0xff] }
   0xc   : > { %s1604_s27 = smul.u32 24, %s2168_s26  ;;  %1653 = vrcp.f32 %v1729_v6  ;;  %562 = vmatpush.msra.mxu0 %v534_v28  ;;  %v1645_v47 = vld [vmem:[%s2154_s1] ss:$0 sm:$0xff]  ;;  %vm585_vm12 = vcmask 31744   ;;  %vm627_vm13 = vcmask 138240   ;;  %vm634_vm14 = vcmask 131072  }
   0xd   : > { %v1646_v51 = vld [vmem:[%s2155_s2] ss:$0 sm:$0xff]  ;;  %vm679_vm15 = vcmask 1040384  }
   0xe   : > { %s435_s30 = scalar_lea.vmem %s2153_s0, %s1604_s27  ;;  %563 = vmatpush.msra.mxu0 %v533_v29 }
   0xf   : > { %v1827_v0 = vld [vmem:[%s435_s30] sm:$0xff]  ;;  %v1829_v1 = vld [vmem:[%s435_s30 + $0x10] sm:$0x1]  ;;  %v1835_v4 = vld [vmem:[%s435_s30 + $0x8] sm:$0xff]  ;;  %s1733_s30 = smov 124  }
  0x10   : > { %v445_v2 = vsel %vm444_vm0, %v1827_v0, 0.0  ;;  %v452_v3 = vsel %vm451_vm1, %v1829_v1, 0.0  ;;  %v448_v5 = vsel %vm444_vm0, %v1835_v4, 0.0 }
  0x11   : > { %446 = vadd.xlane.f32.xlu0 %v445_v2  ;;  %453 = vadd.xlane.f32.xlu1 %v452_v3 }
  0x12   : > { %v1654_v7 = vpop.eup %1653 }
  0x13   : > { %v456_v8 = vmul.f32 16.0, %v1654_v7  ;;  %vm460_vm2 = vweird.f32 %v1654_v7 }
  0x15   : > { %v457_v9 = vsub.f32 1.0, %v456_v8 }
  0x17   : > { %v458_v10 = vmul.f32 %v1654_v7, %v457_v9 }
  0x19   : > { %449 = vadd.xlane.f32.xlu0 %v448_v5  ;;  %v459_v11 = vadd.f32 %v1654_v7, %v458_v10  ;;  %v1647_v10 = vld [vmem:[%s2157_s4] ss:$0 sm:$0xff] }
  0x1b   : > { %v1839_v12 = vsel %vm460_vm2, %v1654_v7, %v459_v11  ;;  %vm850_vm2 = vcmask 1043456  }
  0x84   : > { %v447_v13 = vpop.xlane.xlu0 %446  ;;  %v454_v17 = vpop.xlane.xlu1 %453 }
  0x85   : > { %v462_v14 = vmul.f32 %v1839_v12, %v447_v13  ;;  %v464_v21 = vmul.f32 %v1839_v12, %v454_v17 }
  0x87   : > { %v465_v15 = vsub.f32 %v1827_v0, %v462_v14  ;;  %v1848_v23 = vsub.f32 %v1829_v1, %v464_v21 }
  0x89   : > { %v468_v16 = vmul.f32 %v465_v15, %v465_v15  ;;  %v470_v26 = vmul.f32 %v1848_v23, %v1848_v23 }
  0x8b   : > { %v471_v18 = vsel %vm444_vm0, %v468_v16, 0.0  ;;  %v477_v27 = vsel %vm451_vm1, %v470_v26, 0.0 }
  0x8c   : > { %472 = vadd.xlane.f32.xlu1 %v471_v18  ;;  %v450_v19 = vpop.xlane.xlu0 %449 }
  0x8d   : > { %v463_v20 = vmul.f32 %v1839_v12, %v450_v19 }
  0x8f   : > { %v466_v22 = vsub.f32 %v1835_v4, %v463_v20 }
  0x91   : > { %v469_v24 = vmul.f32 %v466_v22, %v466_v22 }
  0x93   : > { %v474_v25 = vsel %vm444_vm0, %v469_v24, 0.0 }
  0x94   : > { %475 = vadd.xlane.f32.xlu2 %v474_v25 }
  0x9c   : > { %478 = vadd.xlane.f32.xlu2 %v477_v27 }
  0xff   : > { %v473_v30 = vpop.xlane.xlu1 %472 }
 0x100   : > { %v480_v31 = vmul.f32 %v473_v30, %v1839_v12 }
 0x102   : > { %v483_v32 = vadd.f32 1e-06, %v480_v31 }
 0x104   : > { %1655 = vrsqrt.f32 %v483_v32  ;;  %vm492_vm4 = vweird.f32 %v483_v32 }
 0x107   : > { %v476_v33 = vpop.xlane.xlu2 %475 }
 0x108   : > { %v481_v34 = vmul.f32 %v476_v33, %v1839_v12 }
 0x10a   : > { %v1656_v35 = vpop.eup %1655  ;;  %v484_v36 = vadd.f32 1e-06, %v481_v34 }
 0x10b   : > { %v487_v37 = vmul.f32 %v1656_v35, %v483_v32  ;;  %vm493_vm3 = vweird.f32 %v1656_v35 }
 0x10c   : > { %1657 = vrsqrt.f32 %v484_v36  ;;  %vm494_vm5 = vmor %vm492_vm4, %vm493_vm3  ;;  %vm502_vm7 = vweird.f32 %v484_v36 }
 0x10d   : > { %v488_v38 = vmul.f32 %v1656_v35, %v487_v37 }
 0x10f   : > { %v489_v39 = vmul.f32 0.5, %v488_v38  ;;  %v479_v40 = vpop.xlane.xlu2 %478 }
 0x110   : > { %v482_v41 = vmul.f32 %v479_v40, %v1839_v12 }
 0x111   : > { %v490_v42 = vsub.f32 1.5, %v489_v39 }
 0x112   : > { %v1658_v43 = vpop.eup %1657  ;;  %v485_v44 = vadd.f32 1e-06, %v482_v41 }
 0x113   : > { %v491_v45 = vmul.f32 %v1656_v35, %v490_v42  ;;  %v497_v46 = vmul.f32 %v1658_v43, %v484_v36  ;;  %vm503_vm6 = vweird.f32 %v1658_v43 }
 0x114   : > { %1659 = vrsqrt.f32 %v485_v44  ;;  %vm504_vm8 = vmor %vm502_vm7, %vm503_vm6  ;;  %vm512_vm10 = vweird.f32 %v485_v44 }
 0x115   : > { %v495_v48 = vsel %vm494_vm5, %v1656_v35, %v491_v45  ;;  %v498_v49 = vmul.f32 %v1658_v43, %v497_v46 }
 0x116   : > { %v516_v50 = vmul.f32 %v495_v48, %v465_v15 }
 0x117   : > { %v499_v52 = vmul.f32 0.5, %v498_v49 }
 0x118   : > { %v523_v53 = vmul.f32 %v1645_v47, %v516_v50 }
 0x119   : > { %v500_v54 = vsub.f32 1.5, %v499_v52 }
 0x11a   : > { %v1660_v55 = vpop.eup %1659  ;;  %v530_v56 = vadd.f32 %v1646_v51, %v523_v53 }
 0x11b   : > { %v501_v57 = vmul.f32 %v1658_v43, %v500_v54  ;;  %v507_v58 = vmul.f32 %v1660_v55, %v485_v44  ;;  %vm513_vm9 = vweird.f32 %v1660_v55 }
 0x11c   : > { %1534 = vmatmul.msk.f32.vlgmr.msra.gmra.mxu0 %vm444_vm0, %v530_v56  ;;  %vm514_vm11 = vmor %vm512_vm10, %vm513_vm9 }
 0x11d   : > { %v505_v59 = vsel %vm504_vm8, %v1658_v43, %v501_v57  ;;  %v508_v60 = vmul.f32 %v1660_v55, %v507_v58  ;;  %v574_v58 = vld [vmem:[%s2158_s5] sm:$0xff] }
 0x11e   : > { %v517_v61 = vmul.f32 %v505_v59, %v466_v22  ;;  %v840_v59 = vrot.slane %v574_v58, 4 }
 0x11f   : > { %v509_v62 = vmul.f32 0.5, %v508_v60 }
 0x120   : > { %v524_v63 = vmul.f32 %v1645_v47, %v517_v61 }
 0x121   : > { %v510_v2 = vsub.f32 1.5, %v509_v62 }
 0x122   : > { %v531_v3 = vadd.f32 %v1646_v51, %v524_v63 }
 0x123   : > { %v511_v5 = vmul.f32 %v1660_v55, %v510_v2 }
 0x124   : > { %1535 = vmatmul.msk.f32.gmra.mxu0 %vm444_vm0, %v531_v3 }
 0x125   : > { %v515_v6 = vsel %vm514_vm11, %v1660_v55, %v511_v5 }
 0x126   : > { %v518_v7 = vmul.f32 %v515_v6, %v1848_v23 }
 0x128   : > { %v525_v8 = vmul.f32 %v1645_v47, %v518_v7 }
 0x12a   : > { %v532_v9 = vadd.f32 %v1646_v51, %v525_v8 }
 0x12c   : > { %1536 = vmatmul.msk.f32.gmra.mxu0 %vm444_vm0, %v532_v9 }
 0x199   : > { %v565_v11 = vpop.f32.mrf.mxu0 }
 0x19a   : > { %v1876_v13 = vadd.f32 %v1647_v10, %v565_v11 }
 0x19c   : > { %579 = vrot.lane.b32.xlu2 %v1876_v13, %s1730_s24 }
 0x1a1   : > { %v568_v14 = vpop.f32.mrf.mxu0 }
 0x1a2   : > { %v569_v15 = vadd.f32 %v1647_v10, %v568_v14 }
 0x1a4   : > { %581 = vrot.lane.b32.xlu1 %v569_v15, %s1730_s24  ;;  %v1898_v30 = vpack.i.bf16 %v1876_v13, %v569_v15 }
 0x1a9   : > { %v571_v16 = vpop.f32.mrf.mxu0 }
 0x1aa   : > { %v1879_v17 = vadd.f32 %v1647_v10, %v571_v16 }
 0x1ac   : > { %583 = vrot.lane.b32.xlu0 %v1879_v17, %s1730_s24 }
 0x1f6   : > { %v580_v20 = vpop.permute.xlu2 %579 }
 0x216   : > { %v582_v19 = vpop.permute.xlu1 %581 }
 0x21e   : > { %v584_v18 = vpop.permute.xlu0 %583 }
 0x21f   : > { %1537 = vmatpush.xpose.msk.msra.mxu1 %vm585_vm12, %v584_v18  ;;  %1601 = vmatpush.xpose.msk.msra.mxu3 %vm585_vm12, %v584_v18 }
 0x223   : > { %1538 = vmatpush.xpose.msk.msra.mxu1 %vm585_vm12, %v582_v19  ;;  %1602 = vmatpush.xpose.msk.msra.mxu3 %vm585_vm12, %v582_v19 }
 0x227   : > { %1539 = vmatpush.xpose.msk.msra.mxu1 %vm585_vm12, %v580_v20  ;;  %1603 = vmatpush.xpose.msk.msra.mxu3 %vm585_vm12, %v580_v20 }
 0x22a   : > { %1540 = vmatmul.msk.f32.vlgmr.msra.gmra.mxu1 %vm585_vm12, %v1876_v13  ;;  %1541 = vmatmul.msk.f32.vlgmr.msra.gmra.mxu3 %vm585_vm12, %v569_v15 }
 0x22b   : > { %1561 = vmatpush.msk.msrb.mxu1 %vm850_vm2, %v574_v58 }
 0x232   : > { %1542 = vmatmul.msk.f32.gmra.mxu3 %vm585_vm12, %v1879_v17 }
 0x2a7   : > { %v615_v21 = vpop.f32.mrf.mxu1 }
 0x2a8   : > { %v624_v22 = vmul.f32 0.5, %v615_v21 }
 0x2aa   : > { %v628_v23 = vsel %vm627_vm13, %v624_v22, -inf }
 0x2ab   : > { %629 = vmax.xlane.f32.xlu0 %v628_v23 }
 0x2ad   : > { %v618_v24 = vpop.f32.mrf.mxu3 }
 0x2ae   : > { %v625_v25 = vmul.f32 0.5, %v618_v24 }
 0x2b0   : > { %v631_v26 = vsel %vm627_vm13, %v625_v25, -inf }
 0x2b1   : > { %632 = vmax.xlane.f32.xlu2 %v631_v26 }
 0x2b5   : > { %v621_v27 = vpop.f32.mrf.mxu3 }
 0x2b6   : > { %v626_v28 = vmul.f32 0.5, %v621_v27 }
 0x2b8   : > { %v635_v29 = vsel %vm634_vm14, %v626_v28, -inf }
 0x2b9   : > { %636 = vmax.xlane.f32.xlu1 %v635_v29 }
 0x2c9   : > { %666 = vrot.lane.b32.xlu2 %v1879_v17, %s1731_s28 }
 0x2d1   : > { %716 = vrot.lane.b32.xlu2 %v569_v15, %s1732_s29 }
 0x2d2   : > { %1626 = vrot.lane.b32.xlu1 %v1898_v30, %s1731_s28 }
 0x2d9   : > { %708 = vrot.lane.b32.xlu2 %v1876_v13, %s1733_s30 }
 0x2da   : > { %714 = vrot.lane.b32.xlu1 %v1876_v13, %s1732_s29 }
 0x2e1   : > { %926 = vrot.lane.b32.xlu2 %v1879_v17, %s1734_s14 }
 0x2e2   : > { %710 = vrot.lane.b32.xlu1 %v569_v15, %s1733_s30 }
 0x2e9   : > { %922 = vrot.lane.b32.xlu2 %v1876_v13, %s1734_s14 }
 0x2ea   : > { %924 = vrot.lane.b32.xlu1 %v569_v15, %s1734_s14 }
 0x2f1   : > { %1096 = vrot.lane.b32.xlu2 %v569_v15, %s1735_s15 }
 0x2f2   : > { %916 = vrot.lane.b32.xlu1 %v1876_v13, %s1736_s16 }
 0x2f9   : > { %1088 = vrot.lane.b32.xlu2 %v1876_v13, %s1737_s17 }
 0x2fa   : > { %918 = vrot.lane.b32.xlu1 %v569_v15, %s1736_s16 }
 0x301   : > { %1092 = vrot.lane.b32.xlu2 %v1879_v17, %s1737_s17 }
 0x302   : > { %1090 = vrot.lane.b32.xlu1 %v569_v15, %s1737_s17 }
 0x31e   : > { %v630_v31 = vpop.xlane.xlu0 %629 }
 0x31f   : > { %v638_v32 = vsub.f32 %v624_v22, %v630_v31 }
 0x321   : > { %v641_v33 = vmul.f32 1.442695, %v638_v32 }
 0x323   : > { %1661 = vpow2.f32 %v641_v33 }
 0x324   : > { %v633_v34 = vpop.xlane.xlu2 %632 }
 0x325   : > { %v639_v35 = vsub.f32 %v625_v25, %v633_v34 }
 0x327   : > { %v643_v36 = vmul.f32 1.442695, %v639_v35 }
 0x329   : > { %v1662_v37 = vpop.eup %1661  ;;  %1663 = vpow2.f32 %v643_v36 }
 0x32a   : > { %v647_v38 = vsel %vm627_vm13, %v1662_v37, 0.0 }
 0x32b   : > { %648 = vadd.xlane.f32.xlu0 %v647_v38 }
 0x32c   : > { %v667_v39 = vpop.permute.xlu2 %666  ;;  %v637_v40 = vpop.xlane.xlu1 %636 }
 0x32d   : > { %v640_v41 = vsub.f32 %v626_v28, %v637_v40  ;;  %1543 = vmatpush.msk.msra.mxu2 %vm679_vm15, %v667_v39 }
 0x32f   : > { %v1664_v42 = vpop.eup %1663  ;;  %v645_v43 = vmul.f32 1.442695, %v640_v41 }
 0x330   : > { %v650_v44 = vsel %vm627_vm13, %v1664_v42, 0.0 }
 0x331   : > { %1665 = vpow2.f32 %v645_v43 }
 0x333   : > { %651 = vadd.xlane.f32.xlu0 %v650_v44 }
 0x334   : > { %v717_v55 = vpop.permute.xlu2 %716 }
 0x337   : > { %v1666_v45 = vpop.eup %1665 }
 0x338   : > { %v653_v46 = vsel %vm634_vm14, %v1666_v45, 0.0 }
 0x33b   : > { %654 = vadd.xlane.f32.xlu0 %v653_v46 }
 0x33c   : > { %v709_v62 = vpop.permute.xlu2 %708 }
 0x344   : > { %v1627_v47 = vpop.permute.xlu1 %1626  ;;  %v927_v2 = vpop.permute.xlu2 %926 }
 0x345   : > { %v1628_v48 = vunpack.i.l.bf16 %v1627_v47  ;;  %v1629_v49 = vunpack.i.h.bf16 %v1627_v47 }
 0x347   : > { %696 = vmatpush.msra.mxu2 %v1628_v48 }
 0x349   : > { %697 = vmatpush.msra.mxu2 %v1629_v49 }
 0x34b   : > { %1557 = vmatpush.msk.msrb.mxu2 %vm850_vm2, %v840_v59 }
 0x34c   : > { %v715_v63 = vpop.permute.xlu1 %714  ;;  %v923_v7 = vpop.permute.xlu2 %922 }
 0x34f   : > { %718 = vrot.lane.b32.xlu0 %v1879_v17, %s1732_s29 }
 0x354   : > { %v711_v5 = vpop.permute.xlu1 %710  ;;  %v1097_v10 = vpop.permute.xlu2 %1096 }
 0x357   : > { %712 = vrot.lane.b32.xlu0 %v1879_v17, %s1733_s30 }
 0x35c   : > { %v925_v8 = vpop.permute.xlu1 %924  ;;  %v1089_v20 = vpop.permute.xlu2 %1088 }
 0x35f   : > { %1098 = vrot.lane.b32.xlu0 %v1879_v17, %s1735_s15 }
 0x364   : > { %v1093_v24 = vpop.permute.xlu2 %1092 }
 0x367   : > { %1094 = vrot.lane.b32.xlu0 %v1876_v13, %s1735_s15  ;;  %v917_v13 = vpop.permute.xlu1 %916  ;;  %s440_s15 = scalar_lea.vmem %s2166_s13, %s1604_s27 }
 0x36f   : > { %920 = vrot.lane.b32.xlu0 %v1879_v17, %s1736_s16  ;;  %v919_v14 = vpop.permute.xlu1 %918 }
 0x377   : > { %v1091_v21 = vpop.permute.xlu1 %1090 }
 0x39e   : > { %v649_v50 = vpop.xlane.xlu0 %648 }
 0x39f   : > { %1667 = vrcp.f32 %v649_v50 }
 0x3a5   : > { %v1668_v51 = vpop.eup %1667 }
 0x3a6   : > { %v652_v52 = vpop.xlane.xlu0 %651  ;;  %v659_v53 = vmul.f32 %v1668_v51, %v1662_v37 }
 0x3a7   : > { %1669 = vrcp.f32 %v652_v52 }
 0x3a8   : > { %1544 = vmatmul.msk.f32.vlgmr.msra.gmra.mxu2 %vm627_vm13, %v659_v53 }
 0x3ad   : > { %v1670_v54 = vpop.eup %1669 }
 0x3ae   : > { %v655_v56 = vpop.xlane.xlu0 %654  ;;  %v660_v57 = vmul.f32 %v1670_v54, %v1664_v42 }
 0x3af   : > { %1671 = vrcp.f32 %v655_v56 }
 0x3b0   : > { %1545 = vmatmul.msk.f32.gmra.mxu2 %vm627_vm13, %v660_v57 }
 0x3b5   : > { %v1672_v60 = vpop.eup %1671 }
 0x3b6   : > { %v661_v61 = vmul.f32 %v1672_v60, %v1666_v45 }
 0x3b8   : > { %1546 = vmatmul.msk.f32.gmra.mxu2 %vm627_vm13, %v661_v61 }
 0x3c1   : > { %v719_v3 = vpop.permute.xlu0 %718 }
 0x3c2   : > { %1547 = vmatpush.xpose.msk.msrb.mxu3 %vm585_vm12, %v719_v3 }
 0x3c6   : > { %1548 = vmatpush.xpose.msk.msrb.mxu3 %vm585_vm12, %v717_v55 }
 0x3c9   : > { %v713_v6 = vpop.permute.xlu0 %712 }
 0x3ca   : > { %1549 = vmatpush.xpose.msk.msrb.mxu3 %vm585_vm12, %v715_v63 }
 0x3cd   : > { %1550 = vmatmul.msk.f32.vlgmr.msrb.gmra.mxu3 %vm585_vm12, %v709_v62 }
 0x3ce   : > { %1565 = vmatpush.xpose.msk.msra.mxu3 %vm585_vm12, %v927_v2 }
 0x3d1   : > { %v1099_v9 = vpop.permute.xlu0 %1098 }
 0x3d2   : > { %1566 = vmatpush.xpose.msk.msra.mxu3 %vm585_vm12, %v925_v8  ;;  %1579 = vmatpush.xpose.msk.msra.mxu1 %vm585_vm12, %v1099_v9 }
 0x3d5   : > { %1551 = vmatmul.msk.f32.gmra.mxu3 %vm585_vm12, %v711_v5 }
 0x3d6   : > { %1567 = vmatpush.xpose.msk.msra.mxu3 %vm585_vm12, %v923_v7  ;;  %1580 = vmatpush.xpose.msk.msra.mxu1 %vm585_vm12, %v1097_v10 }
 0x3d9   : > { %v1095_v11 = vpop.permute.xlu0 %1094 }
 0x3da   : > { %1581 = vmatpush.xpose.msk.msra.mxu1 %vm585_vm12, %v1095_v11 }
 0x3dd   : > { %1552 = vmatmul.msk.f32.gmra.mxu3 %vm585_vm12, %v713_v6 }
 0x3e1   : > { %v921_v15 = vpop.permute.xlu0 %920 }
 0x3e5   : > { %1568 = vmatmul.msk.f32.vlgmr.msra.gmra.mxu3 %vm585_vm12, %v917_v13 }
 0x3ed   : > { %1569 = vmatmul.msk.f32.gmra.mxu3 %vm585_vm12, %v919_v14 }
 0x3f5   : > { %1570 = vmatmul.msk.f32.gmra.mxu3 %vm585_vm12, %v921_v15 }
 0x42b   : > { %v699_v16 = vpop.f32.mrf.mxu2 }
 0x42c   : > { %1562 = vmatmul.msk.f32.vlgmr.msrb.gmra.mxu1 %vm585_vm12, %v699_v16 }
 0x433   : > { %v702_v18 = vpop.f32.mrf.mxu2 }
 0x434   : > { %1563 = vmatmul.msk.f32.gmra.mxu1 %vm585_vm12, %v702_v18 }
 0x43b   : > { %v705_v19 = vpop.f32.mrf.mxu2 }
 0x43c   : > { %1564 = vmatmul.msk.f32.gmra.mxu1 %vm585_vm12, %v705_v19 }
 0x444   : > { %1582 = vmatmul.msk.f32.vlgmr.msra.gmra.mxu1 %vm585_vm12, %v1089_v20 }
 0x44c   : > { %1583 = vmatmul.msk.f32.gmra.mxu1 %vm585_vm12, %v1091_v21 }
 0x450   : > { %v749_v22 = vpop.f32.mrf.mxu3 }
 0x451   : > { %v758_v23 = vmul.f32 0.5, %v749_v22 }
 0x453   : > { %v761_v25 = vsel %vm627_vm13, %v758_v23, -inf }
 0x454   : > { %762 = vmax.xlane.f32.xlu0 %v761_v25  ;;  %1584 = vmatmul.msk.f32.gmra.mxu1 %vm585_vm12, %v1093_v24 }
 0x458   : > { %v752_v26 = vpop.f32.mrf.mxu3 }
 0x459   : > { %v759_v27 = vmul.f32 0.5, %v752_v26 }
 0x45b   : > { %v764_v28 = vsel %vm627_vm13, %v759_v27, -inf }
 0x45c   : > { %765 = vmax.xlane.f32.xlu1 %v764_v28 }
 0x460   : > { %v755_v29 = vpop.f32.mrf.mxu3 }
 0x461   : > { %v760_v31 = vmul.f32 0.5, %v755_v29 }
 0x463   : > { %v767_v32 = vsel %vm634_vm14, %v760_v31, -inf }
 0x464   : > { %768 = vmax.xlane.f32.xlu2 %v767_v32 }
 0x468   : > { %v957_v33 = vpop.f32.mrf.mxu3 }
 0x469   : > { %v966_v34 = vmul.f32 0.5, %v957_v33 }
 0x46b   : > { %v969_v35 = vsel %vm627_vm13, %v966_v34, -inf }
 0x46c   : > { %970 = vmax.xlane.f32.xlu0 %v969_v35 }
 0x470   : > { %v960_v36 = vpop.f32.mrf.mxu3 }
 0x471   : > { %v967_v37 = vmul.f32 0.5, %v960_v36 }
 0x473   : > { %v972_v38 = vsel %vm627_vm13, %v967_v37, -inf }
 0x474   : > { %973 = vmax.xlane.f32.xlu2 %v972_v38 }
 0x478   : > { %v963_v39 = vpop.f32.mrf.mxu3 }
 0x479   : > { %v1963_v40 = vmul.f32 0.5, %v963_v39 }
 0x47b   : > { %v975_v41 = vsel %vm634_vm14, %v1963_v40, -inf }
 0x47c   : > { %976 = vmax.xlane.f32.xlu1 %v975_v41 }
 0x48c   : > { %1631 = vrot.lane.b32.xlu2 %v1898_v30, %s1738_s20 }
 0x494   : > { %1006 = vrot.lane.b32.xlu2 %v1879_v17, %s1739_s21 }
 0x4a9   : > { %v1971_v42 = vpop.f32.mrf.mxu1 }
 0x4b1   : > { %v1973_v43 = vpop.f32.mrf.mxu1 }
 0x4b9   : > { %v1975_v44 = vpop.f32.mrf.mxu1 }
 0x4c1   : > { %v1129_v45 = vpop.f32.mrf.mxu1 }
 0x4c2   : > { %v1138_v46 = vmul.f32 0.5, %v1129_v45 }
 0x4c4   : > { %v1141_v47 = vsel %vm627_vm13, %v1138_v46, -inf }
 0x4c5   : > { %1142 = vmax.xlane.f32.xlu1 %v1141_v47 }
 0x4c7   : > { %v763_v48 = vpop.xlane.xlu0 %762 }
 0x4c8   : > { %v770_v49 = vsub.f32 %v758_v23, %v763_v48 }
 0x4c9   : > { %v1132_v50 = vpop.f32.mrf.mxu1 }
 0x4ca   : > { %v773_v51 = vmul.f32 1.442695, %v770_v49  ;;  %v2004_v18 = vmul.f32 0.5, %v1132_v50 }
 0x4cc   : > { %1673 = vpow2.f32 %v773_v51  ;;  %v1144_v19 = vsel %vm627_vm13, %v2004_v18, -inf }
 0x4cf   : > { %v766_v52 = vpop.xlane.xlu1 %765 }
 0x4d0   : > { %v771_v53 = vsub.f32 %v759_v27, %v766_v52 }
 0x4d1   : > { %v1135_v54 = vpop.f32.mrf.mxu1 }
 0x4d2   : > { %v1978_v55 = vpop.eup %1673  ;;  %v775_v56 = vmul.f32 1.442695, %v771_v53  ;;  %v1140_v57 = vmul.f32 0.5, %v1135_v54 }
 0x4d3   : > { %v779_v58 = vsel %vm627_vm13, %v1978_v55, 0.0 }
 0x4d4   : > { %1675 = vpow2.f32 %v775_v56  ;;  %780 = vadd.xlane.f32.xlu0 %v779_v58  ;;  %v1147_v59 = vsel %vm634_vm14, %v1140_v57, -inf }
 0x4d5   : > { %1148 = vmax.xlane.f32.xlu2 %v1147_v59 }
 0x4d7   : > { %v769_v60 = vpop.xlane.xlu2 %768 }
 0x4d8   : > { %v772_v61 = vsub.f32 %v760_v31, %v769_v60 }
 0x4da   : > { %v1983_v62 = vpop.eup %1675  ;;  %v777_v63 = vmul.f32 1.442695, %v772_v61 }
 0x4db   : > { %v782_v2 = vsel %vm627_vm13, %v1983_v62, 0.0 }
 0x4dc   : > { %1677 = vpow2.f32 %v777_v63  ;;  %783 = vadd.xlane.f32.xlu0 %v782_v2 }
 0x4de   : > { %798 = vrot.lane.b32.xlu1 %v1879_v17, %s1738_s20 }
 0x4df   : > { %v971_v3 = vpop.xlane.xlu0 %970 }
 0x4e0   : > { %v978_v5 = vsub.f32 %v966_v34, %v971_v3 }
 0x4e2   : > { %v1989_v6 = vpop.eup %1677  ;;  %v981_v7 = vmul.f32 1.442695, %v978_v5 }
 0x4e3   : > { %v785_v8 = vsel %vm634_vm14, %v1989_v6, 0.0 }
 0x4e4   : > { %1679 = vpow2.f32 %v981_v7  ;;  %786 = vadd.xlane.f32.xlu0 %v785_v8 }
 0x4e7   : > { %v974_v11 = vpop.xlane.xlu2 %973 }
 0x4e8   : > { %v979_v13 = vsub.f32 %v967_v37, %v974_v11 }
 0x4ea   : > { %v1993_v9 = vpop.eup %1679  ;;  %v983_v14 = vmul.f32 1.442695, %v979_v13 }
 0x4eb   : > { %v987_v10 = vsel %vm627_vm13, %v1993_v9, 0.0 }
 0x4ec   : > { %988 = vadd.xlane.f32.xlu0 %v987_v10  ;;  %1681 = vpow2.f32 %v983_v14 }
 0x4ed   : > { %1178 = vrot.lane.b32.xlu2 %v1879_v17, %s1740_s22 }
 0x4ef   : > { %v977_v17 = vpop.xlane.xlu1 %976  ;;  %v1632_v20 = vpop.permute.xlu2 %1631 }
 0x4f0   : > { %v980_v23 = vsub.f32 %v1963_v40, %v977_v17  ;;  %v1633_v39 = vunpack.i.l.bf16 %v1632_v20  ;;  %v1634_v41 = vunpack.i.h.bf16 %v1632_v20 }
 0x4f2   : > { %v2000_v15 = vpop.eup %1681  ;;  %v985_v25 = vmul.f32 1.442695, %v980_v23 }
 0x4f3   : > { %v990_v16 = vsel %vm627_vm13, %v2000_v15, 0.0 }
 0x4f7   : > { %v1007_v26 = vpop.permute.xlu2 %1006 }
 0x500   : > { %1636 = vrot.lane.b32.xlu0 %v1898_v30, %s1739_s21 }
 0x516   : > { %991 = vadd.xlane.f32.xlu2 %v990_v16  ;;  %v575_v16 = vld [vmem:[%s2158_s5 + $0x8] sm:$0xff] }
 0x517   : > { %1575 = vmatpush.msk.msra.mxu2 %vm850_vm2, %v575_v16 }
 0x52a   : > { %1145 = vmax.xlane.f32.xlu0 %v1144_v19 }
 0x538   : > { %v1143_v21 = vpop.xlane.xlu1 %1142 }
 0x539   : > { %v1150_v22 = vsub.f32 %v1138_v46, %v1143_v21 }
 0x53b   : > { %v1153_v24 = vmul.f32 1.442695, %v1150_v22 }
 0x53d   : > { %1683 = vpow2.f32 %v1153_v24 }
 0x53e   : > { %1641 = vrot.lane.b32.xlu0 %v1898_v30, %s1740_s22  ;;  %1685 = vpow2.f32 %v985_v25 }
 0x543   : > { %v2010_v27 = vpop.eup %1683 }
 0x544   : > { %v1159_v28 = vsel %vm627_vm13, %v2010_v27, 0.0  ;;  %v2014_v32 = vpop.eup %1685 }
 0x545   : > { %1160 = vadd.xlane.f32.xlu1 %v1159_v28  ;;  %v993_v35 = vsel %vm634_vm14, %v2014_v32, 0.0 }
 0x547   : > { %v781_v29 = vpop.xlane.xlu0 %780 }
 0x548   : > { %v1149_v31 = vpop.xlane.xlu2 %1148  ;;  %1687 = vrcp.f32 %v781_v29 }
 0x549   : > { %v1152_v33 = vsub.f32 %v1140_v57, %v1149_v31 }
 0x54b   : > { %v1157_v34 = vmul.f32 1.442695, %v1152_v33 }
 0x54d   : > { %1689 = vpow2.f32 %v1157_v34  ;;  %994 = vadd.xlane.f32.xlu1 %v993_v35 }
 0x54e   : > { %v1688_v38 = vpop.eup %1687 }
 0x54f   : > { %v784_v30 = vpop.xlane.xlu0 %783  ;;  %v791_v46 = vmul.f32 %v1688_v38, %v1978_v55 }
 0x550   : > { %v1179_v36 = vpop.permute.xlu2 %1178  ;;  %v799_v37 = vpop.permute.xlu1 %798  ;;  %1691 = vrcp.f32 %v784_v30 }
 0x551   : > { %1553 = vmatpush.msk.msrb.mxu0 %vm679_vm15, %v799_v37  ;;  %1585 = vmatpush.msk.msrb.mxu3 %vm679_vm15, %v1179_v36 }
 0x553   : > { %v2020_v40 = vpop.eup %1689  ;;  %827 = vmatpush.msrb.mxu0 %v1633_v39 }
 0x554   : > { %v1165_v45 = vsel %vm634_vm14, %v2020_v40, 0.0 }
 0x555   : > { %1166 = vadd.xlane.f32.xlu1 %v1165_v45  ;;  %828 = vmatpush.msrb.mxu0 %v1634_v41 }
 0x556   : > { %1554 = vmatmul.msk.f32.vlgmr.msrb.gmra.mxu0 %vm627_vm13, %v791_v46  ;;  %v1692_v48 = vpop.eup %1691 }
 0x557   : > { %1571 = vmatpush.msk.msra.mxu0 %vm679_vm15, %v1007_v26  ;;  %v787_v47 = vpop.xlane.xlu0 %786  ;;  %v792_v49 = vmul.f32 %v1692_v48, %v1983_v62 }
 0x558   : > { %1693 = vrcp.f32 %v787_v47 }
 0x55e   : > { %1555 = vmatmul.msk.f32.gmra.mxu0 %vm627_vm13, %v792_v49  ;;  %v1694_v50 = vpop.eup %1693 }
 0x55f   : > { %v793_v51 = vmul.f32 %v1694_v50, %v1989_v6  ;;  %v989_v52 = vpop.xlane.xlu0 %988 }
 0x560   : > { %1695 = vrcp.f32 %v989_v52 }
 0x566   : > { %1556 = vmatmul.msk.f32.gmra.mxu0 %vm627_vm13, %v793_v51  ;;  %v1696_v54 = vpop.eup %1695 }
 0x567   : > { %v999_v57 = vmul.f32 %v1696_v54, %v1993_v9 }
 0x572   : > { %v1637_v53 = vpop.permute.xlu0 %1636 }
 0x573   : > { %v1638_v55 = vunpack.i.l.bf16 %v1637_v53  ;;  %v1639_v56 = vunpack.i.h.bf16 %v1637_v53 }
 0x575   : > { %1035 = vmatpush.msra.mxu0 %v1638_v55 }
 0x577   : > { %1036 = vmatpush.msra.mxu0 %v1639_v56 }
 0x578   : > { %1572 = vmatmul.msk.f32.vlgmr.msra.gmra.mxu0 %vm627_vm13, %v999_v57 }
 0x589   : > { %v992_v58 = vpop.xlane.xlu2 %991 }
 0x58a   : > { %1697 = vrcp.f32 %v992_v58 }
 0x590   : > { %v1698_v59 = vpop.eup %1697 }
 0x591   : > { %v1000_v60 = vmul.f32 %v1698_v59, %v2000_v15 }
 0x593   : > { %1573 = vmatmul.msk.f32.gmra.mxu0 %vm627_vm13, %v1000_v60 }
 0x59d   : > { %v1146_v61 = vpop.xlane.xlu0 %1145 }
 0x59e   : > { %v1151_v62 = vsub.f32 %v2004_v18, %v1146_v61  ;;  %v1219_v18 = vrot.slane %v575_v16, 4 }
 0x5a0   : > { %v1155_v63 = vmul.f32 1.442695, %v1151_v62  ;;  %1589 = vmatpush.msk.msrb.mxu0 %vm850_vm2, %v1219_v18 }
 0x5a2   : > { %1699 = vpow2.f32 %v1155_v63 }
 0x5a8   : > { %v1700_v2 = vpop.eup %1699 }
 0x5a9   : > { %v1162_v3 = vsel %vm627_vm13, %v1700_v2, 0.0 }
 0x5aa   : > { %1163 = vadd.xlane.f32.xlu0 %v1162_v3 }
 0x5b0   : > { %v1642_v5 = vpop.permute.xlu0 %1641 }
 0x5b1   : > { %v1643_v6 = vunpack.i.l.bf16 %v1642_v5  ;;  %v1644_v7 = vunpack.i.h.bf16 %v1642_v5 }
 0x5b3   : > { %1207 = vmatpush.msrb.mxu3 %v1643_v6 }
 0x5b5   : > { %1208 = vmatpush.msrb.mxu3 %v1644_v7 }
 0x5b8   : > { %v1161_v8 = vpop.xlane.xlu1 %1160 }
 0x5b9   : > { %1701 = vrcp.f32 %v1161_v8 }
 0x5bf   : > { %v1702_v9 = vpop.eup %1701 }
 0x5c0   : > { %v1171_v10 = vmul.f32 %v1702_v9, %v2010_v27  ;;  %v995_v11 = vpop.xlane.xlu1 %994 }
 0x5c1   : > { %1703 = vrcp.f32 %v995_v11  ;;  %v1351_v11 = vld [vmem:[%s2162_s9 + $0x8] sm:$0xff] }
 0x5c2   : > { %1586 = vmatmul.msk.f32.vlgmr.msrb.gmra.mxu3 %vm627_vm13, %v1171_v10 }
 0x5c7   : > { %v1704_v13 = vpop.eup %1703 }
 0x5c8   : > { %v1001_v14 = vmul.f32 %v1704_v13, %v2014_v32  ;;  %v1167_v23 = vpop.xlane.xlu1 %1166  ;;  %v1350_v13 = vld [vmem:[%s2162_s9] sm:$0xff] }
 0x5ca   : > { %1574 = vmatmul.msk.f32.gmra.mxu0 %vm627_vm13, %v1001_v14 }
 0x5d3   : > { %v830_v15 = vpop.f32.mrf.mxu0 }
 0x5d4   : > { %1558 = vmatmul.msk.f32.vlgmr.msrb.gmra.mxu2 %vm585_vm12, %v830_v15 }
 0x5d5   : > { %1379 = vmatpush.msrb.mxu2 %v1351_v11 }
 0x5d7   : > { %1380 = vmatpush.msrb.mxu2 %v1350_v13 }
 0x5db   : > { %v833_v19 = vpop.f32.mrf.mxu0 }
 0x5dc   : > { %1559 = vmatmul.msk.f32.gmra.mxu2 %vm585_vm12, %v833_v19 }
 0x5e3   : > { %v836_v17 = vpop.f32.mrf.mxu0 }
 0x5e4   : > { %1560 = vmatmul.msk.f32.gmra.mxu2 %vm585_vm12, %v836_v17 }
 0x5f5   : > { %v1038_v20 = vpop.f32.mrf.mxu0 }
 0x5f6   : > { %1576 = vmatmul.msk.f32.vlgmr.msra.gmra.mxu2 %vm585_vm12, %v1038_v20 }
 0x610   : > { %v1041_v21 = vpop.f32.mrf.mxu0 }
 0x611   : > { %1577 = vmatmul.msk.f32.gmra.mxu2 %vm585_vm12, %v1041_v21 }
 0x61d   : > { %v1164_v22 = vpop.xlane.xlu0 %1163 }
 0x61e   : > { %1705 = vrcp.f32 %v1164_v22 }
 0x61f   : > { %1707 = vrcp.f32 %v1167_v23  ;;  %v1649_v23 = vld [vmem:[%s2160_s7] ss:$0 sm:$0xff] }
 0x624   : > { %v1706_v24 = vpop.eup %1705 }
 0x625   : > { %v1172_v25 = vmul.f32 %v1706_v24, %v1700_v2  ;;  %v1708_v26 = vpop.eup %1707 }
 0x626   : > { %v1173_v27 = vmul.f32 %v1708_v26, %v2020_v40  ;;  %v1648_v40 = vld [vmem:[%s2159_s6] ss:$0 sm:$0xff] }
 0x627   : > { %1587 = vmatmul.msk.f32.gmra.mxu3 %vm627_vm13, %v1172_v25  ;;  %v1650_v26 = vld [vmem:[%s2161_s8] ss:$0 sm:$0xff] }
 0x62f   : > { %1588 = vmatmul.msk.f32.gmra.mxu3 %vm627_vm13, %v1173_v27 }
 0x645   : > { %v1210_v28 = vpop.f32.mrf.mxu3 }
 0x646   : > { %1590 = vmatmul.msk.f32.vlgmr.msrb.gmra.mxu0 %vm585_vm12, %v1210_v28 }
 0x647   : > { %v1044_v29 = vpop.f32.mrf.mxu0 }
 0x648   : > { %1578 = vmatmul.msk.f32.gmra.mxu2 %vm585_vm12, %v1044_v29 }
 0x657   : > { %v870_v31 = vpop.f32.mrf.mxu2 }
 0x658   : > { %v908_v36 = vadd.f32 %v1971_v42, %v870_v31 }
 0x65f   : > { %v873_v33 = vpop.f32.mrf.mxu2 }
 0x660   : > { %v911_v48 = vadd.f32 %v1973_v43, %v873_v33 }
 0x667   : > { %v876_v35 = vpop.f32.mrf.mxu2 }
 0x668   : > { %v914_v53 = vadd.f32 %v1975_v44, %v876_v35 }
 0x679   : > { %v1076_v30 = vpop.f32.mrf.mxu2 }
 0x67a   : > { %v1085_v37 = vadd.f32 %v1076_v30, %v908_v36 }
 0x694   : > { %v1079_v47 = vpop.f32.mrf.mxu2 }
 0x695   : > { %v1086_v49 = vadd.f32 %v1079_v47, %v911_v48 }
 0x6aa   : > { %v1213_v32 = vpop.f32.mrf.mxu3 }
 0x6ab   : > { %1591 = vmatmul.msk.f32.gmra.mxu0 %vm585_vm12, %v1213_v32 }
 0x6b2   : > { %v1216_v34 = vpop.f32.mrf.mxu3 }
 0x6b3   : > { %1592 = vmatmul.msk.f32.gmra.mxu0 %vm585_vm12, %v1216_v34  ;;  %vm1430_vm12 = vcmask 523264  }
 0x6c3   : > { %v1248_v38 = vpop.f32.mrf.mxu0 }
 0x6c4   : > { %v1257_v39 = vadd.f32 %v1248_v38, %v1085_v37 }
 0x6c6   : > { %v1260_v41 = vadd.f32 %v1257_v39, %v1827_v0 }
 0x6c8   : > { %v2063_v45 = vadd.f32 %v1648_v40, %v1260_v41 }
 0x6ca   : > { %v1270_v46 = vsel %vm444_vm0, %v2063_v45, 0.0 }
 0x6cb   : > { %1271 = vadd.xlane.f32.xlu1 %v1270_v46  ;;  %v1082_v52 = vpop.f32.mrf.mxu2 }
 0x6cc   : > { %v1087_v0 = vadd.f32 %v1082_v52, %v914_v53 }
 0x728   : > { %v1251_v42 = vpop.f32.mrf.mxu0 }
 0x729   : > { %v1258_v50 = vadd.f32 %v1251_v42, %v1086_v49 }
 0x72b   : > { %v1261_v51 = vadd.f32 %v1258_v50, %v1835_v4 }
 0x72d   : > { %v2070_v54 = vadd.f32 %v1648_v40, %v1261_v51 }
 0x72f   : > { %v1273_v55 = vsel %vm444_vm0, %v2070_v54, 0.0 }
 0x730   : > { %1274 = vadd.xlane.f32.xlu2 %v1273_v55  ;;  %v1254_v56 = vpop.f32.mrf.mxu0 }
 0x731   : > { %v1259_v57 = vadd.f32 %v1254_v56, %v1087_v0 }
 0x733   : > { %v1262_v58 = vadd.f32 %v1259_v57, %v1829_v1  ;;  %v1425_v57 = vld [vmem:[%s2164_s11 + $0x38] sm:$0xff] }
 0x734   : > { %1448 = vmatpush.msrb.mxu1 %v1425_v57 }
 0x735   : > { %v2075_v43 = vadd.f32 %v1648_v40, %v1262_v58  ;;  %v1424_v58 = vld [vmem:[%s2164_s11 + $0x30] sm:$0xff] }
 0x736   : > { %1449 = vmatpush.msrb.mxu1 %v1424_v58 }
 0x737   : > { %v1276_v59 = vsel %vm451_vm1, %v2075_v43, 0.0 }
 0x738   : > { %1277 = vadd.xlane.f32.xlu1 %v1276_v59  ;;  %v1423_v59 = vld [vmem:[%s2164_s11 + $0x28] sm:$0xff] }
 0x739   : > { %1450 = vmatpush.msrb.mxu1 %v1423_v59 }
 0x73e   : > { %v1272_v4 = vpop.xlane.xlu1 %1271 }
 0x73f   : > { %v1279_v44 = vmul.f32 %v1272_v4, %v1839_v12  ;;  %v1422_v4 = vld [vmem:[%s2164_s11 + $0x20] sm:$0xff] }
 0x740   : > { %1451 = vmatpush.msrb.mxu1 %v1422_v4 }
 0x741   : > { %v1282_v60 = vsub.f32 %v2063_v45, %v1279_v44  ;;  %v1421_v44 = vld [vmem:[%s2164_s11 + $0x18] sm:$0xff] }
 0x742   : > { %1452 = vmatpush.msrb.mxu1 %v1421_v44 }
 0x743   : > { %v1285_v61 = vmul.f32 %v1282_v60, %v1282_v60 }
 0x745   : > { %v1288_v62 = vsel %vm444_vm0, %v1285_v61, 0.0  ;;  %v1419_v61 = vld [vmem:[%s2164_s11 + $0x8] sm:$0xff] }
 0x746   : > { %1289 = vadd.xlane.f32.xlu2 %v1288_v62  ;;  %v1418_v62 = vld [vmem:[%s2164_s11] sm:$0xff] }
 0x7a3   : > { %v1275_v63 = vpop.xlane.xlu2 %1274 }
 0x7a4   : > { %v1280_v2 = vmul.f32 %v1275_v63, %v1839_v12  ;;  %v1651_v63 = vld [vmem:[%s2163_s10] ss:$0 sm:$0xff] }
 0x7a6   : > { %v1283_v1 = vsub.f32 %v2070_v54, %v1280_v2 }
 0x7a8   : > { %v1286_v3 = vmul.f32 %v1283_v1, %v1283_v1 }
 0x7aa   : > { %v1291_v5 = vsel %vm444_vm0, %v1286_v3, 0.0 }
 0x7ab   : > { %1292 = vadd.xlane.f32.xlu1 %v1291_v5  ;;  %v1278_v6 = vpop.xlane.xlu1 %1277 }
 0x7ac   : > { %v1281_v7 = vmul.f32 %v1278_v6, %v1839_v12 }
 0x7ae   : > { %v1284_v8 = vsub.f32 %v2075_v43, %v1281_v7 }
 0x7b0   : > { %v1287_v9 = vmul.f32 %v1284_v8, %v1284_v8 }
 0x7b2   : > { %v1294_v10 = vsel %vm451_vm1, %v1287_v9, 0.0 }
 0x7b3   : > { %1295 = vadd.xlane.f32.xlu0 %v1294_v10 }
 0x7b9   : > { %v1290_v14 = vpop.xlane.xlu2 %1289 }
 0x7ba   : > { %v1297_v15 = vmul.f32 %v1290_v14, %v1839_v12 }
 0x7bc   : > { %v1300_v16 = vadd.f32 1e-06, %v1297_v15 }
 0x7be   : > { %1709 = vrsqrt.f32 %v1300_v16  ;;  %vm1309_vm4 = vweird.f32 %v1300_v16 }
 0x7c4   : > { %v1710_v18 = vpop.eup %1709 }
 0x7c5   : > { %v1304_v19 = vmul.f32 %v1710_v18, %v1300_v16  ;;  %vm1310_vm3 = vweird.f32 %v1710_v18 }
 0x7c6   : > { %vm1311_vm5 = vmor %vm1309_vm4, %vm1310_vm3 }
 0x7c7   : > { %v1305_v17 = vmul.f32 %v1710_v18, %v1304_v19 }
 0x7c9   : > { %v1306_v20 = vmul.f32 0.5, %v1305_v17 }
 0x7cb   : > { %v1307_v21 = vsub.f32 1.5, %v1306_v20 }
 0x7cd   : > { %v1308_v22 = vmul.f32 %v1710_v18, %v1307_v21 }
 0x7cf   : > { %v1312_v24 = vsel %vm1311_vm5, %v1710_v18, %v1308_v22 }
 0x7d0   : > { %v1333_v25 = vmul.f32 %v1312_v24, %v1282_v60  ;;  %v1420_v60 = vld [vmem:[%s2164_s11 + $0x10] sm:$0xff] }
 0x7d1   : > { %1453 = vmatpush.msrb.mxu1 %v1420_v60 }
 0x7d2   : > { %v1340_v27 = vmul.f32 %v1649_v23, %v1333_v25 }
 0x7d3   : > { %1454 = vmatpush.msrb.mxu1 %v1419_v61 }
 0x7d4   : > { %v1347_v28 = vadd.f32 %v1650_v26, %v1340_v27 }
 0x7d5   : > { %1455 = vmatpush.msrb.mxu1 %v1418_v62 }
 0x7d6   : > { %1593 = vmatmul.msk.f32.vlgmr.msrb.gmra.mxu2 %vm444_vm0, %v1347_v28 }
 0x81e   : > { %v1293_v29 = vpop.xlane.xlu1 %1292 }
 0x81f   : > { %v1298_v31 = vmul.f32 %v1293_v29, %v1839_v12 }
 0x821   : > { %v1301_v32 = vadd.f32 1e-06, %v1298_v31 }
 0x823   : > { %1711 = vrsqrt.f32 %v1301_v32  ;;  %vm1319_vm7 = vweird.f32 %v1301_v32 }
 0x826   : > { %v1296_v33 = vpop.xlane.xlu0 %1295 }
 0x827   : > { %v1299_v34 = vmul.f32 %v1296_v33, %v1839_v12 }
 0x829   : > { %v1712_v35 = vpop.eup %1711  ;;  %v1302_v30 = vadd.f32 1e-06, %v1299_v34 }
 0x82a   : > { %v1314_v36 = vmul.f32 %v1712_v35, %v1301_v32  ;;  %vm1320_vm6 = vweird.f32 %v1712_v35 }
 0x82b   : > { %1713 = vrsqrt.f32 %v1302_v30  ;;  %vm1321_vm8 = vmor %vm1319_vm7, %vm1320_vm6  ;;  %vm1329_vm10 = vweird.f32 %v1302_v30 }
 0x82c   : > { %v1315_v37 = vmul.f32 %v1712_v35, %v1314_v36  ;;  %v1652_v36 = vld [vmem:[%s2165_s12] ss:$0 sm:$0xff] }
 0x82e   : > { %v1316_v38 = vmul.f32 0.5, %v1315_v37 }
 0x830   : > { %v1317_v39 = vsub.f32 1.5, %v1316_v38 }
 0x831   : > { %v1714_v40 = vpop.eup %1713 }
 0x832   : > { %v1318_v41 = vmul.f32 %v1712_v35, %v1317_v39  ;;  %v1324_v46 = vmul.f32 %v1714_v40, %v1302_v30  ;;  %vm1330_vm9 = vweird.f32 %v1714_v40 }
 0x833   : > { %vm1331_vm11 = vmor %vm1329_vm10, %vm1330_vm9 }
 0x834   : > { %v1322_v47 = vsel %vm1321_vm8, %v1712_v35, %v1318_v41  ;;  %v1325_v48 = vmul.f32 %v1714_v40, %v1324_v46 }
 0x835   : > { %v1334_v49 = vmul.f32 %v1322_v47, %v1283_v1 }
 0x836   : > { %v1326_v42 = vmul.f32 0.5, %v1325_v48 }
 0x837   : > { %v1341_v50 = vmul.f32 %v1649_v23, %v1334_v49 }
 0x838   : > { %v1327_v51 = vsub.f32 1.5, %v1326_v42 }
 0x839   : > { %v1348_v12 = vadd.f32 %v1650_v26, %v1341_v50 }
 0x83a   : > { %v1328_v52 = vmul.f32 %v1714_v40, %v1327_v51 }
 0x83b   : > { %1594 = vmatmul.msk.f32.gmra.mxu2 %vm444_vm0, %v1348_v12 }
 0x83c   : > { %v1332_v53 = vsel %vm1331_vm11, %v1714_v40, %v1328_v52 }
 0x83d   : > { %v1335_v0 = vmul.f32 %v1332_v53, %v1284_v8 }
 0x83f   : > { %v1342_v55 = vmul.f32 %v1649_v23, %v1335_v0 }
 0x841   : > { %v1349_v56 = vadd.f32 %v1650_v26, %v1342_v55 }
 0x843   : > { %1595 = vmatmul.msk.f32.gmra.mxu2 %vm444_vm0, %v1349_v56 }
 0x859   : > { %v1382_v2 = vpop.f32.mrf.mxu2 }
 0x85a   : > { %v1383_v1 = vadd.f32 %v1651_v63, %v1382_v2 }
 0x85c   : > { %v1391_v3 = vmul.f32 %v1383_v1, %v1383_v1 }
 0x85e   : > { %v1394_v5 = vmul.f32 %v1391_v3, %v1383_v1 }
 0x860   : > { %v1397_v6 = vmul.f32 0.044715, %v1394_v5 }
 0x862   : > { %v1400_v7 = vadd.f32 %v1397_v6, %v1383_v1 }
 0x864   : > { %v1403_v8 = vmul.f32 0.7978846, %v1400_v7 }
 0x866   : > { %1715 = vtanh.f32 %v1403_v8 }
 0x86c   : > { %v1716_v9 = vpop.eup %1715 }
 0x86d   : > { %v1409_v10 = vadd.f32 1.0, %v1716_v9 }
 0x86f   : > { %v1412_v11 = vmul.f32 0.5, %v1409_v10 }
 0x871   : > { %v1415_v13 = vmul.f32 %v1412_v11, %v1383_v1 }
 0x873   : > { %1596 = vmatmul.msk.f32.vlgmr.msrb.gmra.mxu1 %vm1430_vm12, %v1415_v13 }
 0x8be   : > { %v1385_v14 = vpop.f32.mrf.mxu2 }
 0x8bf   : > { %v1386_v15 = vadd.f32 %v1651_v63, %v1385_v14 }
 0x8c1   : > { %v1392_v16 = vmul.f32 %v1386_v15, %v1386_v15 }
 0x8c3   : > { %v1395_v18 = vmul.f32 %v1392_v16, %v1386_v15 }
 0x8c5   : > { %v1398_v19 = vmul.f32 0.044715, %v1395_v18 }
 0x8c6   : > { %v1388_v17 = vpop.f32.mrf.mxu2 }
 0x8c7   : > { %v1401_v20 = vadd.f32 %v1398_v19, %v1386_v15  ;;  %v1389_v21 = vadd.f32 %v1651_v63, %v1388_v17 }
 0x8c9   : > { %v1393_v22 = vmul.f32 %v1389_v21, %v1389_v21  ;;  %v1404_v23 = vmul.f32 0.7978846, %v1401_v20 }
 0x8cb   : > { %v1396_v24 = vmul.f32 %v1393_v22, %v1389_v21  ;;  %1717 = vtanh.f32 %v1404_v23 }
 0x8cd   : > { %v1399_v25 = vmul.f32 0.044715, %v1396_v24 }
 0x8cf   : > { %v1402_v26 = vadd.f32 %v1399_v25, %v1389_v21 }
 0x8d1   : > { %v1718_v27 = vpop.eup %1717  ;;  %v1405_v28 = vmul.f32 0.7978846, %v1402_v26 }
 0x8d2   : > { %v1410_v29 = vadd.f32 1.0, %v1718_v27 }
 0x8d3   : > { %1719 = vtanh.f32 %v1405_v28 }
 0x8d4   : > { %v1413_v31 = vmul.f32 0.5, %v1410_v29 }
 0x8d6   : > { %v1416_v32 = vmul.f32 %v1413_v31, %v1386_v15 }
 0x8d8   : > { %1597 = vmatmul.msk.f32.gmra.mxu1 %vm1430_vm12, %v1416_v32 }
 0x8d9   : > { %v1720_v33 = vpop.eup %1719 }
 0x8da   : > { %v1411_v34 = vadd.f32 1.0, %v1720_v33 }
 0x8dc   : > { %v1414_v35 = vmul.f32 0.5, %v1411_v34 }
 0x8de   : > { %v1417_v30 = vmul.f32 %v1414_v35, %v1389_v21 }
 0x8e0   : > { %1598 = vmatmul.msk.f32.gmra.mxu1 %vm1430_vm12, %v1417_v30 }
 0x8f0   : > { %v1457_v37 = vpop.f32.mrf.mxu1 }
 0x8f1   : > { %v1458_v38 = vadd.f32 %v1652_v36, %v1457_v37 }
 0x8f3   : > { %v1466_v39 = vadd.f32 %v1458_v38, %v2063_v45 }
 0x8f5   : > { %1469 = vst.msk [vmem:[%s440_s15] sm:$0xff] %vm444_vm0, %v1466_v39 }
 0x955   : > { %v1460_v40 = vpop.f32.mrf.mxu1 }
 0x956   : > { %v1461_v41 = vadd.f32 %v1652_v36, %v1460_v40 }
 0x958   : > { %v1467_v46 = vadd.f32 %v1461_v41, %v2070_v54 }
 0x95a   : > { %1470 = vst.msk [vmem:[%s440_s15 + $0x8] sm:$0xff] %vm444_vm0, %v1467_v46 }
 0x95d   : > { %v1463_v47 = vpop.f32.mrf.mxu1 }
 0x95e   : > { %v1464_v48 = vadd.f32 %v1652_v36, %v1463_v47 }
 0x960   : > { %v1468_v49 = vadd.f32 %v1464_v48, %v2075_v43 }
 0x962   : > { %1471 = vst.msk [vmem:[%s440_s15 + $0x10] sm:$0x1] %vm451_vm1, %v1468_v49 }
 0x963 PF: > { %s23_s25 = sadd.s32 1, %s1727_s25  }
 0x964   : > { %p20_p4 = scmp.ge.s32.totalorder %s23_s25, 4  }
 0x966   :  { %22 = sbr.rel (!%p20_p4) target bundleno = 1 (0x1), region = 102 }

// kernel: ema_mae_forward.13
= control target key start
LH: loop header
LB: loop body
LE: loop exit
PB: predicated region body
PF: predicated region fallthrough
CT: control target
= control target key end

     0   :  { %s329_s9 = smov 0   ;;  %s349_s0 = inlined_call_operand.vmem [shape: f32[256,128], index: 0, kind: input, shape index: {}, may-alias: {0,2}]   ;;  %s350_s1 = inlined_call_operand.vmem [shape: f32[256,128], index: 1, kind: input, shape index: {}]   ;;  %s351_s2 = inlined_call_operand.vmem [shape: f32[256,128], index: 2, kind: output, shape index: {}, may-alias: {0,2}]  }
   0x1 LB: > { %s285_s10 = sadd.s32 4294967295, %s312_s9   ;;  %p289_p0 = scmp.ge.s32.totalorder %s312_s9, 1  ;;  %s312_s9 = sphi %s329_s9, %s12_s9  }
   0x2   : > { %p124_p1 = scmp.lt.s32.totalorder %s312_s9, 5 }
   0x4   : > { %p125_p2 = pnand %p289_p0, %p124_p1 }
   0x5   : > { %s290_s11 = sshll.u32 (!%p125_p2), %s285_s10, 3 }
   0x6   : > { %128 = sbr.rel (%p125_p2) target bundleno = 31 (0x1f), region = 28  ;;  %p152_p3 = scmp.lt.s32.totalorder (!%p125_p2), %s290_s11, 31 }
   0xb   : > { %s353_s11 = smov (!%p152_p3, %s290_s11), 31 }
   0xc   : > { %s291_s12 = sshll.u32 %s353_s11, 3 }
   0xd   : > { %s155_s15 = scalar_lea.vmem %s349_s0, %s291_s12  ;;  %s161_s18 = scalar_lea.vmem %s350_s1, %s291_s12 }
   0xe   : > { %v169_v0 = vld [vmem:[%s155_s15] sm:$0xff]  ;;  %v170_v1 = vld [vmem:[%s155_s15 + $0x8] sm:$0xff]  ;;  %v171_v2 = vld [vmem:[%s155_s15 + $0x10] sm:$0xff]  ;;  %s167_s21 = scalar_lea.vmem %s351_s2, %s291_s12 }
   0xf   : > { %v172_v3 = vld [vmem:[%s155_s15 + $0x18] sm:$0xff]  ;;  %v173_v4 = vld [vmem:[%s155_s15 + $0x20] sm:$0xff]  ;;  %v174_v5 = vld [vmem:[%s155_s15 + $0x28] sm:$0xff]  ;;  %v177_v6 = vmul.f32 0.999, %v169_v0 }
  0x10   : > { %v175_v7 = vld [vmem:[%s155_s15 + $0x30] sm:$0xff]  ;;  %v176_v8 = vld [vmem:[%s155_s15 + $0x38] sm:$0xff]  ;;  %v178_v9 = vmul.f32 0.999, %v170_v1  ;;  %v179_v10 = vmul.f32 0.999, %v171_v2 }
  0x11   : > { %v180_v11 = vmul.f32 0.999, %v172_v3  ;;  %v181_v12 = vmul.f32 0.999, %v173_v4  ;;  %v182_v13 = vmul.f32 0.999, %v174_v5 }
  0x12   : > { %v183_v14 = vmul.f32 0.999, %v175_v7  ;;  %v184_v15 = vmul.f32 0.999, %v176_v8  ;;  %v185_v16 = vld [vmem:[%s161_s18] sm:$0xff]  ;;  %v186_v17 = vld [vmem:[%s161_s18 + $0x8] sm:$0xff] }
  0x13   : > { %v187_v18 = vld [vmem:[%s161_s18 + $0x10] sm:$0xff]  ;;  %v188_v19 = vld [vmem:[%s161_s18 + $0x18] sm:$0xff]  ;;  %v189_v20 = vld [vmem:[%s161_s18 + $0x20] sm:$0xff]  ;;  %v193_v21 = vmul.f32 0.001, %v185_v16 }
  0x14   : > { %v190_v22 = vld [vmem:[%s161_s18 + $0x28] sm:$0xff]  ;;  %v191_v23 = vld [vmem:[%s161_s18 + $0x30] sm:$0xff]  ;;  %v192_v24 = vld [vmem:[%s161_s18 + $0x38] sm:$0xff]  ;;  %v194_v25 = vmul.f32 0.001, %v186_v17 }
  0x15   : > { %v195_v26 = vmul.f32 0.001, %v187_v18  ;;  %v196_v27 = vmul.f32 0.001, %v188_v19  ;;  %v197_v28 = vmul.f32 0.001, %v189_v20  ;;  %v201_v29 = vadd.f32 %v193_v21, %v177_v6 }
  0x16   : > { %v198_v30 = vmul.f32 0.001, %v190_v22  ;;  %v199_v31 = vmul.f32 0.001, %v191_v23  ;;  %v200_v32 = vmul.f32 0.001, %v192_v24  ;;  %v202_v33 = vadd.f32 %v194_v25, %v178_v9 }
  0x17   : > { %v203_v34 = vadd.f32 %v195_v26, %v179_v10  ;;  %v204_v35 = vadd.f32 %v196_v27, %v180_v11  ;;  %v205_v36 = vadd.f32 %v197_v28, %v181_v12  ;;  %209 = vst [vmem:[%s167_s21] sm:$0xff] %v201_v29 }
  0x18   : > { %v206_v37 = vadd.f32 %v198_v30, %v182_v13  ;;  %210 = vst [vmem:[%s167_s21 + $0x8] sm:$0xff] %v202_v33  ;;  %v207_v38 = vadd.f32 %v199_v31, %v183_v14  ;;  %v208_v39 = vadd.f32 %v200_v32, %v184_v15 }
  0x19   : > { %211 = vst [vmem:[%s167_s21 + $0x10] sm:$0xff] %v203_v34 }
  0x1a   : > { %212 = vst [vmem:[%s167_s21 + $0x18] sm:$0xff] %v204_v35 }
  0x1b   : > { %213 = vst [vmem:[%s167_s21 + $0x20] sm:$0xff] %v205_v36 }
  0x1c   : > { %214 = vst [vmem:[%s167_s21 + $0x28] sm:$0xff] %v206_v37 }
  0x1d   : > { %215 = vst [vmem:[%s167_s21 + $0x30] sm:$0xff] %v207_v38 }
  0x1e   : > { %216 = vst [vmem:[%s167_s21 + $0x38] sm:$0xff] %v208_v39 }
  0x1f PF: > { %s12_s9 = sadd.s32 1, %s312_s9  }
  0x20   : > { %p9_p4 = scmp.ge.s32.totalorder %s12_s9, 6  }
  0x22   :  { %11 = sbr.rel (!%p9_p4) target bundleno = 1 (0x1), region = 61 }

</bundles_post_ra>
